<compile_context>
chip_gen: v6e
topology: v6e:2x2x1
jax: 0.10.0
libtpu: 0.0.40
codegen_flags: <defaults>
</compile_context>

<pallas_src>
import functools

import jax
import jax.numpy as jnp
from jax.experimental import pallas as pl
from jax.experimental.pallas import tpu as pltpu

C_IN = 2560
C_H1 = 512
C_H2 = 128
BN_EPS = 1e-5


def _round_up(x, m):
    return ((x + m - 1) // m) * m


def _fre_encoder_kernel(x_ref, w1_ref, b1_ref, w2_ref, b2_ref, w3_ref, b3_ref,
                        o_ref):
    """One row-tile of (B*L) positions through the full 3-layer conv/BN stack."""
    x = x_ref[...]  # (TM, 2560) bf16

    # Layer 1: Conv1d(2560->512, k=1) + folded BN + ReLU   (dominant matmul)
    h1 = jnp.dot(x, w1_ref[...], preferred_element_type=jnp.float32) + b1_ref[...]
    h1 = jnp.maximum(h1, 0.0).astype(jnp.bfloat16)

    # Layer 2: Conv1d(512->128, k=1) + folded BN + ReLU
    h2 = jnp.dot(h1, w2_ref[...], preferred_element_type=jnp.float32) + b2_ref[...]
    h2 = jnp.maximum(h2, 0.0).astype(jnp.bfloat16)

    # Layer 3: Conv1d(128->fea_pad, k=1) + folded BN + Tanh (f32 epilogue, EUP)
    h3 = jnp.dot(h2, w3_ref[...], preferred_element_type=jnp.float32) + b3_ref[...]
    o_ref[...] = jnp.tanh(h3)


def _fold_bn(w, b, gamma, beta, mean, var):
    """Fold inference-mode BatchNorm1d into a 1x1 conv.

    w: (Cout, Cin) PyTorch conv weight (kernel dim squeezed), b: (Cout,).
    Returns (w_eff (Cin, Cout) bf16, b_eff (1, Cout) f32) for `x @ w_eff + b_eff`.
    """
    scale = gamma / jnp.sqrt(var + BN_EPS)                    # (Cout,)
    w_eff = (w.astype(jnp.float32) * scale[:, None]).T        # (Cin, Cout) f32
    b_eff = (b - mean) * scale + beta                         # (Cout,)
    return w_eff.astype(jnp.bfloat16), b_eff.reshape(1, -1).astype(jnp.float32)


@functools.partial(jax.jit, static_argnames=("fea_size", "tile_m"))
def fre_encoder_forward(x, params, *, fea_size, tile_m=256):
    """x: (B, C, H, W) with C*W == 2560.  Returns (B, H, fea_size) f32."""
    B, C, H, W = x.shape
    assert C * W == C_IN, f"C*W must equal {C_IN}, got {C * W}"
    L = H
    M = B * L

    # --- plain-JAX glue equivalent to PyTorch transpose(2,3) + view(B,2560,L),
    # followed by moving channels to the last (lane) axis:
    #   z[b, c*W+w, h] = x[b, c, h, w]   ==>   x2d[b*H+h, c*W+w] = x[b, c, h, w]
    xb = x.astype(jnp.bfloat16)                                # halve the HBM copy
    x2d = jnp.transpose(xb, (0, 2, 1, 3)).reshape(M, C_IN)     # (M, 2560)

    # Fold BN into the convs; bf16 weights, f32 biases.
    w1, b1 = _fold_bn(*params["layer1"])
    w2, b2 = _fold_bn(*params["layer2"])
    w3, b3 = _fold_bn(*params["layer3"])

    # Pad the output channel dim to a full lane width (128) -> unmasked stores.
    fea_pad = _round_up(fea_size, 128)
    if fea_pad != fea_size:
        w3 = jnp.pad(w3, ((0, 0), (0, fea_pad - fea_size)))
        b3 = jnp.pad(b3, ((0, 0), (0, fea_pad - fea_size)))

    # Row tiling: big tiles for MXU utilization, shrink for tiny inputs,
    # zero-pad ragged M instead of asserting divisibility.
    tile = min(tile_m, _round_up(M, 8))
    m_pad = _round_up(M, tile)
    if m_pad != M:
        x2d = jnp.pad(x2d, ((0, m_pad - M), (0, 0)))

    grid = (m_pad // tile,)
    resident = lambda i: (0, 0)  # weights/biases: same block every grid step

    flops = 2 * m_pad * (C_IN * C_H1 + C_H1 * C_H2 + C_H2 * fea_pad)
    bytes_accessed = (
        m_pad * C_IN * 2                                           # x slab (bf16)
        + (C_IN * C_H1 + C_H1 * C_H2 + C_H2 * fea_pad) * 2         # weights (bf16)
        + (C_H1 + C_H2 + fea_pad) * 4                              # biases (f32)
        + m_pad * fea_pad * 4                                      # output (f32)
    )

    out2d = pl.pallas_call(
        _fre_encoder_kernel,
        out_shape=jax.ShapeDtypeStruct((m_pad, fea_pad), jnp.float32),
        grid_spec=pltpu.PrefetchScalarGridSpec(
            num_scalar_prefetch=0,
            grid=grid,
            in_specs=[
                pl.BlockSpec((tile, C_IN), lambda i: (i, 0)),
                pl.BlockSpec((C_IN, C_H1), resident),
                pl.BlockSpec((1, C_H1), resident),
                pl.BlockSpec((C_H1, C_H2), resident),
                pl.BlockSpec((1, C_H2), resident),
                pl.BlockSpec((C_H2, fea_pad), resident),
                pl.BlockSpec((1, fea_pad), resident),
            ],
            out_specs=pl.BlockSpec((tile, fea_pad), lambda i: (i, 0)),
        ),
        compiler_params=pltpu.CompilerParams(
            dimension_semantics=("parallel",),
            vmem_limit_bytes=32 * 1024 * 1024,
        ),
        cost_estimate=pl.CostEstimate(
            flops=flops,
            transcendentals=m_pad * fea_pad,   # tanh
            bytes_accessed=bytes_accessed,
        ),
    )(x2d, w1, b1, w2, b2, w3, b3)

    # Drop row/lane padding; reshape == PyTorch transpose(1,2) output.
    return out2d[:M, :fea_size].reshape(B, L, fea_size)


def _init_params(key, fea_size):
    """Deterministic synthetic parameters matching the PyTorch module's shapes."""
    def layer(k, cin, cout):
        k1, k2, k3, k4, k5, k6 = jax.random.split(k, 6)
        w = jax.random.normal(k1, (cout, cin), jnp.float32) * 0.02   # Conv1d weight (k=1 squeezed)
        b = jax.random.normal(k2, (cout,), jnp.float32) * 0.02       # Conv1d bias
        gamma = 1.0 + 0.1 * jax.random.normal(k3, (cout,), jnp.float32)  # BN weight
        beta = 0.1 * jax.random.normal(k4, (cout,), jnp.float32)         # BN bias
        mean = 0.05 * jax.random.normal(k5, (cout,), jnp.float32)        # BN running_mean
        var = jnp.abs(1.0 + 0.1 * jax.random.normal(k6, (cout,), jnp.float32))  # running_var
        return (w, b, gamma, beta, mean, var)

    k1, k2, k3 = jax.random.split(key, 3)
    return {
        "layer1": layer(k1, C_IN, C_H1),
        "layer2": layer(k2, C_H1, C_H2),
        "layer3": layer(k3, C_H2, fea_size),
    }


def _reference_forward(x, params, fea_size):
    """Pure-JAX f32 reference mirroring the PyTorch forward (inference-mode BN)."""
    B, C, H, W = x.shape
    z = jnp.swapaxes(x, 2, 3).reshape(B, C_IN, H).astype(jnp.float32)  # (B, 2560, L)

    def conv_bn(z, p, act):
        w, b, gamma, beta, mean, var = p
        y = jnp.einsum("oc,bcl->bol", w, z) + b[None, :, None]
        y = (y - mean[None, :, None]) / jnp.sqrt(var[None, :, None] + BN_EPS)
        y = y * gamma[None, :, None] + beta[None, :, None]
        return act(y)

    z = conv_bn(z, params["layer1"], lambda v: jnp.maximum(v, 0.0))
    z = conv_bn(z, params["layer2"], lambda v: jnp.maximum(v, 0.0))
    z = conv_bn(z, params["layer3"], jnp.tanh)
    return jnp.swapaxes(z, 1, 2)                    # (B, L, fea_size)


if __name__ == "__main__":
    key = jax.random.PRNGKey(0)
    k_x, k_p = jax.random.split(key)

    FEA_SIZE = 16
    B, C, H, W = 2, 512, 8, 5                       # C*W = 2560, L = H = 8
    x = jax.random.normal(k_x, (B, C, H, W), jnp.float32)
    params = _init_params(k_p, FEA_SIZE)

    out = fre_encoder_forward(x, params, fea_size=FEA_SIZE)
    out = jax.block_until_ready(out)

    ref = _reference_forward(x, params, FEA_SIZE)
    assert out.shape == (B, H, FEA_SIZE), out.shape
    # bf16 matmul operands with f32 accumulation -> slightly looser tolerance.
    assert jnp.allclose(out, ref, atol=5e-2, rtol=5e-2), \
        f"max abs err {jnp.max(jnp.abs(out - ref))}"

    print("KERNEL_OK")
</pallas_src>

<mosaic_0001>
module attributes {stable_mosaic.version = 11 : i64} {
  func.func @_fre_encoder_kernel(%arg0: i32, %arg1: memref<16x2560xbf16, #tpu.memory_space<vmem>>, %arg2: memref<2560x512xbf16, #tpu.memory_space<vmem>>, %arg3: memref<1x512xf32, #tpu.memory_space<vmem>>, %arg4: memref<512x128xbf16, #tpu.memory_space<vmem>>, %arg5: memref<1x128xf32, #tpu.memory_space<vmem>>, %arg6: memref<128x128xbf16, #tpu.memory_space<vmem>>, %arg7: memref<1x128xf32, #tpu.memory_space<vmem>>, %arg8: memref<16x128xf32, #tpu.memory_space<vmem>>) attributes {dimension_semantics = [#tpu.dimension_semantics<parallel>], iteration_bounds = array<i64: 1>, scalar_prefetch = 0 : i64, scratch_operands = 0 : i64, tpu.core_type = #tpu.core_type<tc>, window_params = [{transform_indices = @transform_0, window_bounds = array<i64: 16, 2560>}, {pipeline_mode = #tpu.pipeline_mode<synchronous>, transform_indices = @transform_1, window_bounds = array<i64: 2560, 512>}, {pipeline_mode = #tpu.pipeline_mode<synchronous>, transform_indices = @transform_2, window_bounds = array<i64: 1, 512>}, {pipeline_mode = #tpu.pipeline_mode<synchronous>, transform_indices = @transform_3, window_bounds = array<i64: 512, 128>}, {pipeline_mode = #tpu.pipeline_mode<synchronous>, transform_indices = @transform_4, window_bounds = array<i64: 1, 128>}, {pipeline_mode = #tpu.pipeline_mode<synchronous>, transform_indices = @transform_5, window_bounds = array<i64: 128, 128>}, {pipeline_mode = #tpu.pipeline_mode<synchronous>, transform_indices = @transform_6, window_bounds = array<i64: 1, 128>}, {transform_indices = @transform_7, window_bounds = array<i64: 16, 128>}]} {
    %c0 = arith.constant 0 : index
    %c0_0 = arith.constant 0 : index
    %0 = vector.load %arg1[%c0, %c0_0] : memref<16x2560xbf16, #tpu.memory_space<vmem>>, vector<16x2560xbf16>
    %c0_1 = arith.constant 0 : index
    %c0_2 = arith.constant 0 : index
    %1 = vector.load %arg2[%c0_1, %c0_2] : memref<2560x512xbf16, #tpu.memory_space<vmem>>, vector<2560x512xbf16>
    %cst = arith.constant dense<0.000000e+00> : vector<16x512xf32>
    %2 = tpu.matmul %0, %1, %cst {dimension_numbers = #tpu.dot_dimension_numbers<[1], [0], [0], [1], [0, 0, 1, 1], [], []>} : vector<16x2560xbf16>, vector<2560x512xbf16>, vector<16x512xf32> -> vector<16x512xf32>
    %c0_3 = arith.constant 0 : index
    %c0_4 = arith.constant 0 : index
    %3 = vector.load %arg3[%c0_3, %c0_4] : memref<1x512xf32, #tpu.memory_space<vmem>>, vector<1x512xf32>
    %4 = vector.broadcast %3 : vector<1x512xf32> to vector<16x512xf32>
    %5 = arith.addf %2, %4 : vector<16x512xf32>
    %cst_5 = arith.constant 0.000000e+00 : f32
    %6 = vector.broadcast %cst_5 : f32 to vector<16x512xf32>
    %7 = arith.maximumf %5, %6 : vector<16x512xf32>
    %8 = arith.truncf %7 : vector<16x512xf32> to vector<16x512xbf16>
    %c0_6 = arith.constant 0 : index
    %c0_7 = arith.constant 0 : index
    %9 = vector.load %arg4[%c0_6, %c0_7] : memref<512x128xbf16, #tpu.memory_space<vmem>>, vector<512x128xbf16>
    %cst_8 = arith.constant dense<0.000000e+00> : vector<16x128xf32>
    %10 = tpu.matmul %8, %9, %cst_8 {dimension_numbers = #tpu.dot_dimension_numbers<[1], [0], [0], [1], [0, 0, 1, 1], [], []>} : vector<16x512xbf16>, vector<512x128xbf16>, vector<16x128xf32> -> vector<16x128xf32>
    %c0_9 = arith.constant 0 : index
    %c0_10 = arith.constant 0 : index
    %11 = vector.load %arg5[%c0_9, %c0_10] : memref<1x128xf32, #tpu.memory_space<vmem>>, vector<1x128xf32>
    %12 = vector.broadcast %11 : vector<1x128xf32> to vector<16x128xf32>
    %13 = arith.addf %10, %12 : vector<16x128xf32>
    %cst_11 = arith.constant 0.000000e+00 : f32
    %14 = vector.broadcast %cst_11 : f32 to vector<16x128xf32>
    %15 = arith.maximumf %13, %14 : vector<16x128xf32>
    %16 = arith.truncf %15 : vector<16x128xf32> to vector<16x128xbf16>
    %c0_12 = arith.constant 0 : index
    %c0_13 = arith.constant 0 : index
    %17 = vector.load %arg6[%c0_12, %c0_13] : memref<128x128xbf16, #tpu.memory_space<vmem>>, vector<128x128xbf16>
    %cst_14 = arith.constant dense<0.000000e+00> : vector<16x128xf32>
    %18 = tpu.matmul %16, %17, %cst_14 {dimension_numbers = #tpu.dot_dimension_numbers<[1], [0], [0], [1], [0, 0, 1, 1], [], []>} : vector<16x128xbf16>, vector<128x128xbf16>, vector<16x128xf32> -> vector<16x128xf32>
    %c0_15 = arith.constant 0 : index
    %c0_16 = arith.constant 0 : index
    %19 = vector.load %arg7[%c0_15, %c0_16] : memref<1x128xf32, #tpu.memory_space<vmem>>, vector<1x128xf32>
    %20 = vector.broadcast %19 : vector<1x128xf32> to vector<16x128xf32>
    %21 = arith.addf %18, %20 : vector<16x128xf32>
    %22 = math.tanh %21 : vector<16x128xf32>
    %c0_17 = arith.constant 0 : index
    %c0_18 = arith.constant 0 : index
    %23 = vector.load %arg8[%c0_17, %c0_18] : memref<16x128xf32, #tpu.memory_space<vmem>>, vector<16x128xf32>
    tpu.vector_store %arg8[%c0_17, %c0_18], %22 {strides = array<i32>} : memref<16x128xf32, #tpu.memory_space<vmem>>, vector<16x128xf32>,
    return
  }
  func.func @transform_0(%arg0: i32) -> (i32, i32) {
    %c0_i32 = arith.constant 0 : i32
    %c0_i32_0 = arith.constant 0 : i32
    return %arg0, %c0_i32 : i32, i32
  }
  func.func @transform_1(%arg0: i32) -> (i32, i32) {
    %c0_i32 = arith.constant 0 : i32
    %c0_i32_0 = arith.constant 0 : i32
    %c0_i32_1 = arith.constant 0 : i32
    return %c0_i32, %c0_i32_0 : i32, i32
  }
  func.func @transform_2(%arg0: i32) -> (i32, i32) {
    %c0_i32 = arith.constant 0 : i32
    %c0_i32_0 = arith.constant 0 : i32
    %c0_i32_1 = arith.constant 0 : i32
    return %c0_i32, %c0_i32_0 : i32, i32
  }
  func.func @transform_3(%arg0: i32) -> (i32, i32) {
    %c0_i32 = arith.constant 0 : i32
    %c0_i32_0 = arith.constant 0 : i32
    %c0_i32_1 = arith.constant 0 : i32
    return %c0_i32, %c0_i32_0 : i32, i32
  }
  func.func @transform_4(%arg0: i32) -> (i32, i32) {
    %c0_i32 = arith.constant 0 : i32
    %c0_i32_0 = arith.constant 0 : i32
    %c0_i32_1 = arith.constant 0 : i32
    return %c0_i32, %c0_i32_0 : i32, i32
  }
  func.func @transform_5(%arg0: i32) -> (i32, i32) {
    %c0_i32 = arith.constant 0 : i32
    %c0_i32_0 = arith.constant 0 : i32
    %c0_i32_1 = arith.constant 0 : i32
    return %c0_i32, %c0_i32_0 : i32, i32
  }
  func.func @transform_6(%arg0: i32) -> (i32, i32) {
    %c0_i32 = arith.constant 0 : i32
    %c0_i32_0 = arith.constant 0 : i32
    %c0_i32_1 = arith.constant 0 : i32
    return %c0_i32, %c0_i32_0 : i32, i32
  }
  func.func @transform_7(%arg0: i32) -> (i32, i32) {
    %c0_i32 = arith.constant 0 : i32
    %c0_i32_0 = arith.constant 0 : i32
    return %arg0, %c0_i32 : i32, i32
  }
}

</mosaic_0001>

<bundles_post_ra>
// kernel: fre_encoder_forward.1
= control target key start
LH: loop header
LB: loop body
LE: loop exit
PB: predicated region body
PF: predicated region fallthrough
CT: control target
= control target key end

     0   :  { %vm7181_vm0 = vmmov 0   ;;  %s9514_s1 = inlined_call_operand.vmem [shape: bf16[2560,512], index: 1, kind: input, shape index: {}]   ;;  %s9515_s0 = inlined_call_operand.vmem [shape: bf16[16,2560], index: 0, kind: input, shape index: {}]   ;;  %s9516_s3 = inlined_call_operand.vmem [shape: bf16[512,128], index: 3, kind: input, shape index: {}]   ;;  %s9517_s2 = inlined_call_operand.vmem [shape: f32[1,512], index: 2, kind: input, shape index: {}]   ;;  %s9518_s5 = inlined_call_operand.vmem [shape: bf16[128,128], index: 5, kind: input, shape index: {}]   ;;  %s9519_s4 = inlined_call_operand.vmem [shape: f32[1,128], index: 4, kind: input, shape index: {}]   ;;  %s9520_s6 = inlined_call_operand.vmem [shape: f32[1,128], index: 6, kind: input, shape index: {}]   ;;  %s9521_s7 = inlined_call_operand.vmem [shape: f32[16,128], index: 7, kind: output, shape index: {}]  }
   0x1   :  { %v6126_v0 = vld [vmem:[%s9514_s1 + $0xe4] ss:$16 sps:$4 sm:$0xff]   ;;  %v6130_v2 = vld [vmem:[%s9514_s1 + $0xe0] ss:$16 sps:$4 sm:$0xff]   ;;  %v6227_v51 = vld [vmem:[%s9515_s0 + $0xc] ss:$80 sps:$4 sm:$0xff]  }
   0x2   :  { %v6128_v1 = vld [vmem:[%s9514_s1 + $0x2e4] ss:$16 sps:$4 sm:$0xff]   ;;  %4009 = vmatprep.subr.bf16.mxu0 %v6126_v0  ;;  %v6131_v3 = vld [vmem:[%s9514_s1 + $0x2e0] ss:$16 sps:$4 sm:$0xff]   ;;  %4084 = vmatprep.mubr.bf16.mxu1 %v6227_v51 }
   0x3   :  { %4052 = vmatprep.subr.bf16.mxu1 %v6128_v1  ;;  %v6132_v4 = vld [vmem:[%s9514_s1 + $0xc4] ss:$16 sps:$4 sm:$0xff]   ;;  %4010 = vmatpush1.bf16.msra.mxu0 %v6130_v2  ;;  %v6136_v6 = vld [vmem:[%s9514_s1 + $0xc0] ss:$16 sps:$4 sm:$0xff]  }
   0x4   :  { %4053 = vmatpush1.bf16.msra.mxu1 %v6131_v3  ;;  %v6134_v5 = vld [vmem:[%s9514_s1 + $0x2c4] ss:$16 sps:$4 sm:$0xff]   ;;  %4011 = vmatprep.subr.bf16.mxu0 %v6132_v4  ;;  %v6137_v7 = vld [vmem:[%s9514_s1 + $0x2c0] ss:$16 sps:$4 sm:$0xff]  }
   0x5   :  { %4054 = vmatprep.subr.bf16.mxu1 %v6134_v5  ;;  %v6138_v8 = vld [vmem:[%s9514_s1 + $0xa4] ss:$16 sps:$4 sm:$0xff]   ;;  %v6142_v10 = vld [vmem:[%s9514_s1 + $0xa0] ss:$16 sps:$4 sm:$0xff]   ;;  %v6225_v5 = vld [vmem:[%s9515_s0 + $0x8] ss:$80 sps:$4 sm:$0xff]  }
   0x6   :  { %v6140_v9 = vld [vmem:[%s9514_s1 + $0x2a4] ss:$16 sps:$4 sm:$0xff]   ;;  %v6143_v11 = vld [vmem:[%s9514_s1 + $0x2a0] ss:$16 sps:$4 sm:$0xff]  }
   0x7   :  { %4012 = vmatpush1.bf16.msra.mxu0 %v6136_v6  ;;  %v6144_v12 = vld [vmem:[%s9514_s1 + $0x84] ss:$16 sps:$4 sm:$0xff]   ;;  %v6148_v14 = vld [vmem:[%s9514_s1 + $0x80] ss:$16 sps:$4 sm:$0xff]  }
   0x8   :  { %4055 = vmatpush1.bf16.msra.mxu1 %v6137_v7  ;;  %4013 = vmatprep.subr.bf16.mxu0 %v6138_v8  ;;  %v6146_v13 = vld [vmem:[%s9514_s1 + $0x284] ss:$16 sps:$4 sm:$0xff]   ;;  %v6149_v15 = vld [vmem:[%s9514_s1 + $0x280] ss:$16 sps:$4 sm:$0xff]  }
   0x9   :  { %4056 = vmatprep.subr.bf16.mxu1 %v6140_v9  ;;  %v6150_v16 = vld [vmem:[%s9514_s1 + $0x64] ss:$16 sps:$4 sm:$0xff]   ;;  %v6154_v18 = vld [vmem:[%s9514_s1 + $0x60] ss:$16 sps:$4 sm:$0xff]  }
   0xa   :  { %v6152_v17 = vld [vmem:[%s9514_s1 + $0x264] ss:$16 sps:$4 sm:$0xff]   ;;  %v6155_v19 = vld [vmem:[%s9514_s1 + $0x260] ss:$16 sps:$4 sm:$0xff]  }
   0xb   :  { %4014 = vmatpush1.bf16.msra.mxu0 %v6142_v10  ;;  %v6156_v20 = vld [vmem:[%s9514_s1 + $0x44] ss:$16 sps:$4 sm:$0xff]   ;;  %v6160_v22 = vld [vmem:[%s9514_s1 + $0x40] ss:$16 sps:$4 sm:$0xff]  }
   0xc   :  { %4057 = vmatpush1.bf16.msra.mxu1 %v6143_v11  ;;  %4015 = vmatprep.subr.bf16.mxu0 %v6144_v12  ;;  %v6158_v21 = vld [vmem:[%s9514_s1 + $0x244] ss:$16 sps:$4 sm:$0xff]   ;;  %v6161_v23 = vld [vmem:[%s9514_s1 + $0x240] ss:$16 sps:$4 sm:$0xff]  }
   0xd   :  { %4058 = vmatprep.subr.bf16.mxu1 %v6146_v13  ;;  %v6162_v24 = vld [vmem:[%s9514_s1 + $0x24] ss:$16 sps:$4 sm:$0xff]   ;;  %v6166_v26 = vld [vmem:[%s9514_s1 + $0x20] ss:$16 sps:$4 sm:$0xff]  }
   0xe   :  { %v6164_v25 = vld [vmem:[%s9514_s1 + $0x224] ss:$16 sps:$4 sm:$0xff]   ;;  %v6167_v27 = vld [vmem:[%s9514_s1 + $0x220] ss:$16 sps:$4 sm:$0xff]  }
   0xf   :  { %4016 = vmatpush1.bf16.msra.mxu0 %v6148_v14  ;;  %v6168_v28 = vld [vmem:[%s9514_s1 + $0x4] ss:$16 sps:$4 sm:$0xff]   ;;  %v6172_v30 = vld [vmem:[%s9514_s1] ss:$16 sps:$4 sm:$0xff]  }
  0x10   :  { %4059 = vmatpush1.bf16.msra.mxu1 %v6149_v15  ;;  %4017 = vmatprep.subr.bf16.mxu0 %v6150_v16  ;;  %v6170_v29 = vld [vmem:[%s9514_s1 + $0x204] ss:$16 sps:$4 sm:$0xff]   ;;  %v6173_v31 = vld [vmem:[%s9514_s1 + $0x200] ss:$16 sps:$4 sm:$0xff]  }
  0x11   :  { %4060 = vmatprep.subr.bf16.mxu1 %v6152_v17  ;;  %v6174_v32 = vld [vmem:[%s9514_s1 + $0x1e4] ss:$16 sps:$4 sm:$0xff]   ;;  %v6178_v34 = vld [vmem:[%s9514_s1 + $0x1e0] ss:$16 sps:$4 sm:$0xff]  }
  0x12   :  { %v6176_v33 = vld [vmem:[%s9514_s1 + $0x3e4] ss:$16 sps:$4 sm:$0xff]   ;;  %v6179_v35 = vld [vmem:[%s9514_s1 + $0x3e0] ss:$16 sps:$4 sm:$0xff]  }
  0x13   :  { %4018 = vmatpush1.bf16.msra.mxu0 %v6154_v18  ;;  %v6180_v36 = vld [vmem:[%s9514_s1 + $0x1c4] ss:$16 sps:$4 sm:$0xff]   ;;  %v6184_v38 = vld [vmem:[%s9514_s1 + $0x1c0] ss:$16 sps:$4 sm:$0xff]  }
  0x14   :  { %4061 = vmatpush1.bf16.msra.mxu1 %v6155_v19  ;;  %4019 = vmatprep.subr.bf16.mxu0 %v6156_v20  ;;  %v6182_v37 = vld [vmem:[%s9514_s1 + $0x3c4] ss:$16 sps:$4 sm:$0xff]   ;;  %v6185_v39 = vld [vmem:[%s9514_s1 + $0x3c0] ss:$16 sps:$4 sm:$0xff]  }
  0x15   :  { %4062 = vmatprep.subr.bf16.mxu1 %v6158_v21  ;;  %v6186_v40 = vld [vmem:[%s9514_s1 + $0x1a4] ss:$16 sps:$4 sm:$0xff]   ;;  %v6190_v42 = vld [vmem:[%s9514_s1 + $0x1a0] ss:$16 sps:$4 sm:$0xff]  }
  0x16   :  { %v6188_v41 = vld [vmem:[%s9514_s1 + $0x3a4] ss:$16 sps:$4 sm:$0xff]   ;;  %v6191_v43 = vld [vmem:[%s9514_s1 + $0x3a0] ss:$16 sps:$4 sm:$0xff]  }
  0x17   :  { %4020 = vmatpush1.bf16.msra.mxu0 %v6160_v22  ;;  %v6192_v44 = vld [vmem:[%s9514_s1 + $0x184] ss:$16 sps:$4 sm:$0xff]   ;;  %v6196_v46 = vld [vmem:[%s9514_s1 + $0x180] ss:$16 sps:$4 sm:$0xff]  }
  0x18   :  { %4063 = vmatpush1.bf16.msra.mxu1 %v6161_v23  ;;  %4021 = vmatprep.subr.bf16.mxu0 %v6162_v24  ;;  %v6194_v45 = vld [vmem:[%s9514_s1 + $0x384] ss:$16 sps:$4 sm:$0xff]   ;;  %v6197_v47 = vld [vmem:[%s9514_s1 + $0x380] ss:$16 sps:$4 sm:$0xff]  }
  0x19   :  { %4064 = vmatprep.subr.bf16.mxu1 %v6164_v25  ;;  %v6198_v48 = vld [vmem:[%s9514_s1 + $0x164] ss:$16 sps:$4 sm:$0xff]   ;;  %v6202_v52 = vld [vmem:[%s9514_s1 + $0x160] ss:$16 sps:$4 sm:$0xff]  }
  0x1a   :  { %v6224_v49 = vld [vmem:[%s9515_s0 + $0x4] ss:$80 sps:$4 sm:$0xff]   ;;  %v6203_v53 = vld [vmem:[%s9514_s1 + $0x360] ss:$16 sps:$4 sm:$0xff]  }
  0x1b   :  { %4022 = vmatpush1.bf16.msra.mxu0 %v6166_v26  ;;  %v6200_v50 = vld [vmem:[%s9514_s1 + $0x364] ss:$16 sps:$4 sm:$0xff]   ;;  %4041 = vmatprep.mubr.bf16.mxu0 %v6224_v49  ;;  %v6208_v56 = vld [vmem:[%s9514_s1 + $0x140] ss:$16 sps:$4 sm:$0xff]  }
  0x1c   :  { %4065 = vmatpush1.bf16.msra.mxu1 %v6167_v27  ;;  %4023 = vmatprep.subr.bf16.mxu0 %v6168_v28  ;;  %v6204_v54 = vld [vmem:[%s9514_s1 + $0x144] ss:$16 sps:$4 sm:$0xff]   ;;  %v6209_v57 = vld [vmem:[%s9514_s1 + $0x340] ss:$16 sps:$4 sm:$0xff]  }
  0x1d   :  { %4066 = vmatprep.subr.bf16.mxu1 %v6170_v29  ;;  %v6206_v55 = vld [vmem:[%s9514_s1 + $0x344] ss:$16 sps:$4 sm:$0xff]   ;;  %v6214_v60 = vld [vmem:[%s9514_s1 + $0x120] ss:$16 sps:$4 sm:$0xff]  }
  0x1e   :  { %v6210_v58 = vld [vmem:[%s9514_s1 + $0x124] ss:$16 sps:$4 sm:$0xff]   ;;  %v6215_v61 = vld [vmem:[%s9514_s1 + $0x320] ss:$16 sps:$4 sm:$0xff]  }
  0x1f   :  { %4024 = vmatpush1.bf16.msra.mxu0 %v6172_v30  ;;  %v6212_v59 = vld [vmem:[%s9514_s1 + $0x324] ss:$16 sps:$4 sm:$0xff]   ;;  %v6220_v0 = vld [vmem:[%s9514_s1 + $0x100] ss:$16 sps:$4 sm:$0xff]  }
  0x20   :  { %4067 = vmatpush1.bf16.msra.mxu1 %v6173_v31  ;;  %4025 = vmatprep.subr.bf16.mxu0 %v6174_v32  ;;  %v6216_v62 = vld [vmem:[%s9514_s1 + $0x104] ss:$16 sps:$4 sm:$0xff]   ;;  %v6221_v1 = vld [vmem:[%s9514_s1 + $0x300] ss:$16 sps:$4 sm:$0xff]  }
  0x21   :  { %4068 = vmatprep.subr.bf16.mxu1 %v6176_v33  ;;  %v6218_v63 = vld [vmem:[%s9514_s1 + $0x304] ss:$16 sps:$4 sm:$0xff]   ;;  %v6222_v4 = vld [vmem:[%s9515_s0] ss:$80 sps:$4 sm:$0xff]  }
  0x22   :  { %v6230_v2 = vld [vmem:[%s9514_s1 + $0x4e4] ss:$16 sps:$4 sm:$0xff]   ;;  %v6228_v6 = vld [vmem:[%s9514_s1 + $0x4e0] ss:$16 sps:$4 sm:$0xff]  }
  0x23   :  { %4026 = vmatpush2.bf16.msra.mxu0 %v6178_v34  ;;  %v6233_v3 = vld [vmem:[%s9514_s1 + $0x6e4] ss:$16 sps:$4 sm:$0xff]   ;;  %v6231_v7 = vld [vmem:[%s9514_s1 + $0x6e0] ss:$16 sps:$4 sm:$0xff]  }
  0x24   :  { %4069 = vmatpush2.bf16.msra.mxu1 %v6179_v35  ;;  %4027 = vmatprep.subr.bf16.mxu0 %v6180_v36  ;;  %v6236_v8 = vld [vmem:[%s9514_s1 + $0x4c4] ss:$16 sps:$4 sm:$0xff]   ;;  %v6234_v10 = vld [vmem:[%s9514_s1 + $0x4c0] ss:$16 sps:$4 sm:$0xff]   ;;  %v6329_v35 = vld [vmem:[%s9515_s0 + $0x1c] ss:$80 sps:$4 sm:$0xff]  }
  0x25   :  { %4070 = vmatprep.subr.bf16.mxu1 %v6182_v37  ;;  %v6239_v9 = vld [vmem:[%s9514_s1 + $0x6c4] ss:$16 sps:$4 sm:$0xff]   ;;  %v6237_v11 = vld [vmem:[%s9514_s1 + $0x6c0] ss:$16 sps:$4 sm:$0xff]  }
  0x26   :  { %v6242_v12 = vld [vmem:[%s9514_s1 + $0x4a4] ss:$16 sps:$4 sm:$0xff]   ;;  %v6240_v14 = vld [vmem:[%s9514_s1 + $0x4a0] ss:$16 sps:$4 sm:$0xff]  }
  0x27   :  { %4028 = vmatpush2.bf16.msra.mxu0 %v6184_v38  ;;  %v6245_v13 = vld [vmem:[%s9514_s1 + $0x6a4] ss:$16 sps:$4 sm:$0xff]   ;;  %v6243_v15 = vld [vmem:[%s9514_s1 + $0x6a0] ss:$16 sps:$4 sm:$0xff]  }
  0x28   :  { %4071 = vmatpush2.bf16.msra.mxu1 %v6185_v39  ;;  %4029 = vmatprep.subr.bf16.mxu0 %v6186_v40  ;;  %v6248_v16 = vld [vmem:[%s9514_s1 + $0x484] ss:$16 sps:$4 sm:$0xff]   ;;  %v6246_v18 = vld [vmem:[%s9514_s1 + $0x480] ss:$16 sps:$4 sm:$0xff]  }
  0x29   :  { %4072 = vmatprep.subr.bf16.mxu1 %v6188_v41  ;;  %v6251_v17 = vld [vmem:[%s9514_s1 + $0x684] ss:$16 sps:$4 sm:$0xff]   ;;  %v6249_v19 = vld [vmem:[%s9514_s1 + $0x680] ss:$16 sps:$4 sm:$0xff]  }
  0x2a   :  { %v6254_v20 = vld [vmem:[%s9514_s1 + $0x464] ss:$16 sps:$4 sm:$0xff]   ;;  %v6252_v22 = vld [vmem:[%s9514_s1 + $0x460] ss:$16 sps:$4 sm:$0xff]  }
  0x2b   :  { %4030 = vmatpush2.bf16.msra.mxu0 %v6190_v42  ;;  %v6257_v21 = vld [vmem:[%s9514_s1 + $0x664] ss:$16 sps:$4 sm:$0xff]   ;;  %v6255_v23 = vld [vmem:[%s9514_s1 + $0x660] ss:$16 sps:$4 sm:$0xff]  }
  0x2c   :  { %4073 = vmatpush2.bf16.msra.mxu1 %v6191_v43  ;;  %4031 = vmatprep.subr.bf16.mxu0 %v6192_v44  ;;  %v6260_v24 = vld [vmem:[%s9514_s1 + $0x444] ss:$16 sps:$4 sm:$0xff]   ;;  %v6258_v26 = vld [vmem:[%s9514_s1 + $0x440] ss:$16 sps:$4 sm:$0xff]  }
  0x2d   :  { %4074 = vmatprep.subr.bf16.mxu1 %v6194_v45  ;;  %v6263_v25 = vld [vmem:[%s9514_s1 + $0x644] ss:$16 sps:$4 sm:$0xff]   ;;  %v6261_v27 = vld [vmem:[%s9514_s1 + $0x640] ss:$16 sps:$4 sm:$0xff]  }
  0x2e   :  { %v6266_v28 = vld [vmem:[%s9514_s1 + $0x424] ss:$16 sps:$4 sm:$0xff]   ;;  %v6264_v30 = vld [vmem:[%s9514_s1 + $0x420] ss:$16 sps:$4 sm:$0xff]  }
  0x2f   :  { %4032 = vmatpush2.bf16.msra.mxu0 %v6196_v46  ;;  %v6269_v29 = vld [vmem:[%s9514_s1 + $0x624] ss:$16 sps:$4 sm:$0xff]   ;;  %v6267_v31 = vld [vmem:[%s9514_s1 + $0x620] ss:$16 sps:$4 sm:$0xff]  }
  0x30   :  { %4075 = vmatpush2.bf16.msra.mxu1 %v6197_v47  ;;  %4033 = vmatprep.subr.bf16.mxu0 %v6198_v48  ;;  %v6272_v32 = vld [vmem:[%s9514_s1 + $0x404] ss:$16 sps:$4 sm:$0xff]   ;;  %v6270_v36 = vld [vmem:[%s9514_s1 + $0x400] ss:$16 sps:$4 sm:$0xff]  }
  0x31   :  { %4076 = vmatprep.subr.bf16.mxu1 %v6200_v50  ;;  %v6275_v33 = vld [vmem:[%s9514_s1 + $0x604] ss:$16 sps:$4 sm:$0xff]   ;;  %v6273_v37 = vld [vmem:[%s9514_s1 + $0x600] ss:$16 sps:$4 sm:$0xff]  }
  0x32   :  { %v6326_v34 = vld [vmem:[%s9515_s0 + $0x14] ss:$80 sps:$4 sm:$0xff]   ;;  %v6276_v40 = vld [vmem:[%s9514_s1 + $0x5e0] ss:$16 sps:$4 sm:$0xff]  }
  0x33   :  { %4034 = vmatpush2.bf16.msra.mxu0 %v6202_v52  ;;  %v6278_v38 = vld [vmem:[%s9514_s1 + $0x5e4] ss:$16 sps:$4 sm:$0xff]   ;;  %v6279_v41 = vld [vmem:[%s9514_s1 + $0x7e0] ss:$16 sps:$4 sm:$0xff]  }
  0x34   :  { %4077 = vmatpush2.bf16.msra.mxu1 %v6203_v53  ;;  %4035 = vmatprep.subr.bf16.mxu0 %v6204_v54  ;;  %v6281_v39 = vld [vmem:[%s9514_s1 + $0x7e4] ss:$16 sps:$4 sm:$0xff]   ;;  %v6282_v44 = vld [vmem:[%s9514_s1 + $0x5c0] ss:$16 sps:$4 sm:$0xff]  }
  0x35   :  { %4078 = vmatprep.subr.bf16.mxu1 %v6206_v55  ;;  %v6284_v42 = vld [vmem:[%s9514_s1 + $0x5c4] ss:$16 sps:$4 sm:$0xff]   ;;  %v6285_v45 = vld [vmem:[%s9514_s1 + $0x7c0] ss:$16 sps:$4 sm:$0xff]  }
  0x36   :  { %v6287_v43 = vld [vmem:[%s9514_s1 + $0x7c4] ss:$16 sps:$4 sm:$0xff]   ;;  %v6288_v48 = vld [vmem:[%s9514_s1 + $0x5a0] ss:$16 sps:$4 sm:$0xff]  }
  0x37   :  { %4036 = vmatpush2.bf16.msra.mxu0 %v6208_v56  ;;  %v6290_v46 = vld [vmem:[%s9514_s1 + $0x5a4] ss:$16 sps:$4 sm:$0xff]   ;;  %v6291_v49 = vld [vmem:[%s9514_s1 + $0x7a0] ss:$16 sps:$4 sm:$0xff]  }
  0x38   :  { %4079 = vmatpush2.bf16.msra.mxu1 %v6209_v57  ;;  %4037 = vmatprep.subr.bf16.mxu0 %v6210_v58  ;;  %v6293_v47 = vld [vmem:[%s9514_s1 + $0x7a4] ss:$16 sps:$4 sm:$0xff]   ;;  %v6294_v52 = vld [vmem:[%s9514_s1 + $0x580] ss:$16 sps:$4 sm:$0xff]  }
  0x39   :  { %4080 = vmatprep.subr.bf16.mxu1 %v6212_v59  ;;  %v6296_v50 = vld [vmem:[%s9514_s1 + $0x584] ss:$16 sps:$4 sm:$0xff]   ;;  %v6297_v53 = vld [vmem:[%s9514_s1 + $0x780] ss:$16 sps:$4 sm:$0xff]  }
  0x3a   :  { %v6299_v51 = vld [vmem:[%s9514_s1 + $0x784] ss:$16 sps:$4 sm:$0xff]   ;;  %v6300_v56 = vld [vmem:[%s9514_s1 + $0x560] ss:$16 sps:$4 sm:$0xff]  }
  0x3b   :  { %4038 = vmatpush2.bf16.msra.mxu0 %v6214_v60  ;;  %v6302_v54 = vld [vmem:[%s9514_s1 + $0x564] ss:$16 sps:$4 sm:$0xff]   ;;  %v6303_v57 = vld [vmem:[%s9514_s1 + $0x760] ss:$16 sps:$4 sm:$0xff]  }
  0x3c   :  { %4081 = vmatpush2.bf16.msra.mxu1 %v6215_v61  ;;  %4039 = vmatprep.subr.bf16.mxu0 %v6216_v62  ;;  %v6305_v55 = vld [vmem:[%s9514_s1 + $0x764] ss:$16 sps:$4 sm:$0xff]   ;;  %v6306_v60 = vld [vmem:[%s9514_s1 + $0x540] ss:$16 sps:$4 sm:$0xff]  }
  0x3d   :  { %4082 = vmatprep.subr.bf16.mxu1 %v6218_v63  ;;  %v6308_v58 = vld [vmem:[%s9514_s1 + $0x544] ss:$16 sps:$4 sm:$0xff]   ;;  %v6309_v61 = vld [vmem:[%s9514_s1 + $0x740] ss:$16 sps:$4 sm:$0xff]  }
  0x3e   :  { %v6311_v59 = vld [vmem:[%s9514_s1 + $0x744] ss:$16 sps:$4 sm:$0xff]  }
  0x3f   :  { %4040 = vmatpush2.bf16.msra.mxu0 %v6220_v0  ;;  %v6314_v62 = vld [vmem:[%s9514_s1 + $0x524] ss:$16 sps:$4 sm:$0xff]   ;;  %v6312_v0 = vld [vmem:[%s9514_s1 + $0x520] ss:$16 sps:$4 sm:$0xff]  }
  0x40   :  { %4083 = vmatpush2.bf16.msra.mxu1 %v6221_v1  ;;  %4095 = vmatprep.subr.bf16.mxu0 %v6230_v2  ;;  %v6317_v63 = vld [vmem:[%s9514_s1 + $0x724] ss:$16 sps:$4 sm:$0xff]   ;;  %v6315_v1 = vld [vmem:[%s9514_s1 + $0x720] ss:$16 sps:$4 sm:$0xff]  }
  0x41   :  { %4138 = vmatprep.subr.bf16.mxu1 %v6233_v3  ;;  %v6320_v2 = vld [vmem:[%s9514_s1 + $0x504] ss:$16 sps:$4 sm:$0xff]  }
  0x42   :  { %4042 = vmatmul.mubr.bf16.vlgmr.msra.gmra.mxu0 %v6222_v4  ;;  %v6323_v3 = vld [vmem:[%s9514_s1 + $0x704] ss:$16 sps:$4 sm:$0xff]   ;;  %v6318_v4 = vld [vmem:[%s9514_s1 + $0x500] ss:$16 sps:$4 sm:$0xff]  }
  0x43   :  { %4085 = vmatmul.mubr.bf16.vlgmr.msra.gmra.mxu1 %v6225_v5  ;;  %4096 = vmatpush1.bf16.msra.mxu0 %v6228_v6  ;;  %v6321_v5 = vld [vmem:[%s9514_s1 + $0x700] ss:$16 sps:$4 sm:$0xff]   ;;  %v6332_v6 = vld [vmem:[%s9514_s1 + $0x8e4] ss:$16 sps:$4 sm:$0xff]  }
  0x44   :  { %4139 = vmatpush1.bf16.msra.mxu1 %v6231_v7  ;;  %4097 = vmatprep.subr.bf16.mxu0 %v6236_v8  ;;  %v6335_v7 = vld [vmem:[%s9514_s1 + $0xae4] ss:$16 sps:$4 sm:$0xff]   ;;  %v6324_v8 = vld [vmem:[%s9515_s0 + $0x10] ss:$80 sps:$4 sm:$0xff]  }
  0x45   :  { %4140 = vmatprep.subr.bf16.mxu1 %v6239_v9  ;;  %4127 = vmatprep.mubr.bf16.mxu0 %v6326_v34  ;;  %v6327_v9 = vld [vmem:[%s9515_s0 + $0x18] ss:$80 sps:$4 sm:$0xff]   ;;  %v6368_v34 = vld [vmem:[%s9514_s1 + $0x824] ss:$16 sps:$4 sm:$0xff]  }
  0x46   :  { %4170 = vmatprep.mubr.bf16.mxu1 %v6329_v35  ;;  %v6371_v35 = vld [vmem:[%s9514_s1 + $0xa24] ss:$16 sps:$4 sm:$0xff]  }
  0x47   :  { %4098 = vmatpush1.bf16.msra.mxu0 %v6234_v10  ;;  %v6330_v10 = vld [vmem:[%s9514_s1 + $0x8e0] ss:$16 sps:$4 sm:$0xff]  }
  0x48   :  { %4141 = vmatpush1.bf16.msra.mxu1 %v6237_v11  ;;  %4099 = vmatprep.subr.bf16.mxu0 %v6242_v12  ;;  %v6333_v11 = vld [vmem:[%s9514_s1 + $0xae0] ss:$16 sps:$4 sm:$0xff]   ;;  %v6338_v12 = vld [vmem:[%s9514_s1 + $0x8c4] ss:$16 sps:$4 sm:$0xff]  }
  0x49   :  { %4142 = vmatprep.subr.bf16.mxu1 %v6245_v13  ;;  %v6341_v13 = vld [vmem:[%s9514_s1 + $0xac4] ss:$16 sps:$4 sm:$0xff]  }
  0x4b   :  { %4100 = vmatpush1.bf16.msra.mxu0 %v6240_v14  ;;  %v6336_v14 = vld [vmem:[%s9514_s1 + $0x8c0] ss:$16 sps:$4 sm:$0xff]  }
  0x4c   :  { %4143 = vmatpush1.bf16.msra.mxu1 %v6243_v15  ;;  %4101 = vmatprep.subr.bf16.mxu0 %v6248_v16  ;;  %v6339_v15 = vld [vmem:[%s9514_s1 + $0xac0] ss:$16 sps:$4 sm:$0xff]   ;;  %v6344_v16 = vld [vmem:[%s9514_s1 + $0x8a4] ss:$16 sps:$4 sm:$0xff]  }
  0x4d   :  { %4144 = vmatprep.subr.bf16.mxu1 %v6251_v17  ;;  %v6347_v17 = vld [vmem:[%s9514_s1 + $0xaa4] ss:$16 sps:$4 sm:$0xff]  }
  0x4f   :  { %4102 = vmatpush1.bf16.msra.mxu0 %v6246_v18  ;;  %v6342_v18 = vld [vmem:[%s9514_s1 + $0x8a0] ss:$16 sps:$4 sm:$0xff]  }
  0x50   :  { %4145 = vmatpush1.bf16.msra.mxu1 %v6249_v19  ;;  %4103 = vmatprep.subr.bf16.mxu0 %v6254_v20  ;;  %v6428_v19 = vld [vmem:[%s9515_s0 + $0x24] ss:$80 sps:$4 sm:$0xff]   ;;  %v6345_v20 = vld [vmem:[%s9514_s1 + $0xaa0] ss:$16 sps:$4 sm:$0xff]  }
  0x51   :  { %4146 = vmatprep.subr.bf16.mxu1 %v6257_v21  ;;  %v6431_v21 = vld [vmem:[%s9515_s0 + $0x2c] ss:$80 sps:$4 sm:$0xff]  }
  0x53   :  { %4104 = vmatpush1.bf16.msra.mxu0 %v6252_v22  ;;  %v6350_v22 = vld [vmem:[%s9514_s1 + $0x884] ss:$16 sps:$4 sm:$0xff]  }
  0x54   :  { %4147 = vmatpush1.bf16.msra.mxu1 %v6255_v23  ;;  %4105 = vmatprep.subr.bf16.mxu0 %v6260_v24  ;;  %v6353_v23 = vld [vmem:[%s9514_s1 + $0xa84] ss:$16 sps:$4 sm:$0xff]   ;;  %v6348_v24 = vld [vmem:[%s9514_s1 + $0x880] ss:$16 sps:$4 sm:$0xff]  }
  0x55   :  { %4148 = vmatprep.subr.bf16.mxu1 %v6263_v25  ;;  %v6351_v25 = vld [vmem:[%s9514_s1 + $0xa80] ss:$16 sps:$4 sm:$0xff]  }
  0x57   :  { %4106 = vmatpush1.bf16.msra.mxu0 %v6258_v26  ;;  %v6356_v26 = vld [vmem:[%s9514_s1 + $0x864] ss:$16 sps:$4 sm:$0xff]  }
  0x58   :  { %4149 = vmatpush1.bf16.msra.mxu1 %v6261_v27  ;;  %4107 = vmatprep.subr.bf16.mxu0 %v6266_v28  ;;  %v6359_v27 = vld [vmem:[%s9514_s1 + $0xa64] ss:$16 sps:$4 sm:$0xff]   ;;  %v6354_v28 = vld [vmem:[%s9514_s1 + $0x860] ss:$16 sps:$4 sm:$0xff]  }
  0x59   :  { %4150 = vmatprep.subr.bf16.mxu1 %v6269_v29  ;;  %v6357_v29 = vld [vmem:[%s9514_s1 + $0xa60] ss:$16 sps:$4 sm:$0xff]  }
  0x5b   :  { %4108 = vmatpush1.bf16.msra.mxu0 %v6264_v30  ;;  %v6362_v30 = vld [vmem:[%s9514_s1 + $0x844] ss:$16 sps:$4 sm:$0xff]  }
  0x5c   :  { %4151 = vmatpush1.bf16.msra.mxu1 %v6267_v31  ;;  %4109 = vmatprep.subr.bf16.mxu0 %v6272_v32  ;;  %v6365_v31 = vld [vmem:[%s9514_s1 + $0xa44] ss:$16 sps:$4 sm:$0xff]   ;;  %v6360_v32 = vld [vmem:[%s9514_s1 + $0x840] ss:$16 sps:$4 sm:$0xff]  }
  0x5d   :  { %4152 = vmatprep.subr.bf16.mxu1 %v6275_v33  ;;  %v6363_v33 = vld [vmem:[%s9514_s1 + $0xa40] ss:$16 sps:$4 sm:$0xff]  }
  0x5f   :  { %4110 = vmatpush1.bf16.msra.mxu0 %v6270_v36  ;;  %v6366_v36 = vld [vmem:[%s9514_s1 + $0x820] ss:$16 sps:$4 sm:$0xff]  }
  0x60   :  { %4153 = vmatpush1.bf16.msra.mxu1 %v6273_v37  ;;  %4111 = vmatprep.subr.bf16.mxu0 %v6278_v38  ;;  %v6369_v37 = vld [vmem:[%s9514_s1 + $0xa20] ss:$16 sps:$4 sm:$0xff]   ;;  %v6374_v38 = vld [vmem:[%s9514_s1 + $0x804] ss:$16 sps:$4 sm:$0xff]  }
  0x61   :  { %4154 = vmatprep.subr.bf16.mxu1 %v6281_v39  ;;  %v6377_v39 = vld [vmem:[%s9514_s1 + $0xa04] ss:$16 sps:$4 sm:$0xff]  }
  0x63   :  { %4112 = vmatpush2.bf16.msra.mxu0 %v6276_v40  ;;  %v6372_v40 = vld [vmem:[%s9514_s1 + $0x800] ss:$16 sps:$4 sm:$0xff]  }
  0x64   :  { %4155 = vmatpush2.bf16.msra.mxu1 %v6279_v41  ;;  %4113 = vmatprep.subr.bf16.mxu0 %v6284_v42  ;;  %v6375_v41 = vld [vmem:[%s9514_s1 + $0xa00] ss:$16 sps:$4 sm:$0xff]   ;;  %v6380_v42 = vld [vmem:[%s9514_s1 + $0x9e4] ss:$16 sps:$4 sm:$0xff]  }
  0x65   :  { %4156 = vmatprep.subr.bf16.mxu1 %v6287_v43  ;;  %v6383_v43 = vld [vmem:[%s9514_s1 + $0xbe4] ss:$16 sps:$4 sm:$0xff]  }
  0x67   :  { %4114 = vmatpush2.bf16.msra.mxu0 %v6282_v44  ;;  %v6378_v44 = vld [vmem:[%s9514_s1 + $0x9e0] ss:$16 sps:$4 sm:$0xff]  }
  0x68   :  { %4157 = vmatpush2.bf16.msra.mxu1 %v6285_v45  ;;  %4115 = vmatprep.subr.bf16.mxu0 %v6290_v46  ;;  %v6381_v45 = vld [vmem:[%s9514_s1 + $0xbe0] ss:$16 sps:$4 sm:$0xff]   ;;  %v6386_v46 = vld [vmem:[%s9514_s1 + $0x9c4] ss:$16 sps:$4 sm:$0xff]  }
  0x69   :  { %4158 = vmatprep.subr.bf16.mxu1 %v6293_v47  ;;  %v6389_v47 = vld [vmem:[%s9514_s1 + $0xbc4] ss:$16 sps:$4 sm:$0xff]  }
  0x6b   :  { %4116 = vmatpush2.bf16.msra.mxu0 %v6288_v48  ;;  %v6384_v48 = vld [vmem:[%s9514_s1 + $0x9c0] ss:$16 sps:$4 sm:$0xff]  }
  0x6c   :  { %4159 = vmatpush2.bf16.msra.mxu1 %v6291_v49  ;;  %4117 = vmatprep.subr.bf16.mxu0 %v6296_v50  ;;  %v6387_v49 = vld [vmem:[%s9514_s1 + $0xbc0] ss:$16 sps:$4 sm:$0xff]   ;;  %v6392_v50 = vld [vmem:[%s9514_s1 + $0x9a4] ss:$16 sps:$4 sm:$0xff]  }
  0x6d   :  { %4160 = vmatprep.subr.bf16.mxu1 %v6299_v51  ;;  %v6395_v51 = vld [vmem:[%s9514_s1 + $0xba4] ss:$16 sps:$4 sm:$0xff]  }
  0x6f   :  { %4118 = vmatpush2.bf16.msra.mxu0 %v6294_v52  ;;  %v6390_v52 = vld [vmem:[%s9514_s1 + $0x9a0] ss:$16 sps:$4 sm:$0xff]  }
  0x70   :  { %4161 = vmatpush2.bf16.msra.mxu1 %v6297_v53  ;;  %4119 = vmatprep.subr.bf16.mxu0 %v6302_v54  ;;  %v6393_v53 = vld [vmem:[%s9514_s1 + $0xba0] ss:$16 sps:$4 sm:$0xff]   ;;  %v6398_v54 = vld [vmem:[%s9514_s1 + $0x984] ss:$16 sps:$4 sm:$0xff]  }
  0x71   :  { %4162 = vmatprep.subr.bf16.mxu1 %v6305_v55  ;;  %v6401_v55 = vld [vmem:[%s9514_s1 + $0xb84] ss:$16 sps:$4 sm:$0xff]  }
  0x73   :  { %4120 = vmatpush2.bf16.msra.mxu0 %v6300_v56  ;;  %v6396_v56 = vld [vmem:[%s9514_s1 + $0x980] ss:$16 sps:$4 sm:$0xff]  }
  0x74   :  { %4163 = vmatpush2.bf16.msra.mxu1 %v6303_v57  ;;  %4121 = vmatprep.subr.bf16.mxu0 %v6308_v58  ;;  %v6399_v57 = vld [vmem:[%s9514_s1 + $0xb80] ss:$16 sps:$4 sm:$0xff]   ;;  %v6404_v58 = vld [vmem:[%s9514_s1 + $0x964] ss:$16 sps:$4 sm:$0xff]  }
  0x75   :  { %4164 = vmatprep.subr.bf16.mxu1 %v6311_v59  ;;  %v6407_v59 = vld [vmem:[%s9514_s1 + $0xb64] ss:$16 sps:$4 sm:$0xff]  }
  0x77   :  { %4122 = vmatpush2.bf16.msra.mxu0 %v6306_v60  ;;  %v6402_v60 = vld [vmem:[%s9514_s1 + $0x960] ss:$16 sps:$4 sm:$0xff]  }
  0x78   :  { %4165 = vmatpush2.bf16.msra.mxu1 %v6309_v61  ;;  %4123 = vmatprep.subr.bf16.mxu0 %v6314_v62  ;;  %v6405_v61 = vld [vmem:[%s9514_s1 + $0xb60] ss:$16 sps:$4 sm:$0xff]   ;;  %v6410_v62 = vld [vmem:[%s9514_s1 + $0x944] ss:$16 sps:$4 sm:$0xff]  }
  0x79   :  { %4166 = vmatprep.subr.bf16.mxu1 %v6317_v63  ;;  %v6413_v63 = vld [vmem:[%s9514_s1 + $0xb44] ss:$16 sps:$4 sm:$0xff]  }
  0x7b   :  { %4124 = vmatpush2.bf16.msra.mxu0 %v6312_v0  ;;  %v6408_v0 = vld [vmem:[%s9514_s1 + $0x940] ss:$16 sps:$4 sm:$0xff]  }
  0x7c   :  { %4167 = vmatpush2.bf16.msra.mxu1 %v6315_v1  ;;  %4125 = vmatprep.subr.bf16.mxu0 %v6320_v2  ;;  %v6411_v1 = vld [vmem:[%s9514_s1 + $0xb40] ss:$16 sps:$4 sm:$0xff]   ;;  %v6416_v2 = vld [vmem:[%s9514_s1 + $0x924] ss:$16 sps:$4 sm:$0xff]  }
  0x7d   :  { %4168 = vmatprep.subr.bf16.mxu1 %v6323_v3  ;;  %v6419_v3 = vld [vmem:[%s9514_s1 + $0xb24] ss:$16 sps:$4 sm:$0xff]  }
  0x7f   :  { %4126 = vmatpush2.bf16.msra.mxu0 %v6318_v4  ;;  %v6414_v4 = vld [vmem:[%s9514_s1 + $0x920] ss:$16 sps:$4 sm:$0xff]  }
  0x80   :  { %4169 = vmatpush2.bf16.msra.mxu1 %v6321_v5  ;;  %4181 = vmatprep.subr.bf16.mxu0 %v6332_v6  ;;  %v6417_v5 = vld [vmem:[%s9514_s1 + $0xb20] ss:$16 sps:$4 sm:$0xff]   ;;  %v6422_v6 = vld [vmem:[%s9514_s1 + $0x904] ss:$16 sps:$4 sm:$0xff]  }
  0x81   :  { %4224 = vmatprep.subr.bf16.mxu1 %v6335_v7  ;;  %v6425_v7 = vld [vmem:[%s9514_s1 + $0xb04] ss:$16 sps:$4 sm:$0xff]  }
  0x82   :  { %4128 = vmatmul.mubr.bf16.vlgmr.msra.gmra.mxu0 %v6324_v8  ;;  %v6420_v8 = vld [vmem:[%s9514_s1 + $0x900] ss:$16 sps:$4 sm:$0xff]  }
  0x83   :  { %4171 = vmatmul.mubr.bf16.vlgmr.msra.gmra.mxu1 %v6327_v9  ;;  %4182 = vmatpush1.bf16.msra.mxu0 %v6330_v10  ;;  %v6423_v9 = vld [vmem:[%s9514_s1 + $0xb00] ss:$16 sps:$4 sm:$0xff]   ;;  %v6434_v10 = vld [vmem:[%s9514_s1 + $0xce4] ss:$16 sps:$4 sm:$0xff]  }
  0x84   :  { %4225 = vmatpush1.bf16.msra.mxu1 %v6333_v11  ;;  %4183 = vmatprep.subr.bf16.mxu0 %v6338_v12  ;;  %v6437_v11 = vld [vmem:[%s9514_s1 + $0xee4] ss:$16 sps:$4 sm:$0xff]   ;;  %v6426_v12 = vld [vmem:[%s9515_s0 + $0x20] ss:$80 sps:$4 sm:$0xff]  }
  0x85   :  { %4226 = vmatprep.subr.bf16.mxu1 %v6341_v13  ;;  %4213 = vmatprep.mubr.bf16.mxu0 %v6428_v19  ;;  %v6429_v13 = vld [vmem:[%s9515_s0 + $0x28] ss:$80 sps:$4 sm:$0xff]   ;;  %v6533_v19 = vld [vmem:[%s9515_s0 + $0x3c] ss:$80 sps:$4 sm:$0xff]  }
  0x86   :  { %4256 = vmatprep.mubr.bf16.mxu1 %v6431_v21  ;;  %v6441_v21 = vld [vmem:[%s9514_s1 + $0xec0] ss:$16 sps:$4 sm:$0xff]  }
  0x87   :  { %4184 = vmatpush1.bf16.msra.mxu0 %v6336_v14  ;;  %v6432_v14 = vld [vmem:[%s9514_s1 + $0xce0] ss:$16 sps:$4 sm:$0xff]  }
  0x88   :  { %4227 = vmatpush1.bf16.msra.mxu1 %v6339_v15  ;;  %4185 = vmatprep.subr.bf16.mxu0 %v6344_v16  ;;  %v6435_v15 = vld [vmem:[%s9514_s1 + $0xee0] ss:$16 sps:$4 sm:$0xff]   ;;  %v6440_v16 = vld [vmem:[%s9514_s1 + $0xcc4] ss:$16 sps:$4 sm:$0xff]  }
  0x89   :  { %4228 = vmatprep.subr.bf16.mxu1 %v6347_v17  ;;  %v6443_v17 = vld [vmem:[%s9514_s1 + $0xec4] ss:$16 sps:$4 sm:$0xff]  }
  0x8b   :  { %4186 = vmatpush1.bf16.msra.mxu0 %v6342_v18  ;;  %v6530_v18 = vld [vmem:[%s9515_s0 + $0x34] ss:$80 sps:$4 sm:$0xff]  }
  0x8c   :  { %4229 = vmatpush1.bf16.msra.mxu1 %v6345_v20  ;;  %4187 = vmatprep.subr.bf16.mxu0 %v6350_v22  ;;  %v6438_v20 = vld [vmem:[%s9514_s1 + $0xcc0] ss:$16 sps:$4 sm:$0xff]   ;;  %v6446_v22 = vld [vmem:[%s9514_s1 + $0xca4] ss:$16 sps:$4 sm:$0xff]  }
  0x8d   :  { %4230 = vmatprep.subr.bf16.mxu1 %v6353_v23  ;;  %v6449_v23 = vld [vmem:[%s9514_s1 + $0xea4] ss:$16 sps:$4 sm:$0xff]  }
  0x8f   :  { %4188 = vmatpush1.bf16.msra.mxu0 %v6348_v24  ;;  %v6444_v24 = vld [vmem:[%s9514_s1 + $0xca0] ss:$16 sps:$4 sm:$0xff]  }
  0x90   :  { %4231 = vmatpush1.bf16.msra.mxu1 %v6351_v25  ;;  %4189 = vmatprep.subr.bf16.mxu0 %v6356_v26  ;;  %v6447_v25 = vld [vmem:[%s9514_s1 + $0xea0] ss:$16 sps:$4 sm:$0xff]   ;;  %v6452_v26 = vld [vmem:[%s9514_s1 + $0xc84] ss:$16 sps:$4 sm:$0xff]  }
  0x91   :  { %4232 = vmatprep.subr.bf16.mxu1 %v6359_v27  ;;  %v6455_v27 = vld [vmem:[%s9514_s1 + $0xe84] ss:$16 sps:$4 sm:$0xff]  }
  0x93   :  { %4190 = vmatpush1.bf16.msra.mxu0 %v6354_v28  ;;  %v6450_v28 = vld [vmem:[%s9514_s1 + $0xc80] ss:$16 sps:$4 sm:$0xff]  }
  0x94   :  { %4233 = vmatpush1.bf16.msra.mxu1 %v6357_v29  ;;  %4191 = vmatprep.subr.bf16.mxu0 %v6362_v30  ;;  %v6453_v29 = vld [vmem:[%s9514_s1 + $0xe80] ss:$16 sps:$4 sm:$0xff]   ;;  %v6458_v30 = vld [vmem:[%s9514_s1 + $0xc64] ss:$16 sps:$4 sm:$0xff]  }
  0x95   :  { %4234 = vmatprep.subr.bf16.mxu1 %v6365_v31  ;;  %v6461_v31 = vld [vmem:[%s9514_s1 + $0xe64] ss:$16 sps:$4 sm:$0xff]  }
  0x97   :  { %4192 = vmatpush1.bf16.msra.mxu0 %v6360_v32  ;;  %v6456_v32 = vld [vmem:[%s9514_s1 + $0xc60] ss:$16 sps:$4 sm:$0xff]  }
  0x98   :  { %4235 = vmatpush1.bf16.msra.mxu1 %v6363_v33  ;;  %4193 = vmatprep.subr.bf16.mxu0 %v6368_v34  ;;  %v6459_v33 = vld [vmem:[%s9514_s1 + $0xe60] ss:$16 sps:$4 sm:$0xff]   ;;  %v6464_v34 = vld [vmem:[%s9514_s1 + $0xc44] ss:$16 sps:$4 sm:$0xff]  }
  0x99   :  { %4236 = vmatprep.subr.bf16.mxu1 %v6371_v35  ;;  %v6467_v35 = vld [vmem:[%s9514_s1 + $0xe44] ss:$16 sps:$4 sm:$0xff]  }
  0x9b   :  { %4194 = vmatpush1.bf16.msra.mxu0 %v6366_v36  ;;  %v6462_v36 = vld [vmem:[%s9514_s1 + $0xc40] ss:$16 sps:$4 sm:$0xff]  }
  0x9c   :  { %4237 = vmatpush1.bf16.msra.mxu1 %v6369_v37  ;;  %4195 = vmatprep.subr.bf16.mxu0 %v6374_v38  ;;  %v6465_v37 = vld [vmem:[%s9514_s1 + $0xe40] ss:$16 sps:$4 sm:$0xff]   ;;  %v6470_v38 = vld [vmem:[%s9514_s1 + $0xc24] ss:$16 sps:$4 sm:$0xff]  }
  0x9d   :  { %4238 = vmatprep.subr.bf16.mxu1 %v6377_v39  ;;  %v6473_v39 = vld [vmem:[%s9514_s1 + $0xe24] ss:$16 sps:$4 sm:$0xff]  }
  0x9f   :  { %4196 = vmatpush1.bf16.msra.mxu0 %v6372_v40  ;;  %v6468_v40 = vld [vmem:[%s9514_s1 + $0xc20] ss:$16 sps:$4 sm:$0xff]  }
  0xa0   :  { %4239 = vmatpush1.bf16.msra.mxu1 %v6375_v41  ;;  %4197 = vmatprep.subr.bf16.mxu0 %v6380_v42  ;;  %v6471_v41 = vld [vmem:[%s9514_s1 + $0xe20] ss:$16 sps:$4 sm:$0xff]   ;;  %v6476_v42 = vld [vmem:[%s9514_s1 + $0xc04] ss:$16 sps:$4 sm:$0xff]  }
  0xa1   :  { %4240 = vmatprep.subr.bf16.mxu1 %v6383_v43  ;;  %v6479_v43 = vld [vmem:[%s9514_s1 + $0xe04] ss:$16 sps:$4 sm:$0xff]  }
  0xa3   :  { %4198 = vmatpush2.bf16.msra.mxu0 %v6378_v44  ;;  %v6474_v44 = vld [vmem:[%s9514_s1 + $0xc00] ss:$16 sps:$4 sm:$0xff]  }
  0xa4   :  { %4241 = vmatpush2.bf16.msra.mxu1 %v6381_v45  ;;  %4199 = vmatprep.subr.bf16.mxu0 %v6386_v46  ;;  %v6477_v45 = vld [vmem:[%s9514_s1 + $0xe00] ss:$16 sps:$4 sm:$0xff]   ;;  %v6482_v46 = vld [vmem:[%s9514_s1 + $0xde4] ss:$16 sps:$4 sm:$0xff]  }
  0xa5   :  { %4242 = vmatprep.subr.bf16.mxu1 %v6389_v47  ;;  %v6485_v47 = vld [vmem:[%s9514_s1 + $0xfe4] ss:$16 sps:$4 sm:$0xff]  }
  0xa7   :  { %4200 = vmatpush2.bf16.msra.mxu0 %v6384_v48  ;;  %v6480_v48 = vld [vmem:[%s9514_s1 + $0xde0] ss:$16 sps:$4 sm:$0xff]  }
  0xa8   :  { %4243 = vmatpush2.bf16.msra.mxu1 %v6387_v49  ;;  %4201 = vmatprep.subr.bf16.mxu0 %v6392_v50  ;;  %v6483_v49 = vld [vmem:[%s9514_s1 + $0xfe0] ss:$16 sps:$4 sm:$0xff]   ;;  %v6488_v50 = vld [vmem:[%s9514_s1 + $0xdc4] ss:$16 sps:$4 sm:$0xff]  }
  0xa9   :  { %4244 = vmatprep.subr.bf16.mxu1 %v6395_v51  ;;  %v6491_v51 = vld [vmem:[%s9514_s1 + $0xfc4] ss:$16 sps:$4 sm:$0xff]  }
  0xab   :  { %4202 = vmatpush2.bf16.msra.mxu0 %v6390_v52  ;;  %v6486_v52 = vld [vmem:[%s9514_s1 + $0xdc0] ss:$16 sps:$4 sm:$0xff]  }
  0xac   :  { %4245 = vmatpush2.bf16.msra.mxu1 %v6393_v53  ;;  %4203 = vmatprep.subr.bf16.mxu0 %v6398_v54  ;;  %v6489_v53 = vld [vmem:[%s9514_s1 + $0xfc0] ss:$16 sps:$4 sm:$0xff]   ;;  %v6494_v54 = vld [vmem:[%s9514_s1 + $0xda4] ss:$16 sps:$4 sm:$0xff]  }
  0xad   :  { %4246 = vmatprep.subr.bf16.mxu1 %v6401_v55  ;;  %v6497_v55 = vld [vmem:[%s9514_s1 + $0xfa4] ss:$16 sps:$4 sm:$0xff]  }
  0xaf   :  { %4204 = vmatpush2.bf16.msra.mxu0 %v6396_v56  ;;  %v6492_v56 = vld [vmem:[%s9514_s1 + $0xda0] ss:$16 sps:$4 sm:$0xff]  }
  0xb0   :  { %4247 = vmatpush2.bf16.msra.mxu1 %v6399_v57  ;;  %4205 = vmatprep.subr.bf16.mxu0 %v6404_v58  ;;  %v6495_v57 = vld [vmem:[%s9514_s1 + $0xfa0] ss:$16 sps:$4 sm:$0xff]   ;;  %v6500_v58 = vld [vmem:[%s9514_s1 + $0xd84] ss:$16 sps:$4 sm:$0xff]  }
  0xb1   :  { %4248 = vmatprep.subr.bf16.mxu1 %v6407_v59  ;;  %v6503_v59 = vld [vmem:[%s9514_s1 + $0xf84] ss:$16 sps:$4 sm:$0xff]  }
  0xb3   :  { %4206 = vmatpush2.bf16.msra.mxu0 %v6402_v60  ;;  %v6498_v60 = vld [vmem:[%s9514_s1 + $0xd80] ss:$16 sps:$4 sm:$0xff]  }
  0xb4   :  { %4249 = vmatpush2.bf16.msra.mxu1 %v6405_v61  ;;  %4207 = vmatprep.subr.bf16.mxu0 %v6410_v62  ;;  %v6501_v61 = vld [vmem:[%s9514_s1 + $0xf80] ss:$16 sps:$4 sm:$0xff]   ;;  %v6506_v62 = vld [vmem:[%s9514_s1 + $0xd64] ss:$16 sps:$4 sm:$0xff]  }
  0xb5   :  { %4250 = vmatprep.subr.bf16.mxu1 %v6413_v63  ;;  %v6509_v63 = vld [vmem:[%s9514_s1 + $0xf64] ss:$16 sps:$4 sm:$0xff]  }
  0xb7   :  { %4208 = vmatpush2.bf16.msra.mxu0 %v6408_v0  ;;  %v6504_v0 = vld [vmem:[%s9514_s1 + $0xd60] ss:$16 sps:$4 sm:$0xff]  }
  0xb8   :  { %4251 = vmatpush2.bf16.msra.mxu1 %v6411_v1  ;;  %4209 = vmatprep.subr.bf16.mxu0 %v6416_v2  ;;  %v6507_v1 = vld [vmem:[%s9514_s1 + $0xf60] ss:$16 sps:$4 sm:$0xff]   ;;  %v6512_v2 = vld [vmem:[%s9514_s1 + $0xd44] ss:$16 sps:$4 sm:$0xff]  }
  0xb9   :  { %4252 = vmatprep.subr.bf16.mxu1 %v6419_v3  ;;  %v6515_v3 = vld [vmem:[%s9514_s1 + $0xf44] ss:$16 sps:$4 sm:$0xff]  }
  0xbb   :  { %4210 = vmatpush2.bf16.msra.mxu0 %v6414_v4  ;;  %v6510_v4 = vld [vmem:[%s9514_s1 + $0xd40] ss:$16 sps:$4 sm:$0xff]  }
  0xbc   :  { %4253 = vmatpush2.bf16.msra.mxu1 %v6417_v5  ;;  %4211 = vmatprep.subr.bf16.mxu0 %v6422_v6  ;;  %v6513_v5 = vld [vmem:[%s9514_s1 + $0xf40] ss:$16 sps:$4 sm:$0xff]   ;;  %v6518_v6 = vld [vmem:[%s9514_s1 + $0xd24] ss:$16 sps:$4 sm:$0xff]  }
  0xbd   :  { %4254 = vmatprep.subr.bf16.mxu1 %v6425_v7  ;;  %v6521_v7 = vld [vmem:[%s9514_s1 + $0xf24] ss:$16 sps:$4 sm:$0xff]  }
  0xbf   :  { %4212 = vmatpush2.bf16.msra.mxu0 %v6420_v8  ;;  %v6516_v8 = vld [vmem:[%s9514_s1 + $0xd20] ss:$16 sps:$4 sm:$0xff]  }
  0xc0   :  { %4255 = vmatpush2.bf16.msra.mxu1 %v6423_v9  ;;  %4267 = vmatprep.subr.bf16.mxu0 %v6434_v10  ;;  %v6519_v9 = vld [vmem:[%s9514_s1 + $0xf20] ss:$16 sps:$4 sm:$0xff]   ;;  %v6524_v10 = vld [vmem:[%s9514_s1 + $0xd04] ss:$16 sps:$4 sm:$0xff]  }
  0xc1   :  { %4310 = vmatprep.subr.bf16.mxu1 %v6437_v11  ;;  %v6527_v11 = vld [vmem:[%s9514_s1 + $0xf04] ss:$16 sps:$4 sm:$0xff]  }
  0xc2   :  { %4214 = vmatmul.mubr.bf16.vlgmr.msra.gmra.mxu0 %v6426_v12  ;;  %v6522_v12 = vld [vmem:[%s9514_s1 + $0xd00] ss:$16 sps:$4 sm:$0xff]  }
  0xc3   :  { %4257 = vmatmul.mubr.bf16.vlgmr.msra.gmra.mxu1 %v6429_v13  ;;  %4268 = vmatpush1.bf16.msra.mxu0 %v6432_v14  ;;  %v6525_v13 = vld [vmem:[%s9514_s1 + $0xf00] ss:$16 sps:$4 sm:$0xff]   ;;  %v6536_v14 = vld [vmem:[%s9514_s1 + $0x10e4] ss:$16 sps:$4 sm:$0xff]  }
  0xc4   :  { %4311 = vmatpush1.bf16.msra.mxu1 %v6435_v15  ;;  %4269 = vmatprep.subr.bf16.mxu0 %v6440_v16  ;;  %v6539_v15 = vld [vmem:[%s9514_s1 + $0x12e4] ss:$16 sps:$4 sm:$0xff]   ;;  %v6528_v16 = vld [vmem:[%s9515_s0 + $0x30] ss:$80 sps:$4 sm:$0xff]  }
  0xc5   :  { %4312 = vmatprep.subr.bf16.mxu1 %v6443_v17  ;;  %4299 = vmatprep.mubr.bf16.mxu0 %v6530_v18  ;;  %v6531_v17 = vld [vmem:[%s9515_s0 + $0x38] ss:$80 sps:$4 sm:$0xff]   ;;  %v6534_v18 = vld [vmem:[%s9514_s1 + $0x10e0] ss:$16 sps:$4 sm:$0xff]  }
  0xc6   :  { %4342 = vmatprep.mubr.bf16.mxu1 %v6533_v19  ;;  %v6537_v19 = vld [vmem:[%s9514_s1 + $0x12e0] ss:$16 sps:$4 sm:$0xff]  }
  0xc7   :  { %4270 = vmatpush1.bf16.msra.mxu0 %v6438_v20  ;;  %v6542_v20 = vld [vmem:[%s9514_s1 + $0x10c4] ss:$16 sps:$4 sm:$0xff]  }
  0xc8   :  { %4313 = vmatpush1.bf16.msra.mxu1 %v6441_v21  ;;  %4271 = vmatprep.subr.bf16.mxu0 %v6446_v22  ;;  %v6545_v21 = vld [vmem:[%s9514_s1 + $0x12c4] ss:$16 sps:$4 sm:$0xff]  }
  0xc9   :  { %4314 = vmatprep.subr.bf16.mxu1 %v6449_v23  ;;  %v6632_v22 = vld [vmem:[%s9515_s0 + $0x44] ss:$80 sps:$4 sm:$0xff]   ;;  %v6635_v23 = vld [vmem:[%s9515_s0 + $0x4c] ss:$80 sps:$4 sm:$0xff]  }
  0xcb   :  { %4272 = vmatpush1.bf16.msra.mxu0 %v6444_v24  ;;  %v6540_v24 = vld [vmem:[%s9514_s1 + $0x10c0] ss:$16 sps:$4 sm:$0xff]  }
  0xcc   :  { %4315 = vmatpush1.bf16.msra.mxu1 %v6447_v25  ;;  %4273 = vmatprep.subr.bf16.mxu0 %v6452_v26  ;;  %v6543_v25 = vld [vmem:[%s9514_s1 + $0x12c0] ss:$16 sps:$4 sm:$0xff]   ;;  %v6548_v26 = vld [vmem:[%s9514_s1 + $0x10a4] ss:$16 sps:$4 sm:$0xff]  }
  0xcd   :  { %4316 = vmatprep.subr.bf16.mxu1 %v6455_v27  ;;  %v6551_v27 = vld [vmem:[%s9514_s1 + $0x12a4] ss:$16 sps:$4 sm:$0xff]  }
  0xcf   :  { %4274 = vmatpush1.bf16.msra.mxu0 %v6450_v28  ;;  %v6546_v28 = vld [vmem:[%s9514_s1 + $0x10a0] ss:$16 sps:$4 sm:$0xff]  }
  0xd0   :  { %4317 = vmatpush1.bf16.msra.mxu1 %v6453_v29  ;;  %4275 = vmatprep.subr.bf16.mxu0 %v6458_v30  ;;  %v6549_v29 = vld [vmem:[%s9514_s1 + $0x12a0] ss:$16 sps:$4 sm:$0xff]   ;;  %v6554_v30 = vld [vmem:[%s9514_s1 + $0x1084] ss:$16 sps:$4 sm:$0xff]  }
  0xd1   :  { %4318 = vmatprep.subr.bf16.mxu1 %v6461_v31  ;;  %v6557_v31 = vld [vmem:[%s9514_s1 + $0x1284] ss:$16 sps:$4 sm:$0xff]  }
  0xd3   :  { %4276 = vmatpush1.bf16.msra.mxu0 %v6456_v32  ;;  %v6552_v32 = vld [vmem:[%s9514_s1 + $0x1080] ss:$16 sps:$4 sm:$0xff]  }
  0xd4   :  { %4319 = vmatpush1.bf16.msra.mxu1 %v6459_v33  ;;  %4277 = vmatprep.subr.bf16.mxu0 %v6464_v34  ;;  %v6555_v33 = vld [vmem:[%s9514_s1 + $0x1280] ss:$16 sps:$4 sm:$0xff]   ;;  %v6560_v34 = vld [vmem:[%s9514_s1 + $0x1064] ss:$16 sps:$4 sm:$0xff]  }
  0xd5   :  { %4320 = vmatprep.subr.bf16.mxu1 %v6467_v35  ;;  %v6563_v35 = vld [vmem:[%s9514_s1 + $0x1264] ss:$16 sps:$4 sm:$0xff]  }
  0xd7   :  { %4278 = vmatpush1.bf16.msra.mxu0 %v6462_v36  ;;  %v6558_v36 = vld [vmem:[%s9514_s1 + $0x1060] ss:$16 sps:$4 sm:$0xff]  }
  0xd8   :  { %4321 = vmatpush1.bf16.msra.mxu1 %v6465_v37  ;;  %4279 = vmatprep.subr.bf16.mxu0 %v6470_v38  ;;  %v6561_v37 = vld [vmem:[%s9514_s1 + $0x1260] ss:$16 sps:$4 sm:$0xff]   ;;  %v6566_v38 = vld [vmem:[%s9514_s1 + $0x1044] ss:$16 sps:$4 sm:$0xff]  }
  0xd9   :  { %4322 = vmatprep.subr.bf16.mxu1 %v6473_v39  ;;  %v6569_v39 = vld [vmem:[%s9514_s1 + $0x1244] ss:$16 sps:$4 sm:$0xff]  }
  0xdb   :  { %4280 = vmatpush1.bf16.msra.mxu0 %v6468_v40  ;;  %v6564_v40 = vld [vmem:[%s9514_s1 + $0x1040] ss:$16 sps:$4 sm:$0xff]  }
  0xdc   :  { %4323 = vmatpush1.bf16.msra.mxu1 %v6471_v41  ;;  %4281 = vmatprep.subr.bf16.mxu0 %v6476_v42  ;;  %v6567_v41 = vld [vmem:[%s9514_s1 + $0x1240] ss:$16 sps:$4 sm:$0xff]   ;;  %v6572_v42 = vld [vmem:[%s9514_s1 + $0x1024] ss:$16 sps:$4 sm:$0xff]  }
  0xdd   :  { %4324 = vmatprep.subr.bf16.mxu1 %v6479_v43  ;;  %v6575_v43 = vld [vmem:[%s9514_s1 + $0x1224] ss:$16 sps:$4 sm:$0xff]  }
  0xdf   :  { %4282 = vmatpush1.bf16.msra.mxu0 %v6474_v44  ;;  %v6570_v44 = vld [vmem:[%s9514_s1 + $0x1020] ss:$16 sps:$4 sm:$0xff]  }
  0xe0   :  { %4325 = vmatpush1.bf16.msra.mxu1 %v6477_v45  ;;  %4283 = vmatprep.subr.bf16.mxu0 %v6482_v46  ;;  %v6573_v45 = vld [vmem:[%s9514_s1 + $0x1220] ss:$16 sps:$4 sm:$0xff]   ;;  %v6578_v46 = vld [vmem:[%s9514_s1 + $0x1004] ss:$16 sps:$4 sm:$0xff]  }
  0xe1   :  { %4326 = vmatprep.subr.bf16.mxu1 %v6485_v47  ;;  %v6581_v47 = vld [vmem:[%s9514_s1 + $0x1204] ss:$16 sps:$4 sm:$0xff]  }
  0xe3   :  { %4284 = vmatpush2.bf16.msra.mxu0 %v6480_v48  ;;  %v6576_v48 = vld [vmem:[%s9514_s1 + $0x1000] ss:$16 sps:$4 sm:$0xff]  }
  0xe4   :  { %4327 = vmatpush2.bf16.msra.mxu1 %v6483_v49  ;;  %4285 = vmatprep.subr.bf16.mxu0 %v6488_v50  ;;  %v6579_v49 = vld [vmem:[%s9514_s1 + $0x1200] ss:$16 sps:$4 sm:$0xff]   ;;  %v6584_v50 = vld [vmem:[%s9514_s1 + $0x11e4] ss:$16 sps:$4 sm:$0xff]  }
  0xe5   :  { %4328 = vmatprep.subr.bf16.mxu1 %v6491_v51  ;;  %v6587_v51 = vld [vmem:[%s9514_s1 + $0x13e4] ss:$16 sps:$4 sm:$0xff]  }
  0xe7   :  { %4286 = vmatpush2.bf16.msra.mxu0 %v6486_v52  ;;  %v6582_v52 = vld [vmem:[%s9514_s1 + $0x11e0] ss:$16 sps:$4 sm:$0xff]  }
  0xe8   :  { %4329 = vmatpush2.bf16.msra.mxu1 %v6489_v53  ;;  %4287 = vmatprep.subr.bf16.mxu0 %v6494_v54  ;;  %v6585_v53 = vld [vmem:[%s9514_s1 + $0x13e0] ss:$16 sps:$4 sm:$0xff]   ;;  %v6590_v54 = vld [vmem:[%s9514_s1 + $0x11c4] ss:$16 sps:$4 sm:$0xff]  }
  0xe9   :  { %4330 = vmatprep.subr.bf16.mxu1 %v6497_v55  ;;  %v6593_v55 = vld [vmem:[%s9514_s1 + $0x13c4] ss:$16 sps:$4 sm:$0xff]  }
  0xeb   :  { %4288 = vmatpush2.bf16.msra.mxu0 %v6492_v56  ;;  %v6588_v56 = vld [vmem:[%s9514_s1 + $0x11c0] ss:$16 sps:$4 sm:$0xff]  }
  0xec   :  { %4331 = vmatpush2.bf16.msra.mxu1 %v6495_v57  ;;  %4289 = vmatprep.subr.bf16.mxu0 %v6500_v58  ;;  %v6591_v57 = vld [vmem:[%s9514_s1 + $0x13c0] ss:$16 sps:$4 sm:$0xff]   ;;  %v6596_v58 = vld [vmem:[%s9514_s1 + $0x11a4] ss:$16 sps:$4 sm:$0xff]  }
  0xed   :  { %4332 = vmatprep.subr.bf16.mxu1 %v6503_v59  ;;  %v6599_v59 = vld [vmem:[%s9514_s1 + $0x13a4] ss:$16 sps:$4 sm:$0xff]  }
  0xef   :  { %4290 = vmatpush2.bf16.msra.mxu0 %v6498_v60  ;;  %v6594_v60 = vld [vmem:[%s9514_s1 + $0x11a0] ss:$16 sps:$4 sm:$0xff]  }
  0xf0   :  { %4333 = vmatpush2.bf16.msra.mxu1 %v6501_v61  ;;  %4291 = vmatprep.subr.bf16.mxu0 %v6506_v62  ;;  %v6597_v61 = vld [vmem:[%s9514_s1 + $0x13a0] ss:$16 sps:$4 sm:$0xff]   ;;  %v6602_v62 = vld [vmem:[%s9514_s1 + $0x1184] ss:$16 sps:$4 sm:$0xff]  }
  0xf1   :  { %4334 = vmatprep.subr.bf16.mxu1 %v6509_v63  ;;  %v6605_v63 = vld [vmem:[%s9514_s1 + $0x1384] ss:$16 sps:$4 sm:$0xff]  }
  0xf3   :  { %4292 = vmatpush2.bf16.msra.mxu0 %v6504_v0  ;;  %v6600_v0 = vld [vmem:[%s9514_s1 + $0x1180] ss:$16 sps:$4 sm:$0xff]  }
  0xf4   :  { %4335 = vmatpush2.bf16.msra.mxu1 %v6507_v1  ;;  %4293 = vmatprep.subr.bf16.mxu0 %v6512_v2  ;;  %v6603_v1 = vld [vmem:[%s9514_s1 + $0x1380] ss:$16 sps:$4 sm:$0xff]   ;;  %v6608_v2 = vld [vmem:[%s9514_s1 + $0x1164] ss:$16 sps:$4 sm:$0xff]  }
  0xf5   :  { %4336 = vmatprep.subr.bf16.mxu1 %v6515_v3  ;;  %v6611_v3 = vld [vmem:[%s9514_s1 + $0x1364] ss:$16 sps:$4 sm:$0xff]  }
  0xf7   :  { %4294 = vmatpush2.bf16.msra.mxu0 %v6510_v4  ;;  %v6606_v4 = vld [vmem:[%s9514_s1 + $0x1160] ss:$16 sps:$4 sm:$0xff]  }
  0xf8   :  { %4337 = vmatpush2.bf16.msra.mxu1 %v6513_v5  ;;  %4295 = vmatprep.subr.bf16.mxu0 %v6518_v6  ;;  %v6609_v5 = vld [vmem:[%s9514_s1 + $0x1360] ss:$16 sps:$4 sm:$0xff]   ;;  %v6614_v6 = vld [vmem:[%s9514_s1 + $0x1144] ss:$16 sps:$4 sm:$0xff]  }
  0xf9   :  { %4338 = vmatprep.subr.bf16.mxu1 %v6521_v7  ;;  %v6617_v7 = vld [vmem:[%s9514_s1 + $0x1344] ss:$16 sps:$4 sm:$0xff]  }
  0xfb   :  { %4296 = vmatpush2.bf16.msra.mxu0 %v6516_v8  ;;  %v6612_v8 = vld [vmem:[%s9514_s1 + $0x1140] ss:$16 sps:$4 sm:$0xff]  }
  0xfc   :  { %4339 = vmatpush2.bf16.msra.mxu1 %v6519_v9  ;;  %4297 = vmatprep.subr.bf16.mxu0 %v6524_v10  ;;  %v6615_v9 = vld [vmem:[%s9514_s1 + $0x1340] ss:$16 sps:$4 sm:$0xff]   ;;  %v6620_v10 = vld [vmem:[%s9514_s1 + $0x1124] ss:$16 sps:$4 sm:$0xff]  }
  0xfd   :  { %4340 = vmatprep.subr.bf16.mxu1 %v6527_v11  ;;  %v6623_v11 = vld [vmem:[%s9514_s1 + $0x1324] ss:$16 sps:$4 sm:$0xff]  }
  0xff   :  { %4298 = vmatpush2.bf16.msra.mxu0 %v6522_v12  ;;  %v6618_v12 = vld [vmem:[%s9514_s1 + $0x1120] ss:$16 sps:$4 sm:$0xff]  }
 0x100   :  { %4341 = vmatpush2.bf16.msra.mxu1 %v6525_v13  ;;  %4353 = vmatprep.subr.bf16.mxu0 %v6536_v14  ;;  %v6621_v13 = vld [vmem:[%s9514_s1 + $0x1320] ss:$16 sps:$4 sm:$0xff]   ;;  %v6626_v14 = vld [vmem:[%s9514_s1 + $0x1104] ss:$16 sps:$4 sm:$0xff]  }
 0x101   :  { %4396 = vmatprep.subr.bf16.mxu1 %v6539_v15  ;;  %v6629_v15 = vld [vmem:[%s9514_s1 + $0x1304] ss:$16 sps:$4 sm:$0xff]  }
 0x102   :  { %4300 = vmatmul.mubr.bf16.vlgmr.msra.gmra.mxu0 %v6528_v16  ;;  %v6624_v16 = vld [vmem:[%s9514_s1 + $0x1100] ss:$16 sps:$4 sm:$0xff]  }
 0x103   :  { %4343 = vmatmul.mubr.bf16.vlgmr.msra.gmra.mxu1 %v6531_v17  ;;  %4354 = vmatpush1.bf16.msra.mxu0 %v6534_v18  ;;  %v6627_v17 = vld [vmem:[%s9514_s1 + $0x1300] ss:$16 sps:$4 sm:$0xff]  }
 0x104   :  { %4397 = vmatpush1.bf16.msra.mxu1 %v6537_v19  ;;  %4355 = vmatprep.subr.bf16.mxu0 %v6542_v20  ;;  %v6630_v18 = vld [vmem:[%s9515_s0 + $0x40] ss:$80 sps:$4 sm:$0xff]   ;;  %v6633_v19 = vld [vmem:[%s9515_s0 + $0x48] ss:$80 sps:$4 sm:$0xff]   ;;  %v6638_v20 = vld [vmem:[%s9514_s1 + $0xec] ss:$16 sps:$4 sm:$0xff]  }
 0x105   :  { %4398 = vmatprep.subr.bf16.mxu1 %v6545_v21  ;;  %4385 = vmatprep.mubr.bf16.mxu0 %v6632_v22  ;;  %v6641_v21 = vld [vmem:[%s9514_s1 + $0x2ec] ss:$16 sps:$4 sm:$0xff]   ;;  %v6636_v22 = vld [vmem:[%s9514_s1 + $0xe8] ss:$16 sps:$4 sm:$0xff]  }
 0x106   :  { %4428 = vmatprep.mubr.bf16.mxu1 %v6635_v23  ;;  %v6639_v23 = vld [vmem:[%s9514_s1 + $0x2e8] ss:$16 sps:$4 sm:$0xff]  }
 0x107   :  { %4356 = vmatpush1.bf16.msra.mxu0 %v6540_v24  ;;  %v6644_v24 = vld [vmem:[%s9514_s1 + $0xcc] ss:$16 sps:$4 sm:$0xff]  }
 0x108   :  { %4399 = vmatpush1.bf16.msra.mxu1 %v6543_v25  ;;  %4357 = vmatprep.subr.bf16.mxu0 %v6548_v26  ;;  %v6647_v25 = vld [vmem:[%s9514_s1 + $0x2cc] ss:$16 sps:$4 sm:$0xff]   ;;  %v6642_v26 = vld [vmem:[%s9514_s1 + $0xc8] ss:$16 sps:$4 sm:$0xff]  }
 0x109   :  { %4400 = vmatprep.subr.bf16.mxu1 %v6551_v27  ;;  %v6645_v27 = vld [vmem:[%s9514_s1 + $0x2c8] ss:$16 sps:$4 sm:$0xff]  }
 0x10b   :  { %4358 = vmatpush1.bf16.msra.mxu0 %v6546_v28  ;;  %v6650_v28 = vld [vmem:[%s9514_s1 + $0xac] ss:$16 sps:$4 sm:$0xff]  }
 0x10c   :  { %4401 = vmatpush1.bf16.msra.mxu1 %v6549_v29  ;;  %4359 = vmatprep.subr.bf16.mxu0 %v6554_v30  ;;  %v6653_v29 = vld [vmem:[%s9514_s1 + $0x2ac] ss:$16 sps:$4 sm:$0xff]   ;;  %v6648_v30 = vld [vmem:[%s9514_s1 + $0xa8] ss:$16 sps:$4 sm:$0xff]  }
 0x10d   :  { %4402 = vmatprep.subr.bf16.mxu1 %v6557_v31  ;;  %v6651_v31 = vld [vmem:[%s9514_s1 + $0x2a8] ss:$16 sps:$4 sm:$0xff]  }
 0x10f   :  { %4360 = vmatpush1.bf16.msra.mxu0 %v6552_v32  ;;  %v7160_v32 = vld [vmem:[%s9515_s0 + $0x4] ss:$80 sps:$4 sm:$0xff]  }
 0x110   :  { %4403 = vmatpush1.bf16.msra.mxu1 %v6555_v33  ;;  %4361 = vmatprep.subr.bf16.mxu0 %v6560_v34  ;;  %v7161_v33 = vld [vmem:[%s9515_s0 + $0xc] ss:$80 sps:$4 sm:$0xff]  }
 0x111   :  { %4404 = vmatprep.subr.bf16.mxu1 %v6563_v35  ;;  %v6656_v34 = vld [vmem:[%s9514_s1 + $0x8c] ss:$16 sps:$4 sm:$0xff]  }
 0x112   :  { %v6659_v35 = vld [vmem:[%s9514_s1 + $0x28c] ss:$16 sps:$4 sm:$0xff]  }
 0x113   :  { %4362 = vmatpush1.bf16.msra.mxu0 %v6558_v36  ;;  %v6654_v36 = vld [vmem:[%s9514_s1 + $0x88] ss:$16 sps:$4 sm:$0xff]  }
 0x114   :  { %4405 = vmatpush1.bf16.msra.mxu1 %v6561_v37  ;;  %4363 = vmatprep.subr.bf16.mxu0 %v6566_v38  ;;  %v6657_v37 = vld [vmem:[%s9514_s1 + $0x288] ss:$16 sps:$4 sm:$0xff]   ;;  %v6662_v38 = vld [vmem:[%s9514_s1 + $0x6c] ss:$16 sps:$4 sm:$0xff]  }
 0x115   :  { %4406 = vmatprep.subr.bf16.mxu1 %v6569_v39  ;;  %v6665_v39 = vld [vmem:[%s9514_s1 + $0x26c] ss:$16 sps:$4 sm:$0xff]  }
 0x117   :  { %4364 = vmatpush1.bf16.msra.mxu0 %v6564_v40  ;;  %v6660_v40 = vld [vmem:[%s9514_s1 + $0x68] ss:$16 sps:$4 sm:$0xff]  }
 0x118   :  { %4407 = vmatpush1.bf16.msra.mxu1 %v6567_v41  ;;  %4365 = vmatprep.subr.bf16.mxu0 %v6572_v42  ;;  %v6663_v41 = vld [vmem:[%s9514_s1 + $0x268] ss:$16 sps:$4 sm:$0xff]   ;;  %v6668_v42 = vld [vmem:[%s9514_s1 + $0x4c] ss:$16 sps:$4 sm:$0xff]  }
 0x119   :  { %4408 = vmatprep.subr.bf16.mxu1 %v6575_v43  ;;  %v6671_v43 = vld [vmem:[%s9514_s1 + $0x24c] ss:$16 sps:$4 sm:$0xff]  }
 0x11b   :  { %4366 = vmatpush1.bf16.msra.mxu0 %v6570_v44  ;;  %v6666_v44 = vld [vmem:[%s9514_s1 + $0x48] ss:$16 sps:$4 sm:$0xff]  }
 0x11c   :  { %4409 = vmatpush1.bf16.msra.mxu1 %v6573_v45  ;;  %4367 = vmatprep.subr.bf16.mxu0 %v6578_v46  ;;  %v6669_v45 = vld [vmem:[%s9514_s1 + $0x248] ss:$16 sps:$4 sm:$0xff]   ;;  %v6674_v46 = vld [vmem:[%s9514_s1 + $0x2c] ss:$16 sps:$4 sm:$0xff]  }
 0x11d   :  { %4410 = vmatprep.subr.bf16.mxu1 %v6581_v47  ;;  %v6677_v47 = vld [vmem:[%s9514_s1 + $0x22c] ss:$16 sps:$4 sm:$0xff]  }
 0x11f   :  { %4368 = vmatpush1.bf16.msra.mxu0 %v6576_v48  ;;  %v6672_v48 = vld [vmem:[%s9514_s1 + $0x28] ss:$16 sps:$4 sm:$0xff]  }
 0x120   :  { %4411 = vmatpush1.bf16.msra.mxu1 %v6579_v49  ;;  %4369 = vmatprep.subr.bf16.mxu0 %v6584_v50  ;;  %v6675_v49 = vld [vmem:[%s9514_s1 + $0x228] ss:$16 sps:$4 sm:$0xff]   ;;  %v6680_v50 = vld [vmem:[%s9514_s1 + $0xc] ss:$16 sps:$4 sm:$0xff]  }
 0x121   :  { %4412 = vmatprep.subr.bf16.mxu1 %v6587_v51  ;;  %v6683_v51 = vld [vmem:[%s9514_s1 + $0x20c] ss:$16 sps:$4 sm:$0xff]  }
 0x123   :  { %4370 = vmatpush2.bf16.msra.mxu0 %v6582_v52  ;;  %v6678_v52 = vld [vmem:[%s9514_s1 + $0x8] ss:$16 sps:$4 sm:$0xff]  }
 0x124   :  { %4413 = vmatpush2.bf16.msra.mxu1 %v6585_v53  ;;  %4371 = vmatprep.subr.bf16.mxu0 %v6590_v54  ;;  %v6681_v53 = vld [vmem:[%s9514_s1 + $0x208] ss:$16 sps:$4 sm:$0xff]   ;;  %v6686_v54 = vld [vmem:[%s9514_s1 + $0x1ec] ss:$16 sps:$4 sm:$0xff]  }
 0x125   :  { %4414 = vmatprep.subr.bf16.mxu1 %v6593_v55  ;;  %v6689_v55 = vld [vmem:[%s9514_s1 + $0x3ec] ss:$16 sps:$4 sm:$0xff]  }
 0x127   :  { %4372 = vmatpush2.bf16.msra.mxu0 %v6588_v56  ;;  %v6684_v56 = vld [vmem:[%s9514_s1 + $0x1e8] ss:$16 sps:$4 sm:$0xff]  }
 0x128   :  { %4415 = vmatpush2.bf16.msra.mxu1 %v6591_v57  ;;  %4373 = vmatprep.subr.bf16.mxu0 %v6596_v58  ;;  %v6687_v57 = vld [vmem:[%s9514_s1 + $0x3e8] ss:$16 sps:$4 sm:$0xff]   ;;  %v6692_v58 = vld [vmem:[%s9514_s1 + $0x1cc] ss:$16 sps:$4 sm:$0xff]  }
 0x129   :  { %4416 = vmatprep.subr.bf16.mxu1 %v6599_v59  ;;  %v6695_v59 = vld [vmem:[%s9514_s1 + $0x3cc] ss:$16 sps:$4 sm:$0xff]  }
 0x12b   :  { %4374 = vmatpush2.bf16.msra.mxu0 %v6594_v60  ;;  %v6690_v60 = vld [vmem:[%s9514_s1 + $0x1c8] ss:$16 sps:$4 sm:$0xff]  }
 0x12c   :  { %4417 = vmatpush2.bf16.msra.mxu1 %v6597_v61  ;;  %4375 = vmatprep.subr.bf16.mxu0 %v6602_v62  ;;  %v6693_v61 = vld [vmem:[%s9514_s1 + $0x3c8] ss:$16 sps:$4 sm:$0xff]   ;;  %v6698_v62 = vld [vmem:[%s9514_s1 + $0x1ac] ss:$16 sps:$4 sm:$0xff]  }
 0x12d   :  { %4418 = vmatprep.subr.bf16.mxu1 %v6605_v63  ;;  %v6701_v63 = vld [vmem:[%s9514_s1 + $0x3ac] ss:$16 sps:$4 sm:$0xff]  }
 0x12f   :  { %4376 = vmatpush2.bf16.msra.mxu0 %v6600_v0  ;;  %v6696_v0 = vld [vmem:[%s9514_s1 + $0x1a8] ss:$16 sps:$4 sm:$0xff]  }
 0x130   :  { %4419 = vmatpush2.bf16.msra.mxu1 %v6603_v1  ;;  %4377 = vmatprep.subr.bf16.mxu0 %v6608_v2  ;;  %v6699_v1 = vld [vmem:[%s9514_s1 + $0x3a8] ss:$16 sps:$4 sm:$0xff]   ;;  %v6704_v2 = vld [vmem:[%s9514_s1 + $0x18c] ss:$16 sps:$4 sm:$0xff]  }
 0x131   :  { %4420 = vmatprep.subr.bf16.mxu1 %v6611_v3  ;;  %v6707_v3 = vld [vmem:[%s9514_s1 + $0x38c] ss:$16 sps:$4 sm:$0xff]  }
 0x133   :  { %4378 = vmatpush2.bf16.msra.mxu0 %v6606_v4  ;;  %v6702_v4 = vld [vmem:[%s9514_s1 + $0x188] ss:$16 sps:$4 sm:$0xff]  }
 0x134   :  { %4421 = vmatpush2.bf16.msra.mxu1 %v6609_v5  ;;  %4379 = vmatprep.subr.bf16.mxu0 %v6614_v6  ;;  %v6705_v5 = vld [vmem:[%s9514_s1 + $0x388] ss:$16 sps:$4 sm:$0xff]   ;;  %v6710_v6 = vld [vmem:[%s9514_s1 + $0x16c] ss:$16 sps:$4 sm:$0xff]  }
 0x135   :  { %4422 = vmatprep.subr.bf16.mxu1 %v6617_v7  ;;  %v6713_v7 = vld [vmem:[%s9514_s1 + $0x36c] ss:$16 sps:$4 sm:$0xff]  }
 0x137   :  { %4380 = vmatpush2.bf16.msra.mxu0 %v6612_v8  ;;  %v6708_v8 = vld [vmem:[%s9514_s1 + $0x168] ss:$16 sps:$4 sm:$0xff]  }
 0x138   :  { %4423 = vmatpush2.bf16.msra.mxu1 %v6615_v9  ;;  %4381 = vmatprep.subr.bf16.mxu0 %v6620_v10  ;;  %v6711_v9 = vld [vmem:[%s9514_s1 + $0x368] ss:$16 sps:$4 sm:$0xff]   ;;  %v6716_v10 = vld [vmem:[%s9514_s1 + $0x14c] ss:$16 sps:$4 sm:$0xff]  }
 0x139   :  { %4424 = vmatprep.subr.bf16.mxu1 %v6623_v11  ;;  %v6719_v11 = vld [vmem:[%s9514_s1 + $0x34c] ss:$16 sps:$4 sm:$0xff]  }
 0x13b   :  { %4382 = vmatpush2.bf16.msra.mxu0 %v6618_v12  ;;  %v6714_v12 = vld [vmem:[%s9514_s1 + $0x148] ss:$16 sps:$4 sm:$0xff]  }
 0x13c   :  { %4425 = vmatpush2.bf16.msra.mxu1 %v6621_v13  ;;  %4383 = vmatprep.subr.bf16.mxu0 %v6626_v14  ;;  %v6717_v13 = vld [vmem:[%s9514_s1 + $0x348] ss:$16 sps:$4 sm:$0xff]   ;;  %v6722_v14 = vld [vmem:[%s9514_s1 + $0x12c] ss:$16 sps:$4 sm:$0xff]  }
 0x13d   :  { %4426 = vmatprep.subr.bf16.mxu1 %v6629_v15  ;;  %v6725_v15 = vld [vmem:[%s9514_s1 + $0x32c] ss:$16 sps:$4 sm:$0xff]  }
 0x13f   :  { %4384 = vmatpush2.bf16.msra.mxu0 %v6624_v16  ;;  %v6720_v16 = vld [vmem:[%s9514_s1 + $0x128] ss:$16 sps:$4 sm:$0xff]  }
 0x140   :  { %4427 = vmatpush2.bf16.msra.mxu1 %v6627_v17  ;;  %4439 = vmatprep.subr.bf16.mxu0 %v6638_v20  ;;  %v6723_v17 = vld [vmem:[%s9514_s1 + $0x328] ss:$16 sps:$4 sm:$0xff]  }
 0x141   :  { %4482 = vmatprep.subr.bf16.mxu1 %v6641_v21  ;;  %v6726_v20 = vld [vmem:[%s9514_s1 + $0x108] ss:$16 sps:$4 sm:$0xff]  }
 0x142   :  { %4386 = vmatmul.mubr.bf16.vlgmr.msra.gmra.mxu0 %v6630_v18  ;;  %v6728_v18 = vld [vmem:[%s9514_s1 + $0x10c] ss:$16 sps:$4 sm:$0xff]   ;;  %v6729_v21 = vld [vmem:[%s9514_s1 + $0x308] ss:$16 sps:$4 sm:$0xff]  }
 0x143   :  { %4429 = vmatmul.mubr.bf16.vlgmr.msra.gmra.mxu1 %v6633_v19  ;;  %4440 = vmatpush1.bf16.msra.mxu0 %v6636_v22  ;;  %v6731_v19 = vld [vmem:[%s9514_s1 + $0x30c] ss:$16 sps:$4 sm:$0xff]  }
 0x144   :  { %4483 = vmatpush1.bf16.msra.mxu1 %v6639_v23  ;;  %4441 = vmatprep.subr.bf16.mxu0 %v6644_v24  ;;  %v6734_v22 = vld [vmem:[%s9514_s1 + $0x4ec] ss:$16 sps:$4 sm:$0xff]   ;;  %v6732_v24 = vld [vmem:[%s9514_s1 + $0x4e8] ss:$16 sps:$4 sm:$0xff]  }
 0x145   :  { %4484 = vmatprep.subr.bf16.mxu1 %v6647_v25  ;;  %4471 = vmatprep.mubr.bf16.mxu0 %v7160_v32  ;;  %v6737_v23 = vld [vmem:[%s9514_s1 + $0x6ec] ss:$16 sps:$4 sm:$0xff]   ;;  %v6735_v25 = vld [vmem:[%s9514_s1 + $0x6e8] ss:$16 sps:$4 sm:$0xff]  }
 0x146   :  { %4514 = vmatprep.mubr.bf16.mxu1 %v7161_v33  ;;  %v6746_v32 = vld [vmem:[%s9514_s1 + $0x4ac] ss:$16 sps:$4 sm:$0xff]  }
 0x147   :  { %4442 = vmatpush1.bf16.msra.mxu0 %v6642_v26  ;;  %v6740_v26 = vld [vmem:[%s9514_s1 + $0x4cc] ss:$16 sps:$4 sm:$0xff]  }
 0x148   :  { %4485 = vmatpush1.bf16.msra.mxu1 %v6645_v27  ;;  %4443 = vmatprep.subr.bf16.mxu0 %v6650_v28  ;;  %v6743_v27 = vld [vmem:[%s9514_s1 + $0x6cc] ss:$16 sps:$4 sm:$0xff]   ;;  %v6738_v28 = vld [vmem:[%s9514_s1 + $0x4c8] ss:$16 sps:$4 sm:$0xff]  }
 0x149   :  { %4486 = vmatprep.subr.bf16.mxu1 %v6653_v29  ;;  %v6741_v29 = vld [vmem:[%s9514_s1 + $0x6c8] ss:$16 sps:$4 sm:$0xff]   ;;  %v6749_v33 = vld [vmem:[%s9514_s1 + $0x6ac] ss:$16 sps:$4 sm:$0xff]  }
 0x14b   :  { %4444 = vmatpush1.bf16.msra.mxu0 %v6648_v30  ;;  %v7162_v30 = vld [vmem:[%s9515_s0] ss:$80 sps:$4 sm:$0xff]  }
 0x14c   :  { %4487 = vmatpush1.bf16.msra.mxu1 %v6651_v31  ;;  %4445 = vmatprep.subr.bf16.mxu0 %v6656_v34  ;;  %v7163_v31 = vld [vmem:[%s9515_s0 + $0x8] ss:$80 sps:$4 sm:$0xff]  }
 0x14d   :  { %4488 = vmatprep.subr.bf16.mxu1 %v6659_v35  ;;  %v6744_v34 = vld [vmem:[%s9514_s1 + $0x4a8] ss:$16 sps:$4 sm:$0xff]  }
 0x14e   :  { %v6747_v35 = vld [vmem:[%s9514_s1 + $0x6a8] ss:$16 sps:$4 sm:$0xff]  }
 0x14f   :  { %4446 = vmatpush1.bf16.msra.mxu0 %v6654_v36  ;;  %v7164_v36 = vld [vmem:[%s9515_s0 + $0x14] ss:$80 sps:$4 sm:$0xff]  }
 0x150   :  { %4489 = vmatpush1.bf16.msra.mxu1 %v6657_v37  ;;  %4447 = vmatprep.subr.bf16.mxu0 %v6662_v38  ;;  %v7165_v37 = vld [vmem:[%s9515_s0 + $0x1c] ss:$80 sps:$4 sm:$0xff]  }
 0x151   :  { %4490 = vmatprep.subr.bf16.mxu1 %v6665_v39  ;;  %v6752_v38 = vld [vmem:[%s9514_s1 + $0x48c] ss:$16 sps:$4 sm:$0xff]  }
 0x152   :  { %v6755_v39 = vld [vmem:[%s9514_s1 + $0x68c] ss:$16 sps:$4 sm:$0xff]  }
 0x153   :  { %4448 = vmatpush1.bf16.msra.mxu0 %v6660_v40  ;;  %v6750_v40 = vld [vmem:[%s9514_s1 + $0x488] ss:$16 sps:$4 sm:$0xff]  }
 0x154   :  { %4491 = vmatpush1.bf16.msra.mxu1 %v6663_v41  ;;  %4449 = vmatprep.subr.bf16.mxu0 %v6668_v42  ;;  %v6753_v41 = vld [vmem:[%s9514_s1 + $0x688] ss:$16 sps:$4 sm:$0xff]   ;;  %v6758_v42 = vld [vmem:[%s9514_s1 + $0x46c] ss:$16 sps:$4 sm:$0xff]  }
 0x155   :  { %4492 = vmatprep.subr.bf16.mxu1 %v6671_v43  ;;  %v6761_v43 = vld [vmem:[%s9514_s1 + $0x66c] ss:$16 sps:$4 sm:$0xff]  }
 0x157   :  { %4450 = vmatpush1.bf16.msra.mxu0 %v6666_v44  ;;  %v6756_v44 = vld [vmem:[%s9514_s1 + $0x468] ss:$16 sps:$4 sm:$0xff]  }
 0x158   :  { %4493 = vmatpush1.bf16.msra.mxu1 %v6669_v45  ;;  %4451 = vmatprep.subr.bf16.mxu0 %v6674_v46  ;;  %v6759_v45 = vld [vmem:[%s9514_s1 + $0x668] ss:$16 sps:$4 sm:$0xff]   ;;  %v6764_v46 = vld [vmem:[%s9514_s1 + $0x44c] ss:$16 sps:$4 sm:$0xff]  }
 0x159   :  { %4494 = vmatprep.subr.bf16.mxu1 %v6677_v47  ;;  %v6767_v47 = vld [vmem:[%s9514_s1 + $0x64c] ss:$16 sps:$4 sm:$0xff]  }
 0x15b   :  { %4452 = vmatpush1.bf16.msra.mxu0 %v6672_v48  ;;  %v6762_v48 = vld [vmem:[%s9514_s1 + $0x448] ss:$16 sps:$4 sm:$0xff]  }
 0x15c   :  { %4495 = vmatpush1.bf16.msra.mxu1 %v6675_v49  ;;  %4453 = vmatprep.subr.bf16.mxu0 %v6680_v50  ;;  %v6765_v49 = vld [vmem:[%s9514_s1 + $0x648] ss:$16 sps:$4 sm:$0xff]   ;;  %v6770_v50 = vld [vmem:[%s9514_s1 + $0x42c] ss:$16 sps:$4 sm:$0xff]  }
 0x15d   :  { %4496 = vmatprep.subr.bf16.mxu1 %v6683_v51  ;;  %v6773_v51 = vld [vmem:[%s9514_s1 + $0x62c] ss:$16 sps:$4 sm:$0xff]  }
 0x15f   :  { %4454 = vmatpush1.bf16.msra.mxu0 %v6678_v52  ;;  %v6768_v52 = vld [vmem:[%s9514_s1 + $0x428] ss:$16 sps:$4 sm:$0xff]  }
 0x160   :  { %4497 = vmatpush1.bf16.msra.mxu1 %v6681_v53  ;;  %4455 = vmatprep.subr.bf16.mxu0 %v6686_v54  ;;  %v6771_v53 = vld [vmem:[%s9514_s1 + $0x628] ss:$16 sps:$4 sm:$0xff]   ;;  %v6776_v54 = vld [vmem:[%s9514_s1 + $0x40c] ss:$16 sps:$4 sm:$0xff]  }
 0x161   :  { %4498 = vmatprep.subr.bf16.mxu1 %v6689_v55  ;;  %v6779_v55 = vld [vmem:[%s9514_s1 + $0x60c] ss:$16 sps:$4 sm:$0xff]  }
 0x163   :  { %4456 = vmatpush2.bf16.msra.mxu0 %v6684_v56  ;;  %v6774_v56 = vld [vmem:[%s9514_s1 + $0x408] ss:$16 sps:$4 sm:$0xff]  }
 0x164   :  { %4499 = vmatpush2.bf16.msra.mxu1 %v6687_v57  ;;  %4457 = vmatprep.subr.bf16.mxu0 %v6692_v58  ;;  %v6777_v57 = vld [vmem:[%s9514_s1 + $0x608] ss:$16 sps:$4 sm:$0xff]   ;;  %v6782_v58 = vld [vmem:[%s9514_s1 + $0x5ec] ss:$16 sps:$4 sm:$0xff]  }
 0x165   :  { %4500 = vmatprep.subr.bf16.mxu1 %v6695_v59  ;;  %v6785_v59 = vld [vmem:[%s9514_s1 + $0x7ec] ss:$16 sps:$4 sm:$0xff]  }
 0x167   :  { %4458 = vmatpush2.bf16.msra.mxu0 %v6690_v60  ;;  %v6780_v60 = vld [vmem:[%s9514_s1 + $0x5e8] ss:$16 sps:$4 sm:$0xff]  }
 0x168   :  { %4501 = vmatpush2.bf16.msra.mxu1 %v6693_v61  ;;  %4459 = vmatprep.subr.bf16.mxu0 %v6698_v62  ;;  %v6783_v61 = vld [vmem:[%s9514_s1 + $0x7e8] ss:$16 sps:$4 sm:$0xff]   ;;  %v6788_v62 = vld [vmem:[%s9514_s1 + $0x5cc] ss:$16 sps:$4 sm:$0xff]  }
 0x169   :  { %4502 = vmatprep.subr.bf16.mxu1 %v6701_v63  ;;  %v6791_v63 = vld [vmem:[%s9514_s1 + $0x7cc] ss:$16 sps:$4 sm:$0xff]  }
 0x16b   :  { %4460 = vmatpush2.bf16.msra.mxu0 %v6696_v0  ;;  %v6786_v0 = vld [vmem:[%s9514_s1 + $0x5c8] ss:$16 sps:$4 sm:$0xff]  }
 0x16c   :  { %4503 = vmatpush2.bf16.msra.mxu1 %v6699_v1  ;;  %4461 = vmatprep.subr.bf16.mxu0 %v6704_v2  ;;  %v6789_v1 = vld [vmem:[%s9514_s1 + $0x7c8] ss:$16 sps:$4 sm:$0xff]   ;;  %v6794_v2 = vld [vmem:[%s9514_s1 + $0x5ac] ss:$16 sps:$4 sm:$0xff]  }
 0x16d   :  { %4504 = vmatprep.subr.bf16.mxu1 %v6707_v3  ;;  %v6797_v3 = vld [vmem:[%s9514_s1 + $0x7ac] ss:$16 sps:$4 sm:$0xff]  }
 0x16f   :  { %4462 = vmatpush2.bf16.msra.mxu0 %v6702_v4  ;;  %v6792_v4 = vld [vmem:[%s9514_s1 + $0x5a8] ss:$16 sps:$4 sm:$0xff]  }
 0x170   :  { %4505 = vmatpush2.bf16.msra.mxu1 %v6705_v5  ;;  %4463 = vmatprep.subr.bf16.mxu0 %v6710_v6  ;;  %v6795_v5 = vld [vmem:[%s9514_s1 + $0x7a8] ss:$16 sps:$4 sm:$0xff]   ;;  %v6800_v6 = vld [vmem:[%s9514_s1 + $0x58c] ss:$16 sps:$4 sm:$0xff]  }
 0x171   :  { %4506 = vmatprep.subr.bf16.mxu1 %v6713_v7  ;;  %v6803_v7 = vld [vmem:[%s9514_s1 + $0x78c] ss:$16 sps:$4 sm:$0xff]  }
 0x173   :  { %4464 = vmatpush2.bf16.msra.mxu0 %v6708_v8  ;;  %v6798_v8 = vld [vmem:[%s9514_s1 + $0x588] ss:$16 sps:$4 sm:$0xff]  }
 0x174   :  { %4507 = vmatpush2.bf16.msra.mxu1 %v6711_v9  ;;  %4465 = vmatprep.subr.bf16.mxu0 %v6716_v10  ;;  %v6801_v9 = vld [vmem:[%s9514_s1 + $0x788] ss:$16 sps:$4 sm:$0xff]   ;;  %v6806_v10 = vld [vmem:[%s9514_s1 + $0x56c] ss:$16 sps:$4 sm:$0xff]  }
 0x175   :  { %4508 = vmatprep.subr.bf16.mxu1 %v6719_v11  ;;  %v6809_v11 = vld [vmem:[%s9514_s1 + $0x76c] ss:$16 sps:$4 sm:$0xff]  }
 0x177   :  { %4466 = vmatpush2.bf16.msra.mxu0 %v6714_v12  ;;  %v6804_v12 = vld [vmem:[%s9514_s1 + $0x568] ss:$16 sps:$4 sm:$0xff]  }
 0x178   :  { %4509 = vmatpush2.bf16.msra.mxu1 %v6717_v13  ;;  %4467 = vmatprep.subr.bf16.mxu0 %v6722_v14  ;;  %v6807_v13 = vld [vmem:[%s9514_s1 + $0x768] ss:$16 sps:$4 sm:$0xff]   ;;  %v6812_v14 = vld [vmem:[%s9514_s1 + $0x54c] ss:$16 sps:$4 sm:$0xff]  }
 0x179   :  { %4510 = vmatprep.subr.bf16.mxu1 %v6725_v15  ;;  %v6815_v15 = vld [vmem:[%s9514_s1 + $0x74c] ss:$16 sps:$4 sm:$0xff]  }
 0x17b   :  { %4468 = vmatpush2.bf16.msra.mxu0 %v6720_v16  ;;  %v6810_v16 = vld [vmem:[%s9514_s1 + $0x548] ss:$16 sps:$4 sm:$0xff]  }
 0x17c   :  { %4511 = vmatpush2.bf16.msra.mxu1 %v6723_v17  ;;  %4469 = vmatprep.subr.bf16.mxu0 %v6728_v18  ;;  %v6813_v17 = vld [vmem:[%s9514_s1 + $0x748] ss:$16 sps:$4 sm:$0xff]   ;;  %v6818_v18 = vld [vmem:[%s9514_s1 + $0x52c] ss:$16 sps:$4 sm:$0xff]  }
 0x17d   :  { %4512 = vmatprep.subr.bf16.mxu1 %v6731_v19  ;;  %v6821_v19 = vld [vmem:[%s9514_s1 + $0x72c] ss:$16 sps:$4 sm:$0xff]  }
 0x17f   :  { %4470 = vmatpush2.bf16.msra.mxu0 %v6726_v20  ;;  %v6816_v20 = vld [vmem:[%s9514_s1 + $0x528] ss:$16 sps:$4 sm:$0xff]  }
 0x180   :  { %4513 = vmatpush2.bf16.msra.mxu1 %v6729_v21  ;;  %4525 = vmatprep.subr.bf16.mxu0 %v6734_v22  ;;  %v6819_v21 = vld [vmem:[%s9514_s1 + $0x728] ss:$16 sps:$4 sm:$0xff]   ;;  %v6824_v22 = vld [vmem:[%s9514_s1 + $0x50c] ss:$16 sps:$4 sm:$0xff]  }
 0x181   :  { %4568 = vmatprep.subr.bf16.mxu1 %v6737_v23  ;;  %v6827_v23 = vld [vmem:[%s9514_s1 + $0x70c] ss:$16 sps:$4 sm:$0xff]  }
 0x182   :  { %4472 = vmatmul.mubr.bf16.vlgmr.msra.gmra.mxu0 %v7162_v30  ;;  %v6836_v30 = vld [vmem:[%s9514_s1 + $0x8cc] ss:$16 sps:$4 sm:$0xff]  }
 0x183   :  { %4515 = vmatmul.mubr.bf16.vlgmr.msra.gmra.mxu1 %v7163_v31  ;;  %4526 = vmatpush1.bf16.msra.mxu0 %v6732_v24  ;;  %v6822_v24 = vld [vmem:[%s9514_s1 + $0x508] ss:$16 sps:$4 sm:$0xff]   ;;  %v6839_v31 = vld [vmem:[%s9514_s1 + $0xacc] ss:$16 sps:$4 sm:$0xff]  }
 0x184   :  { %4569 = vmatpush1.bf16.msra.mxu1 %v6735_v25  ;;  %4527 = vmatprep.subr.bf16.mxu0 %v6740_v26  ;;  %v6825_v25 = vld [vmem:[%s9514_s1 + $0x708] ss:$16 sps:$4 sm:$0xff]   ;;  %v6830_v26 = vld [vmem:[%s9514_s1 + $0x8ec] ss:$16 sps:$4 sm:$0xff]  }
 0x185   :  { %4570 = vmatprep.subr.bf16.mxu1 %v6743_v27  ;;  %4557 = vmatprep.mubr.bf16.mxu0 %v7164_v36  ;;  %v6833_v27 = vld [vmem:[%s9514_s1 + $0xaec] ss:$16 sps:$4 sm:$0xff]  }
 0x186   :  { %4600 = vmatprep.mubr.bf16.mxu1 %v7165_v37  ;;  %v6842_v36 = vld [vmem:[%s9514_s1 + $0x8ac] ss:$16 sps:$4 sm:$0xff]  }
 0x187   :  { %4528 = vmatpush1.bf16.msra.mxu0 %v6738_v28  ;;  %v6828_v28 = vld [vmem:[%s9514_s1 + $0x8e8] ss:$16 sps:$4 sm:$0xff]   ;;  %v6845_v37 = vld [vmem:[%s9514_s1 + $0xaac] ss:$16 sps:$4 sm:$0xff]  }
 0x188   :  { %4571 = vmatpush1.bf16.msra.mxu1 %v6741_v29  ;;  %4529 = vmatprep.subr.bf16.mxu0 %v6746_v32  ;;  %v6831_v29 = vld [vmem:[%s9514_s1 + $0xae8] ss:$16 sps:$4 sm:$0xff]   ;;  %v7166_v32 = vld [vmem:[%s9515_s0 + $0x10] ss:$80 sps:$4 sm:$0xff]  }
 0x189   :  { %4572 = vmatprep.subr.bf16.mxu1 %v6749_v33  ;;  %v7167_v33 = vld [vmem:[%s9515_s0 + $0x18] ss:$80 sps:$4 sm:$0xff]  }
 0x18b   :  { %4530 = vmatpush1.bf16.msra.mxu0 %v6744_v34  ;;  %v6834_v34 = vld [vmem:[%s9514_s1 + $0x8c8] ss:$16 sps:$4 sm:$0xff]  }
 0x18c   :  { %4573 = vmatpush1.bf16.msra.mxu1 %v6747_v35  ;;  %4531 = vmatprep.subr.bf16.mxu0 %v6752_v38  ;;  %v6837_v35 = vld [vmem:[%s9514_s1 + $0xac8] ss:$16 sps:$4 sm:$0xff]   ;;  %v7168_v38 = vld [vmem:[%s9515_s0 + $0x24] ss:$80 sps:$4 sm:$0xff]  }
 0x18d   :  { %4574 = vmatprep.subr.bf16.mxu1 %v6755_v39  ;;  %v7169_v39 = vld [vmem:[%s9515_s0 + $0x2c] ss:$80 sps:$4 sm:$0xff]  }
 0x18f   :  { %4532 = vmatpush1.bf16.msra.mxu0 %v6750_v40  ;;  %v6840_v40 = vld [vmem:[%s9514_s1 + $0x8a8] ss:$16 sps:$4 sm:$0xff]  }
 0x190   :  { %4575 = vmatpush1.bf16.msra.mxu1 %v6753_v41  ;;  %4533 = vmatprep.subr.bf16.mxu0 %v6758_v42  ;;  %v6843_v41 = vld [vmem:[%s9514_s1 + $0xaa8] ss:$16 sps:$4 sm:$0xff]   ;;  %v6848_v42 = vld [vmem:[%s9514_s1 + $0x88c] ss:$16 sps:$4 sm:$0xff]  }
 0x191   :  { %4576 = vmatprep.subr.bf16.mxu1 %v6761_v43  ;;  %v6851_v43 = vld [vmem:[%s9514_s1 + $0xa8c] ss:$16 sps:$4 sm:$0xff]  }
 0x193   :  { %4534 = vmatpush1.bf16.msra.mxu0 %v6756_v44  ;;  %v6846_v44 = vld [vmem:[%s9514_s1 + $0x888] ss:$16 sps:$4 sm:$0xff]  }
 0x194   :  { %4577 = vmatpush1.bf16.msra.mxu1 %v6759_v45  ;;  %4535 = vmatprep.subr.bf16.mxu0 %v6764_v46  ;;  %v6849_v45 = vld [vmem:[%s9514_s1 + $0xa88] ss:$16 sps:$4 sm:$0xff]   ;;  %v6854_v46 = vld [vmem:[%s9514_s1 + $0x86c] ss:$16 sps:$4 sm:$0xff]  }
 0x195   :  { %4578 = vmatprep.subr.bf16.mxu1 %v6767_v47  ;;  %v6857_v47 = vld [vmem:[%s9514_s1 + $0xa6c] ss:$16 sps:$4 sm:$0xff]  }
 0x197   :  { %4536 = vmatpush1.bf16.msra.mxu0 %v6762_v48  ;;  %v6852_v48 = vld [vmem:[%s9514_s1 + $0x868] ss:$16 sps:$4 sm:$0xff]  }
 0x198   :  { %4579 = vmatpush1.bf16.msra.mxu1 %v6765_v49  ;;  %4537 = vmatprep.subr.bf16.mxu0 %v6770_v50  ;;  %v6855_v49 = vld [vmem:[%s9514_s1 + $0xa68] ss:$16 sps:$4 sm:$0xff]   ;;  %v6860_v50 = vld [vmem:[%s9514_s1 + $0x84c] ss:$16 sps:$4 sm:$0xff]  }
 0x199   :  { %4580 = vmatprep.subr.bf16.mxu1 %v6773_v51  ;;  %v6863_v51 = vld [vmem:[%s9514_s1 + $0xa4c] ss:$16 sps:$4 sm:$0xff]  }
 0x19b   :  { %4538 = vmatpush1.bf16.msra.mxu0 %v6768_v52  ;;  %v6858_v52 = vld [vmem:[%s9514_s1 + $0x848] ss:$16 sps:$4 sm:$0xff]  }
 0x19c   :  { %4581 = vmatpush1.bf16.msra.mxu1 %v6771_v53  ;;  %4539 = vmatprep.subr.bf16.mxu0 %v6776_v54  ;;  %v6861_v53 = vld [vmem:[%s9514_s1 + $0xa48] ss:$16 sps:$4 sm:$0xff]   ;;  %v6866_v54 = vld [vmem:[%s9514_s1 + $0x82c] ss:$16 sps:$4 sm:$0xff]  }
 0x19d   :  { %4582 = vmatprep.subr.bf16.mxu1 %v6779_v55  ;;  %v6869_v55 = vld [vmem:[%s9514_s1 + $0xa2c] ss:$16 sps:$4 sm:$0xff]  }
 0x19f   :  { %4540 = vmatpush1.bf16.msra.mxu0 %v6774_v56  ;;  %v6864_v56 = vld [vmem:[%s9514_s1 + $0x828] ss:$16 sps:$4 sm:$0xff]  }
 0x1a0   :  { %4583 = vmatpush1.bf16.msra.mxu1 %v6777_v57  ;;  %4541 = vmatprep.subr.bf16.mxu0 %v6782_v58  ;;  %v6867_v57 = vld [vmem:[%s9514_s1 + $0xa28] ss:$16 sps:$4 sm:$0xff]   ;;  %v6872_v58 = vld [vmem:[%s9514_s1 + $0x80c] ss:$16 sps:$4 sm:$0xff]  }
 0x1a1   :  { %4584 = vmatprep.subr.bf16.mxu1 %v6785_v59  ;;  %v6875_v59 = vld [vmem:[%s9514_s1 + $0xa0c] ss:$16 sps:$4 sm:$0xff]  }
 0x1a3   :  { %4542 = vmatpush2.bf16.msra.mxu0 %v6780_v60  ;;  %v6870_v60 = vld [vmem:[%s9514_s1 + $0x808] ss:$16 sps:$4 sm:$0xff]  }
 0x1a4   :  { %4585 = vmatpush2.bf16.msra.mxu1 %v6783_v61  ;;  %4543 = vmatprep.subr.bf16.mxu0 %v6788_v62  ;;  %v6873_v61 = vld [vmem:[%s9514_s1 + $0xa08] ss:$16 sps:$4 sm:$0xff]   ;;  %v6878_v62 = vld [vmem:[%s9514_s1 + $0x9ec] ss:$16 sps:$4 sm:$0xff]  }
 0x1a5   :  { %4586 = vmatprep.subr.bf16.mxu1 %v6791_v63  ;;  %v6881_v63 = vld [vmem:[%s9514_s1 + $0xbec] ss:$16 sps:$4 sm:$0xff]  }
 0x1a7   :  { %4544 = vmatpush2.bf16.msra.mxu0 %v6786_v0  ;;  %v6876_v0 = vld [vmem:[%s9514_s1 + $0x9e8] ss:$16 sps:$4 sm:$0xff]  }
 0x1a8   :  { %4587 = vmatpush2.bf16.msra.mxu1 %v6789_v1  ;;  %4545 = vmatprep.subr.bf16.mxu0 %v6794_v2  ;;  %v6879_v1 = vld [vmem:[%s9514_s1 + $0xbe8] ss:$16 sps:$4 sm:$0xff]   ;;  %v6884_v2 = vld [vmem:[%s9514_s1 + $0x9cc] ss:$16 sps:$4 sm:$0xff]  }
 0x1a9   :  { %4588 = vmatprep.subr.bf16.mxu1 %v6797_v3  ;;  %v6887_v3 = vld [vmem:[%s9514_s1 + $0xbcc] ss:$16 sps:$4 sm:$0xff]  }
 0x1ab   :  { %4546 = vmatpush2.bf16.msra.mxu0 %v6792_v4  ;;  %v6882_v4 = vld [vmem:[%s9514_s1 + $0x9c8] ss:$16 sps:$4 sm:$0xff]  }
 0x1ac   :  { %4589 = vmatpush2.bf16.msra.mxu1 %v6795_v5  ;;  %4547 = vmatprep.subr.bf16.mxu0 %v6800_v6  ;;  %v6885_v5 = vld [vmem:[%s9514_s1 + $0xbc8] ss:$16 sps:$4 sm:$0xff]   ;;  %v6890_v6 = vld [vmem:[%s9514_s1 + $0x9ac] ss:$16 sps:$4 sm:$0xff]  }
 0x1ad   :  { %4590 = vmatprep.subr.bf16.mxu1 %v6803_v7  ;;  %v6893_v7 = vld [vmem:[%s9514_s1 + $0xbac] ss:$16 sps:$4 sm:$0xff]  }
 0x1af   :  { %4548 = vmatpush2.bf16.msra.mxu0 %v6798_v8  ;;  %v6888_v8 = vld [vmem:[%s9514_s1 + $0x9a8] ss:$16 sps:$4 sm:$0xff]  }
 0x1b0   :  { %4591 = vmatpush2.bf16.msra.mxu1 %v6801_v9  ;;  %4549 = vmatprep.subr.bf16.mxu0 %v6806_v10  ;;  %v6891_v9 = vld [vmem:[%s9514_s1 + $0xba8] ss:$16 sps:$4 sm:$0xff]   ;;  %v6896_v10 = vld [vmem:[%s9514_s1 + $0x98c] ss:$16 sps:$4 sm:$0xff]  }
 0x1b1   :  { %4592 = vmatprep.subr.bf16.mxu1 %v6809_v11  ;;  %v6899_v11 = vld [vmem:[%s9514_s1 + $0xb8c] ss:$16 sps:$4 sm:$0xff]  }
 0x1b3   :  { %4550 = vmatpush2.bf16.msra.mxu0 %v6804_v12  ;;  %v6894_v12 = vld [vmem:[%s9514_s1 + $0x988] ss:$16 sps:$4 sm:$0xff]  }
 0x1b4   :  { %4593 = vmatpush2.bf16.msra.mxu1 %v6807_v13  ;;  %4551 = vmatprep.subr.bf16.mxu0 %v6812_v14  ;;  %v6897_v13 = vld [vmem:[%s9514_s1 + $0xb88] ss:$16 sps:$4 sm:$0xff]   ;;  %v6902_v14 = vld [vmem:[%s9514_s1 + $0x96c] ss:$16 sps:$4 sm:$0xff]  }
 0x1b5   :  { %4594 = vmatprep.subr.bf16.mxu1 %v6815_v15  ;;  %v6905_v15 = vld [vmem:[%s9514_s1 + $0xb6c] ss:$16 sps:$4 sm:$0xff]  }
 0x1b7   :  { %4552 = vmatpush2.bf16.msra.mxu0 %v6810_v16  ;;  %v6900_v16 = vld [vmem:[%s9514_s1 + $0x968] ss:$16 sps:$4 sm:$0xff]  }
 0x1b8   :  { %4595 = vmatpush2.bf16.msra.mxu1 %v6813_v17  ;;  %4553 = vmatprep.subr.bf16.mxu0 %v6818_v18  ;;  %v6903_v17 = vld [vmem:[%s9514_s1 + $0xb68] ss:$16 sps:$4 sm:$0xff]   ;;  %v6908_v18 = vld [vmem:[%s9514_s1 + $0x94c] ss:$16 sps:$4 sm:$0xff]  }
 0x1b9   :  { %4596 = vmatprep.subr.bf16.mxu1 %v6821_v19  ;;  %v6911_v19 = vld [vmem:[%s9514_s1 + $0xb4c] ss:$16 sps:$4 sm:$0xff]  }
 0x1bb   :  { %4554 = vmatpush2.bf16.msra.mxu0 %v6816_v20  ;;  %v6906_v20 = vld [vmem:[%s9514_s1 + $0x948] ss:$16 sps:$4 sm:$0xff]  }
 0x1bc   :  { %4597 = vmatpush2.bf16.msra.mxu1 %v6819_v21  ;;  %4555 = vmatprep.subr.bf16.mxu0 %v6824_v22  ;;  %v6909_v21 = vld [vmem:[%s9514_s1 + $0xb48] ss:$16 sps:$4 sm:$0xff]   ;;  %v6914_v22 = vld [vmem:[%s9514_s1 + $0x92c] ss:$16 sps:$4 sm:$0xff]  }
 0x1bd   :  { %4598 = vmatprep.subr.bf16.mxu1 %v6827_v23  ;;  %v6917_v23 = vld [vmem:[%s9514_s1 + $0xb2c] ss:$16 sps:$4 sm:$0xff]  }
 0x1bf   :  { %4556 = vmatpush2.bf16.msra.mxu0 %v6822_v24  ;;  %v6912_v24 = vld [vmem:[%s9514_s1 + $0x928] ss:$16 sps:$4 sm:$0xff]  }
 0x1c0   :  { %4599 = vmatpush2.bf16.msra.mxu1 %v6825_v25  ;;  %4611 = vmatprep.subr.bf16.mxu0 %v6830_v26  ;;  %v6915_v25 = vld [vmem:[%s9514_s1 + $0xb28] ss:$16 sps:$4 sm:$0xff]   ;;  %v6920_v26 = vld [vmem:[%s9514_s1 + $0x90c] ss:$16 sps:$4 sm:$0xff]  }
 0x1c1   :  { %4654 = vmatprep.subr.bf16.mxu1 %v6833_v27  ;;  %v6923_v27 = vld [vmem:[%s9514_s1 + $0xb0c] ss:$16 sps:$4 sm:$0xff]  }
 0x1c2   :  { %4558 = vmatmul.mubr.bf16.vlgmr.msra.gmra.mxu0 %v7166_v32  ;;  %v6924_v32 = vld [vmem:[%s9514_s1 + $0xce8] ss:$16 sps:$4 sm:$0xff]  }
 0x1c3   :  { %4601 = vmatmul.mubr.bf16.vlgmr.msra.gmra.mxu1 %v7167_v33  ;;  %4612 = vmatpush1.bf16.msra.mxu0 %v6828_v28  ;;  %v6918_v28 = vld [vmem:[%s9514_s1 + $0x908] ss:$16 sps:$4 sm:$0xff]  }
 0x1c4   :  { %4655 = vmatpush1.bf16.msra.mxu1 %v6831_v29  ;;  %4613 = vmatprep.subr.bf16.mxu0 %v6836_v30  ;;  %v6921_v29 = vld [vmem:[%s9514_s1 + $0xb08] ss:$16 sps:$4 sm:$0xff]   ;;  %v6926_v30 = vld [vmem:[%s9514_s1 + $0xcec] ss:$16 sps:$4 sm:$0xff]  }
 0x1c5   :  { %4656 = vmatprep.subr.bf16.mxu1 %v6839_v31  ;;  %4643 = vmatprep.mubr.bf16.mxu0 %v7168_v38  ;;  %v6929_v31 = vld [vmem:[%s9514_s1 + $0xeec] ss:$16 sps:$4 sm:$0xff]   ;;  %v6927_v33 = vld [vmem:[%s9514_s1 + $0xee8] ss:$16 sps:$4 sm:$0xff]   ;;  %v7170_v38 = vld [vmem:[%s9515_s0 + $0x20] ss:$80 sps:$4 sm:$0xff]  }
 0x1c6   :  { %4686 = vmatprep.mubr.bf16.mxu1 %v7169_v39  ;;  %v7171_v39 = vld [vmem:[%s9515_s0 + $0x28] ss:$80 sps:$4 sm:$0xff]  }
 0x1c7   :  { %4614 = vmatpush1.bf16.msra.mxu0 %v6834_v34  ;;  %v6932_v34 = vld [vmem:[%s9514_s1 + $0xccc] ss:$16 sps:$4 sm:$0xff]  }
 0x1c8   :  { %4657 = vmatpush1.bf16.msra.mxu1 %v6837_v35  ;;  %4615 = vmatprep.subr.bf16.mxu0 %v6842_v36  ;;  %v6935_v35 = vld [vmem:[%s9514_s1 + $0xecc] ss:$16 sps:$4 sm:$0xff]   ;;  %v6930_v36 = vld [vmem:[%s9514_s1 + $0xcc8] ss:$16 sps:$4 sm:$0xff]  }
 0x1c9   :  { %4658 = vmatprep.subr.bf16.mxu1 %v6845_v37  ;;  %v6933_v37 = vld [vmem:[%s9514_s1 + $0xec8] ss:$16 sps:$4 sm:$0xff]  }
 0x1cb   :  { %4616 = vmatpush1.bf16.msra.mxu0 %v6840_v40  ;;  %v6938_v40 = vld [vmem:[%s9514_s1 + $0xcac] ss:$16 sps:$4 sm:$0xff]  }
 0x1cc   :  { %4659 = vmatpush1.bf16.msra.mxu1 %v6843_v41  ;;  %4617 = vmatprep.subr.bf16.mxu0 %v6848_v42  ;;  %v6941_v41 = vld [vmem:[%s9514_s1 + $0xeac] ss:$16 sps:$4 sm:$0xff]   ;;  %v6936_v42 = vld [vmem:[%s9514_s1 + $0xca8] ss:$16 sps:$4 sm:$0xff]  }
 0x1cd   :  { %4660 = vmatprep.subr.bf16.mxu1 %v6851_v43  ;;  %v6939_v43 = vld [vmem:[%s9514_s1 + $0xea8] ss:$16 sps:$4 sm:$0xff]  }
 0x1cf   :  { %4618 = vmatpush1.bf16.msra.mxu0 %v6846_v44  ;;  %v7172_v44 = vld [vmem:[%s9515_s0 + $0x34] ss:$80 sps:$4 sm:$0xff]  }
 0x1d0   :  { %4661 = vmatpush1.bf16.msra.mxu1 %v6849_v45  ;;  %4619 = vmatprep.subr.bf16.mxu0 %v6854_v46  ;;  %v7173_v45 = vld [vmem:[%s9515_s0 + $0x3c] ss:$80 sps:$4 sm:$0xff]  }
 0x1d1   :  { %4662 = vmatprep.subr.bf16.mxu1 %v6857_v47  ;;  %v6944_v46 = vld [vmem:[%s9514_s1 + $0xc8c] ss:$16 sps:$4 sm:$0xff]  }
 0x1d2   :  { %v6947_v47 = vld [vmem:[%s9514_s1 + $0xe8c] ss:$16 sps:$4 sm:$0xff]  }
 0x1d3   :  { %4620 = vmatpush1.bf16.msra.mxu0 %v6852_v48  ;;  %v6942_v48 = vld [vmem:[%s9514_s1 + $0xc88] ss:$16 sps:$4 sm:$0xff]  }
 0x1d4   :  { %4663 = vmatpush1.bf16.msra.mxu1 %v6855_v49  ;;  %4621 = vmatprep.subr.bf16.mxu0 %v6860_v50  ;;  %v6945_v49 = vld [vmem:[%s9514_s1 + $0xe88] ss:$16 sps:$4 sm:$0xff]   ;;  %v6950_v50 = vld [vmem:[%s9514_s1 + $0xc6c] ss:$16 sps:$4 sm:$0xff]  }
 0x1d5   :  { %4664 = vmatprep.subr.bf16.mxu1 %v6863_v51  ;;  %v6953_v51 = vld [vmem:[%s9514_s1 + $0xe6c] ss:$16 sps:$4 sm:$0xff]  }
 0x1d7   :  { %4622 = vmatpush1.bf16.msra.mxu0 %v6858_v52  ;;  %v6948_v52 = vld [vmem:[%s9514_s1 + $0xc68] ss:$16 sps:$4 sm:$0xff]  }
 0x1d8   :  { %4665 = vmatpush1.bf16.msra.mxu1 %v6861_v53  ;;  %4623 = vmatprep.subr.bf16.mxu0 %v6866_v54  ;;  %v6951_v53 = vld [vmem:[%s9514_s1 + $0xe68] ss:$16 sps:$4 sm:$0xff]   ;;  %v6956_v54 = vld [vmem:[%s9514_s1 + $0xc4c] ss:$16 sps:$4 sm:$0xff]  }
 0x1d9   :  { %4666 = vmatprep.subr.bf16.mxu1 %v6869_v55  ;;  %v6959_v55 = vld [vmem:[%s9514_s1 + $0xe4c] ss:$16 sps:$4 sm:$0xff]  }
 0x1db   :  { %4624 = vmatpush1.bf16.msra.mxu0 %v6864_v56  ;;  %v6954_v56 = vld [vmem:[%s9514_s1 + $0xc48] ss:$16 sps:$4 sm:$0xff]  }
 0x1dc   :  { %4667 = vmatpush1.bf16.msra.mxu1 %v6867_v57  ;;  %4625 = vmatprep.subr.bf16.mxu0 %v6872_v58  ;;  %v6957_v57 = vld [vmem:[%s9514_s1 + $0xe48] ss:$16 sps:$4 sm:$0xff]   ;;  %v6962_v58 = vld [vmem:[%s9514_s1 + $0xc2c] ss:$16 sps:$4 sm:$0xff]  }
 0x1dd   :  { %4668 = vmatprep.subr.bf16.mxu1 %v6875_v59  ;;  %v6965_v59 = vld [vmem:[%s9514_s1 + $0xe2c] ss:$16 sps:$4 sm:$0xff]  }
 0x1df   :  { %4626 = vmatpush1.bf16.msra.mxu0 %v6870_v60  ;;  %v6960_v60 = vld [vmem:[%s9514_s1 + $0xc28] ss:$16 sps:$4 sm:$0xff]  }
 0x1e0   :  { %4669 = vmatpush1.bf16.msra.mxu1 %v6873_v61  ;;  %4627 = vmatprep.subr.bf16.mxu0 %v6878_v62  ;;  %v6963_v61 = vld [vmem:[%s9514_s1 + $0xe28] ss:$16 sps:$4 sm:$0xff]   ;;  %v6968_v62 = vld [vmem:[%s9514_s1 + $0xc0c] ss:$16 sps:$4 sm:$0xff]  }
 0x1e1   :  { %4670 = vmatprep.subr.bf16.mxu1 %v6881_v63  ;;  %v6971_v63 = vld [vmem:[%s9514_s1 + $0xe0c] ss:$16 sps:$4 sm:$0xff]  }
 0x1e3   :  { %4628 = vmatpush2.bf16.msra.mxu0 %v6876_v0  ;;  %v6966_v0 = vld [vmem:[%s9514_s1 + $0xc08] ss:$16 sps:$4 sm:$0xff]  }
 0x1e4   :  { %4671 = vmatpush2.bf16.msra.mxu1 %v6879_v1  ;;  %4629 = vmatprep.subr.bf16.mxu0 %v6884_v2  ;;  %v6969_v1 = vld [vmem:[%s9514_s1 + $0xe08] ss:$16 sps:$4 sm:$0xff]   ;;  %v6974_v2 = vld [vmem:[%s9514_s1 + $0xdec] ss:$16 sps:$4 sm:$0xff]  }
 0x1e5   :  { %4672 = vmatprep.subr.bf16.mxu1 %v6887_v3  ;;  %v6977_v3 = vld [vmem:[%s9514_s1 + $0xfec] ss:$16 sps:$4 sm:$0xff]  }
 0x1e7   :  { %4630 = vmatpush2.bf16.msra.mxu0 %v6882_v4  ;;  %v6972_v4 = vld [vmem:[%s9514_s1 + $0xde8] ss:$16 sps:$4 sm:$0xff]  }
 0x1e8   :  { %4673 = vmatpush2.bf16.msra.mxu1 %v6885_v5  ;;  %4631 = vmatprep.subr.bf16.mxu0 %v6890_v6  ;;  %v6975_v5 = vld [vmem:[%s9514_s1 + $0xfe8] ss:$16 sps:$4 sm:$0xff]   ;;  %v6980_v6 = vld [vmem:[%s9514_s1 + $0xdcc] ss:$16 sps:$4 sm:$0xff]  }
 0x1e9   :  { %4674 = vmatprep.subr.bf16.mxu1 %v6893_v7  ;;  %v6983_v7 = vld [vmem:[%s9514_s1 + $0xfcc] ss:$16 sps:$4 sm:$0xff]  }
 0x1eb   :  { %4632 = vmatpush2.bf16.msra.mxu0 %v6888_v8  ;;  %v6978_v8 = vld [vmem:[%s9514_s1 + $0xdc8] ss:$16 sps:$4 sm:$0xff]  }
 0x1ec   :  { %4675 = vmatpush2.bf16.msra.mxu1 %v6891_v9  ;;  %4633 = vmatprep.subr.bf16.mxu0 %v6896_v10  ;;  %v6981_v9 = vld [vmem:[%s9514_s1 + $0xfc8] ss:$16 sps:$4 sm:$0xff]   ;;  %v6986_v10 = vld [vmem:[%s9514_s1 + $0xdac] ss:$16 sps:$4 sm:$0xff]  }
 0x1ed   :  { %4676 = vmatprep.subr.bf16.mxu1 %v6899_v11  ;;  %v6989_v11 = vld [vmem:[%s9514_s1 + $0xfac] ss:$16 sps:$4 sm:$0xff]  }
 0x1ef   :  { %4634 = vmatpush2.bf16.msra.mxu0 %v6894_v12  ;;  %v6984_v12 = vld [vmem:[%s9514_s1 + $0xda8] ss:$16 sps:$4 sm:$0xff]  }
 0x1f0   :  { %4677 = vmatpush2.bf16.msra.mxu1 %v6897_v13  ;;  %4635 = vmatprep.subr.bf16.mxu0 %v6902_v14  ;;  %v6987_v13 = vld [vmem:[%s9514_s1 + $0xfa8] ss:$16 sps:$4 sm:$0xff]   ;;  %v6992_v14 = vld [vmem:[%s9514_s1 + $0xd8c] ss:$16 sps:$4 sm:$0xff]  }
 0x1f1   :  { %4678 = vmatprep.subr.bf16.mxu1 %v6905_v15  ;;  %v6995_v15 = vld [vmem:[%s9514_s1 + $0xf8c] ss:$16 sps:$4 sm:$0xff]  }
 0x1f3   :  { %4636 = vmatpush2.bf16.msra.mxu0 %v6900_v16  ;;  %v6990_v16 = vld [vmem:[%s9514_s1 + $0xd88] ss:$16 sps:$4 sm:$0xff]  }
 0x1f4   :  { %4679 = vmatpush2.bf16.msra.mxu1 %v6903_v17  ;;  %4637 = vmatprep.subr.bf16.mxu0 %v6908_v18  ;;  %v6993_v17 = vld [vmem:[%s9514_s1 + $0xf88] ss:$16 sps:$4 sm:$0xff]   ;;  %v6998_v18 = vld [vmem:[%s9514_s1 + $0xd6c] ss:$16 sps:$4 sm:$0xff]  }
 0x1f5   :  { %4680 = vmatprep.subr.bf16.mxu1 %v6911_v19  ;;  %v7001_v19 = vld [vmem:[%s9514_s1 + $0xf6c] ss:$16 sps:$4 sm:$0xff]  }
 0x1f7   :  { %4638 = vmatpush2.bf16.msra.mxu0 %v6906_v20  ;;  %v9010_v20 = vpop.f32.mrf.mxu0 }
 0x1f8   :  { %4681 = vmatpush2.bf16.msra.mxu1 %v6909_v21  ;;  %4639 = vmatprep.subr.bf16.mxu0 %v6914_v22  ;;  %v6996_v21 = vld [vmem:[%s9514_s1 + $0xd68] ss:$16 sps:$4 sm:$0xff]  }
 0x1f9   :  { %4682 = vmatprep.subr.bf16.mxu1 %v6917_v23  ;;  %v6999_v22 = vld [vmem:[%s9514_s1 + $0xf68] ss:$16 sps:$4 sm:$0xff]   ;;  %v7004_v23 = vld [vmem:[%s9514_s1 + $0xd4c] ss:$16 sps:$4 sm:$0xff]  }
 0x1fb   :  { %4640 = vmatpush2.bf16.msra.mxu0 %v6912_v24  ;;  %v7007_v24 = vld [vmem:[%s9514_s1 + $0xf4c] ss:$16 sps:$4 sm:$0xff]  }
 0x1fc   :  { %4683 = vmatpush2.bf16.msra.mxu1 %v6915_v25  ;;  %4641 = vmatprep.subr.bf16.mxu0 %v6920_v26  ;;  %v9024_v25 = vpop.f32.mrf.mxu0  ;;  %v7002_v26 = vld [vmem:[%s9514_s1 + $0xd48] ss:$16 sps:$4 sm:$0xff]  }
 0x1fd   :  { %4684 = vmatprep.subr.bf16.mxu1 %v6923_v27  ;;  %v7005_v27 = vld [vmem:[%s9514_s1 + $0xf48] ss:$16 sps:$4 sm:$0xff]  }
 0x1ff   :  { %4642 = vmatpush2.bf16.msra.mxu0 %v6918_v28  ;;  %v9032_v28 = vpop.f32.mrf.mxu1 }
 0x200   :  { %4685 = vmatpush2.bf16.msra.mxu1 %v6921_v29  ;;  %4697 = vmatprep.subr.bf16.mxu0 %v6926_v30  ;;  %v7010_v29 = vld [vmem:[%s9514_s1 + $0xd2c] ss:$16 sps:$4 sm:$0xff]  }
 0x201   :  { %4740 = vmatprep.subr.bf16.mxu1 %v6929_v31  ;;  %v7013_v30 = vld [vmem:[%s9514_s1 + $0xf2c] ss:$16 sps:$4 sm:$0xff]   ;;  %v9040_v31 = vpop.f32.mrf.mxu0 }
 0x202   :  { %4644 = vmatmul.mubr.bf16.vlgmr.msra.gmra.mxu0 %v7170_v38  ;;  %v7014_v38 = vld [vmem:[%s9514_s1 + $0xd08] ss:$16 sps:$4 sm:$0xff]  }
 0x203   :  { %4687 = vmatmul.mubr.bf16.vlgmr.msra.gmra.mxu1 %v7171_v39  ;;  %4698 = vmatpush1.bf16.msra.mxu0 %v6924_v32  ;;  %v7008_v32 = vld [vmem:[%s9514_s1 + $0xd28] ss:$16 sps:$4 sm:$0xff]  }
 0x204   :  { %4741 = vmatpush1.bf16.msra.mxu1 %v6927_v33  ;;  %4699 = vmatprep.subr.bf16.mxu0 %v6932_v34  ;;  %v7011_v33 = vld [vmem:[%s9514_s1 + $0xf28] ss:$16 sps:$4 sm:$0xff]   ;;  %v9048_v34 = vpop.f32.mrf.mxu1 }
 0x205   :  { %4742 = vmatprep.subr.bf16.mxu1 %v6935_v35  ;;  %4729 = vmatprep.mubr.bf16.mxu0 %v7172_v44  ;;  %v7016_v35 = vld [vmem:[%s9514_s1 + $0xd0c] ss:$16 sps:$4 sm:$0xff]   ;;  %v7017_v39 = vld [vmem:[%s9514_s1 + $0xf08] ss:$16 sps:$4 sm:$0xff]  }
 0x206   :  { %4772 = vmatprep.mubr.bf16.mxu1 %v7173_v45  ;;  %v7020_v44 = vld [vmem:[%s9514_s1 + $0x10e8] ss:$16 sps:$4 sm:$0xff]  }
 0x207   :  { %4700 = vmatpush1.bf16.msra.mxu0 %v6930_v36  ;;  %v7019_v36 = vld [vmem:[%s9514_s1 + $0xf0c] ss:$16 sps:$4 sm:$0xff]   ;;  %v7023_v45 = vld [vmem:[%s9514_s1 + $0x12e8] ss:$16 sps:$4 sm:$0xff]  }
 0x208   :  { %4743 = vmatpush1.bf16.msra.mxu1 %v6933_v37  ;;  %4701 = vmatprep.subr.bf16.mxu0 %v6938_v40  ;;  %v9056_v37 = vpop.f32.mrf.mxu0  ;;  %v9064_v40 = vpop.f32.mrf.mxu1 }
 0x209   :  { %4744 = vmatprep.subr.bf16.mxu1 %v6941_v41 }
 0x20a   :  { %v9066_v41 = vpop.f32.mrf.mxu0 }
 0x20b   :  { %4702 = vmatpush1.bf16.msra.mxu0 %v6936_v42  ;;  %v7022_v42 = vld [vmem:[%s9514_s1 + $0x10ec] ss:$16 sps:$4 sm:$0xff]  }
 0x20c   :  { %4745 = vmatpush1.bf16.msra.mxu1 %v6939_v43  ;;  %4703 = vmatprep.subr.bf16.mxu0 %v6944_v46  ;;  %v7025_v43 = vld [vmem:[%s9514_s1 + $0x12ec] ss:$16 sps:$4 sm:$0xff]   ;;  %v9080_v46 = vpop.f32.mrf.mxu1 }
 0x20d   :  { %4746 = vmatprep.subr.bf16.mxu1 %v6947_v47  ;;  %v9082_v47 = vpop.f32.mrf.mxu0 }
 0x20f   :  { %4704 = vmatpush1.bf16.msra.mxu0 %v6942_v48  ;;  %v7028_v48 = vld [vmem:[%s9514_s1 + $0x10cc] ss:$16 sps:$4 sm:$0xff]  }
 0x210   :  { %4747 = vmatpush1.bf16.msra.mxu1 %v6945_v49  ;;  %4705 = vmatprep.subr.bf16.mxu0 %v6950_v50  ;;  %v7031_v49 = vld [vmem:[%s9514_s1 + $0x12cc] ss:$16 sps:$4 sm:$0xff]   ;;  %v9090_v50 = vpop.f32.mrf.mxu1 }
 0x211   :  { %4748 = vmatprep.subr.bf16.mxu1 %v6953_v51  ;;  %v7174_v51 = vld [vmem:[%s9515_s0 + $0x30] ss:$80 sps:$4 sm:$0xff]  }
 0x213   :  { %4706 = vmatpush1.bf16.msra.mxu0 %v6948_v52  ;;  %v7175_v52 = vld [vmem:[%s9515_s0 + $0x38] ss:$80 sps:$4 sm:$0xff]  }
 0x214   :  { %4749 = vmatpush1.bf16.msra.mxu1 %v6951_v53  ;;  %4707 = vmatprep.subr.bf16.mxu0 %v6956_v54  ;;  %v7026_v53 = vld [vmem:[%s9514_s1 + $0x10c8] ss:$16 sps:$4 sm:$0xff]  }
 0x215   :  { %4750 = vmatprep.subr.bf16.mxu1 %v6959_v55  ;;  %v7029_v54 = vld [vmem:[%s9514_s1 + $0x12c8] ss:$16 sps:$4 sm:$0xff]   ;;  %v9104_v55 = vpop.f32.mrf.mxu0 }
 0x217   :  { %4708 = vmatpush1.bf16.msra.mxu0 %v6954_v56  ;;  %v7034_v56 = vld [vmem:[%s9514_s1 + $0x10ac] ss:$16 sps:$4 sm:$0xff]  }
 0x218   :  { %4751 = vmatpush1.bf16.msra.mxu1 %v6957_v57  ;;  %4709 = vmatprep.subr.bf16.mxu0 %v6962_v58  ;;  %v7037_v57 = vld [vmem:[%s9514_s1 + $0x12ac] ss:$16 sps:$4 sm:$0xff]   ;;  %v7176_v58 = vld [vmem:[%s9515_s0 + $0x44] ss:$80 sps:$4 sm:$0xff]  }
 0x219   :  { %4752 = vmatprep.subr.bf16.mxu1 %v6965_v59  ;;  %v7177_v59 = vld [vmem:[%s9515_s0 + $0x4c] ss:$80 sps:$4 sm:$0xff]  }
 0x21b   :  { %4710 = vmatpush1.bf16.msra.mxu0 %v6960_v60  ;;  %v9118_v60 = vpop.f32.mrf.mxu1 }
 0x21c   :  { %4753 = vmatpush1.bf16.msra.mxu1 %v6963_v61  ;;  %4711 = vmatprep.subr.bf16.mxu0 %v6968_v62  ;;  %v7032_v61 = vld [vmem:[%s9514_s1 + $0x10a8] ss:$16 sps:$4 sm:$0xff]  }
 0x21d   :  { %4754 = vmatprep.subr.bf16.mxu1 %v6971_v63  ;;  %v7035_v62 = vld [vmem:[%s9514_s1 + $0x12a8] ss:$16 sps:$4 sm:$0xff]   ;;  %v9126_v63 = vpop.f32.mrf.mxu0 }
 0x21f   :  { %4712 = vmatpush1.bf16.msra.mxu0 %v6966_v0  ;;  %v7040_v0 = vld [vmem:[%s9514_s1 + $0x108c] ss:$16 sps:$4 sm:$0xff]  }
 0x220   :  { %4755 = vmatpush1.bf16.msra.mxu1 %v6969_v1  ;;  %4713 = vmatprep.subr.bf16.mxu0 %v6974_v2  ;;  %v7043_v1 = vld [vmem:[%s9514_s1 + $0x128c] ss:$16 sps:$4 sm:$0xff]   ;;  %v9134_v2 = vpop.f32.mrf.mxu1 }
 0x221   :  { %4756 = vmatprep.subr.bf16.mxu1 %v6977_v3  ;;  %v9136_v3 = vpop.f32.mrf.mxu0 }
 0x223   :  { %4714 = vmatpush2.bf16.msra.mxu0 %v6972_v4  ;;  %v7038_v4 = vld [vmem:[%s9514_s1 + $0x1088] ss:$16 sps:$4 sm:$0xff]  }
 0x224   :  { %4757 = vmatpush2.bf16.msra.mxu1 %v6975_v5  ;;  %4715 = vmatprep.subr.bf16.mxu0 %v6980_v6  ;;  %v7041_v5 = vld [vmem:[%s9514_s1 + $0x1288] ss:$16 sps:$4 sm:$0xff]   ;;  %v7046_v6 = vld [vmem:[%s9514_s1 + $0x106c] ss:$16 sps:$4 sm:$0xff]  }
 0x225   :  { %4758 = vmatprep.subr.bf16.mxu1 %v6983_v7  ;;  %v7049_v7 = vld [vmem:[%s9514_s1 + $0x126c] ss:$16 sps:$4 sm:$0xff]  }
 0x227   :  { %4716 = vmatpush2.bf16.msra.mxu0 %v6978_v8  ;;  %v9150_v8 = vpop.f32.mrf.mxu1 }
 0x228   :  { %4759 = vmatpush2.bf16.msra.mxu1 %v6981_v9  ;;  %4717 = vmatprep.subr.bf16.mxu0 %v6986_v10  ;;  %v9152_v9 = vpop.f32.mrf.mxu0  ;;  %v689_v10 = vlaneseq }
 0x229   :  { %4760 = vmatprep.subr.bf16.mxu1 %v6989_v11  ;;  %v7044_v11 = vld [vmem:[%s9514_s1 + $0x1068] ss:$16 sps:$4 sm:$0xff]  }
 0x22b   :  { %4718 = vmatpush2.bf16.msra.mxu0 %v6984_v12  ;;  %v7047_v12 = vld [vmem:[%s9514_s1 + $0x1268] ss:$16 sps:$4 sm:$0xff]  }
 0x22c   :  { %4761 = vmatpush2.bf16.msra.mxu1 %v6987_v13  ;;  %4719 = vmatprep.subr.bf16.mxu0 %v6992_v14  ;;  %v9160_v13 = vpop.f32.mrf.mxu1  ;;  %v7052_v14 = vld [vmem:[%s9514_s1 + $0x104c] ss:$16 sps:$4 sm:$0xff]  }
 0x22d   :  { %4762 = vmatprep.subr.bf16.mxu1 %v6995_v15  ;;  %v7055_v15 = vld [vmem:[%s9514_s1 + $0x124c] ss:$16 sps:$4 sm:$0xff]  }
 0x22f   :  { %4720 = vmatpush2.bf16.msra.mxu0 %v6990_v16  ;;  %v9168_v16 = vpop.f32.mrf.mxu0 }
 0x230   :  { %4763 = vmatpush2.bf16.msra.mxu1 %v6993_v17  ;;  %4721 = vmatprep.subr.bf16.mxu0 %v6998_v18  ;;  %v9170_v17 = vshrl.u32 %v689_v10, 7  ;;  %v7050_v18 = vld [vmem:[%s9514_s1 + $0x1048] ss:$16 sps:$4 sm:$0xff]  }
 0x231   :  { %4764 = vmatprep.subr.bf16.mxu1 %v7001_v19  ;;  %v7053_v19 = vld [vmem:[%s9514_s1 + $0x1248] ss:$16 sps:$4 sm:$0xff]  }
 0x232   :  { %v7083_v10 = vld [vmem:[%s9514_s1 + $0x13a8] ss:$16 sps:$4 sm:$0xff]  }
 0x233   :  { %4722 = vmatpush2.bf16.msra.mxu0 %v6996_v21  ;;  %v9178_v21 = vpop.f32.mrf.mxu1 }
 0x234   :  { %4765 = vmatpush2.bf16.msra.mxu1 %v6999_v22  ;;  %4723 = vmatprep.subr.bf16.mxu0 %v7004_v23  ;;  %v7058_v22 = vld [vmem:[%s9514_s1 + $0x102c] ss:$16 sps:$4 sm:$0xff]  }
 0x235   :  { %4766 = vmatprep.subr.bf16.mxu1 %v7007_v24  ;;  %v7061_v23 = vld [vmem:[%s9514_s1 + $0x122c] ss:$16 sps:$4 sm:$0xff]   ;;  %v4221_v24 = vpop.f32.mrf.mxu0 }
 0x237   :  { %4724 = vmatpush2.bf16.msra.mxu0 %v7002_v26  ;;  %v695_v26 = vsub.s32 1, %v9170_v17 }
 0x238   :  { %4767 = vmatpush2.bf16.msra.mxu1 %v7005_v27  ;;  %4725 = vmatprep.subr.bf16.mxu0 %v7010_v29  ;;  %v7056_v27 = vld [vmem:[%s9514_s1 + $0x1028] ss:$16 sps:$4 sm:$0xff]  }
 0x239   :  { %4768 = vmatprep.subr.bf16.mxu1 %v7013_v30  ;;  %v7059_v29 = vld [vmem:[%s9514_s1 + $0x1228] ss:$16 sps:$4 sm:$0xff]   ;;  %v9196_v30 = vld [vmem:[%s9517_s2] sm:$0xf] }
 0x23b   :  { %4726 = vmatpush2.bf16.msra.mxu0 %v7008_v32  ;;  %v9198_v32 = vpop.f32.mrf.mxu1 }
 0x23c   :  { %4769 = vmatpush2.bf16.msra.mxu1 %v7011_v33  ;;  %4727 = vmatprep.subr.bf16.mxu0 %v7016_v35  ;;  %v9200_v33 = vpop.f32.mrf.mxu0  ;;  %v7064_v35 = vld [vmem:[%s9514_s1 + $0x100c] ss:$16 sps:$4 sm:$0xff]  }
 0x23d   :  { %4770 = vmatprep.subr.bf16.mxu1 %v7019_v36  ;;  %v7067_v36 = vld [vmem:[%s9514_s1 + $0x120c] ss:$16 sps:$4 sm:$0xff]  }
 0x23f   :  { %4728 = vmatpush2.bf16.msra.mxu0 %v7014_v38  ;;  %v696_v38 = vrot.slane %v9196_v30, %v695_v26 }
 0x240   :  { %4771 = vmatpush2.bf16.msra.mxu1 %v7017_v39  ;;  %4783 = vmatprep.subr.bf16.mxu0 %v7022_v42  ;;  %v7062_v39 = vld [vmem:[%s9514_s1 + $0x1008] ss:$16 sps:$4 sm:$0xff]  }
 0x241   :  { %4826 = vmatprep.subr.bf16.mxu1 %v7025_v43  ;;  %v7065_v42 = vld [vmem:[%s9514_s1 + $0x1208] ss:$16 sps:$4 sm:$0xff]   ;;  %v4264_v43 = vpop.f32.mrf.mxu1 }
 0x242   :  { %4730 = vmatmul.mubr.bf16.vlgmr.msra.gmra.mxu0 %v7174_v51 }
 0x243   :  { %4773 = vmatmul.mubr.bf16.vlgmr.msra.gmra.mxu1 %v7175_v52  ;;  %4784 = vmatpush1.bf16.msra.mxu0 %v7020_v44  ;;  %v9215_v44 = vpop.f32.mrf.mxu0  ;;  %v9224_v51 = vpop.f32.mrf.mxu1  ;;  %v4046_v52 = vadd.f32 %v9024_v25, %v696_v38  ;;  %v7079_v25 = vld [vmem:[%s9514_s1 + $0x13cc] ss:$16 sps:$4 sm:$0xff]  }
 0x244   :  { %4827 = vmatpush1.bf16.msra.mxu1 %v7023_v45  ;;  %4785 = vmatprep.subr.bf16.mxu0 %v7028_v48  ;;  %v7070_v45 = vld [vmem:[%s9514_s1 + $0x11ec] ss:$16 sps:$4 sm:$0xff]  }
 0x245   :  { %4828 = vmatprep.subr.bf16.mxu1 %v7031_v49  ;;  %4815 = vmatprep.mubr.bf16.mxu0 %v7176_v58  ;;  %v7073_v48 = vld [vmem:[%s9514_s1 + $0x13ec] ss:$16 sps:$4 sm:$0xff]   ;;  %v4050_v49 = vadd.f32 %v9056_v37, %v696_v38  ;;  %v9242_v58 = vpop.f32.mrf.mxu1 }
 0x246   :  { %4858 = vmatprep.mubr.bf16.mxu1 %v7177_v59  ;;  %v7076_v37 = vld [vmem:[%s9514_s1 + $0x11cc] ss:$16 sps:$4 sm:$0xff]   ;;  %v4089_v59 = vadd.f32 %v9048_v34, %v4046_v52 }
 0x247   :  { %4786 = vmatpush1.bf16.msra.mxu0 %v7026_v53  ;;  %v7068_v53 = vld [vmem:[%s9514_s1 + $0x11e8] ss:$16 sps:$4 sm:$0xff]   ;;  %v7085_v34 = vld [vmem:[%s9514_s1 + $0x13ac] ss:$16 sps:$4 sm:$0xff]  }
 0x248   :  { %4829 = vmatpush1.bf16.msra.mxu1 %v7029_v54  ;;  %4787 = vmatprep.subr.bf16.mxu0 %v7034_v56  ;;  %v7071_v54 = vld [vmem:[%s9514_s1 + $0x13e8] ss:$16 sps:$4 sm:$0xff]   ;;  %v9233_v56 = vpop.f32.mrf.mxu0 }
 0x249   :  { %4830 = vmatprep.subr.bf16.mxu1 %v7037_v57  ;;  %v4093_v57 = vadd.f32 %v9080_v46, %v4050_v49  ;;  %v7082_v46 = vld [vmem:[%s9514_s1 + $0x11ac] ss:$16 sps:$4 sm:$0xff]   ;;  %v7101_v49 = vld [vmem:[%s9514_s1 + $0x1348] ss:$16 sps:$4 sm:$0xff]  }
 0x24b   :  { %4788 = vmatpush1.bf16.msra.mxu0 %v7032_v61  ;;  %v4136_v61 = vadd.f32 %v9126_v63, %v4093_v57  ;;  %v4132_v63 = vadd.f32 %v9082_v47, %v4089_v59  ;;  %v7088_v47 = vld [vmem:[%s9514_s1 + $0x118c] ss:$16 sps:$4 sm:$0xff]   ;;  %v7104_v59 = vld [vmem:[%s9514_s1 + $0x1128] ss:$16 sps:$4 sm:$0xff]  }
 0x24c   :  { %4831 = vmatpush1.bf16.msra.mxu1 %v7035_v62  ;;  %4789 = vmatprep.subr.bf16.mxu0 %v7040_v0  ;;  %v7074_v62 = vld [vmem:[%s9514_s1 + $0x11c8] ss:$16 sps:$4 sm:$0xff]  }
 0x24d   :  { %4832 = vmatprep.subr.bf16.mxu1 %v7043_v1  ;;  %v7077_v0 = vld [vmem:[%s9514_s1 + $0x13c8] ss:$16 sps:$4 sm:$0xff]   ;;  %v4307_v1 = vpop.f32.mrf.mxu0 }
 0x24f   :  { %4790 = vmatpush1.bf16.msra.mxu0 %v7038_v4  ;;  %v9259_v4 = vpop.f32.mrf.mxu1 }
 0x250   :  { %4833 = vmatpush1.bf16.msra.mxu1 %v7041_v5  ;;  %4791 = vmatprep.subr.bf16.mxu0 %v7046_v6  ;;  %v9261_v5 = vpop.f32.mrf.mxu0  ;;  %v4179_v6 = vadd.f32 %v9150_v8, %v4136_v61  ;;  %v7091_v8 = vld [vmem:[%s9514_s1 + $0x138c] ss:$16 sps:$4 sm:$0xff]   ;;  %v7107_v61 = vld [vmem:[%s9514_s1 + $0x1328] ss:$16 sps:$4 sm:$0xff]  }
 0x251   :  { %4834 = vmatprep.subr.bf16.mxu1 %v7049_v7  ;;  %v7080_v7 = vld [vmem:[%s9514_s1 + $0x11a8] ss:$16 sps:$4 sm:$0xff]  }
 0x253   :  { %4792 = vmatpush1.bf16.msra.mxu0 %v7044_v11  ;;  %v4175_v11 = vadd.f32 %v9118_v60, %v4132_v63  ;;  %v7094_v60 = vld [vmem:[%s9514_s1 + $0x116c] ss:$16 sps:$4 sm:$0xff]   ;;  %v7110_v63 = vld [vmem:[%s9514_s1 + $0x1108] ss:$16 sps:$4 sm:$0xff]  }
 0x254   :  { %4835 = vmatpush1.bf16.msra.mxu1 %v7047_v12  ;;  %4793 = vmatprep.subr.bf16.mxu0 %v7052_v14  ;;  %v4222_v12 = vadd.f32 %v4221_v24, %v4179_v6  ;;  %v4350_v14 = vpop.f32.mrf.mxu1  ;;  %v7113_v6 = vld [vmem:[%s9514_s1 + $0x1308] ss:$16 sps:$4 sm:$0xff]  }
 0x255   :  { %4836 = vmatprep.subr.bf16.mxu1 %v7055_v15  ;;  %v4389_v15 = vpop.f32.mrf.mxu0 }
 0x256   :  { %v4265_v24 = vadd.f32 %v4264_v43, %v4222_v12  ;;  %v7117_v12 = vld [vmem:[%s9516_s3 + $0x38] sm:$0xff]  }
 0x257   :  { %4794 = vmatpush1.bf16.msra.mxu0 %v7050_v18  ;;  %v4218_v18 = vadd.f32 %v9152_v9, %v4175_v11  ;;  %v7097_v9 = vld [vmem:[%s9514_s1 + $0x136c] ss:$16 sps:$4 sm:$0xff]   ;;  %v9292_v26 = vpop.f32.mrf.mxu0 }
 0x258   :  { %4837 = vmatpush1.bf16.msra.mxu1 %v7053_v19  ;;  %4795 = vmatprep.subr.bf16.mxu0 %v7058_v22  ;;  %v7086_v19 = vld [vmem:[%s9514_s1 + $0x1188] ss:$16 sps:$4 sm:$0xff]  }
 0x259   :  { %4838 = vmatprep.subr.bf16.mxu1 %v7061_v23  ;;  %v7089_v22 = vld [vmem:[%s9514_s1 + $0x1388] ss:$16 sps:$4 sm:$0xff]   ;;  %v9284_v23 = vpop.f32.mrf.mxu1  ;;  %v4393_v43 = vpop.f32.mrf.mxu0 }
 0x25b   :  { %4796 = vmatpush1.bf16.msra.mxu0 %v7056_v27  ;;  %v4261_v27 = vadd.f32 %v9178_v21, %v4218_v18  ;;  %v4432_v38 = vpop.f32.mrf.mxu1  ;;  %v7103_v21 = vld [vmem:[%s9514_s1 + $0x134c] ss:$16 sps:$4 sm:$0xff]  }
 0x25c   :  { %4839 = vmatpush1.bf16.msra.mxu1 %v7059_v29  ;;  %4797 = vmatprep.subr.bf16.mxu0 %v7064_v35  ;;  %v4308_v29 = vadd.f32 %v4307_v1, %v4265_v24  ;;  %v7092_v35 = vld [vmem:[%s9514_s1 + $0x1168] ss:$16 sps:$4 sm:$0xff]  }
 0x25d   :  { %4840 = vmatprep.subr.bf16.mxu1 %v7067_v36  ;;  %v7095_v36 = vld [vmem:[%s9514_s1 + $0x1368] ss:$16 sps:$4 sm:$0xff]   ;;  %v9314_v52 = vpop.f32.mrf.mxu1 }
 0x25f   :  { %4798 = vmatpush1.bf16.msra.mxu0 %v7062_v39  ;;  %v7100_v39 = vld [vmem:[%s9514_s1 + $0x114c] ss:$16 sps:$4 sm:$0xff]  }
 0x260   :  { %4841 = vmatpush1.bf16.msra.mxu1 %v7065_v42  ;;  %4799 = vmatprep.subr.bf16.mxu0 %v7070_v45  ;;  %v4304_v42 = vadd.f32 %v9215_v44, %v4261_v27  ;;  %v4351_v45 = vadd.f32 %v4350_v14, %v4308_v29  ;;  %v7106_v44 = vld [vmem:[%s9514_s1 + $0x112c] ss:$16 sps:$4 sm:$0xff]  }
 0x261   :  { %4842 = vmatprep.subr.bf16.mxu1 %v7073_v48  ;;  %v7098_v48 = vld [vmem:[%s9514_s1 + $0x1148] ss:$16 sps:$4 sm:$0xff]  }
 0x263   :  { %4800 = vmatpush2.bf16.msra.mxu0 %v7068_v53  ;;  %v7109_v53 = vld [vmem:[%s9514_s1 + $0x132c] ss:$16 sps:$4 sm:$0xff]  }
 0x264   :  { %4843 = vmatpush2.bf16.msra.mxu1 %v7071_v54  ;;  %4801 = vmatprep.subr.bf16.mxu0 %v7076_v37  ;;  %v4347_v54 = vadd.f32 %v9242_v58, %v4304_v42  ;;  %v4394_v37 = vadd.f32 %v4393_v43, %v4351_v45  ;;  %v7112_v58 = vld [vmem:[%s9514_s1 + $0x110c] ss:$16 sps:$4 sm:$0xff]  }
 0x265   :  { %4844 = vmatprep.subr.bf16.mxu1 %v7079_v25  ;;  %v691_v25 = vsub.s32 0, %v9170_v17  ;;  %v7136_v42 = vld [vmem:[%s9516_s3 + $0xe8] sm:$0xff]  }
 0x266   :  { %v4390_v57 = vadd.f32 %v4389_v15, %v4347_v54  ;;  %v7137_v45 = vld [vmem:[%s9516_s3 + $0xa8] sm:$0xff]   ;;  %v7139_v54 = vld [vmem:[%s9516_s3 + $0xa0] sm:$0xff]  }
 0x267   :  { %4802 = vmatpush2.bf16.msra.mxu0 %v7074_v62  ;;  %v4436_v62 = vpop.f32.mrf.mxu1 }
 0x268   :  { %4845 = vmatpush2.bf16.msra.mxu1 %v7077_v0  ;;  %4803 = vmatprep.subr.bf16.mxu0 %v7082_v46  ;;  %v7115_v0 = vld [vmem:[%s9514_s1 + $0x130c] ss:$16 sps:$4 sm:$0xff]   ;;  %v4437_v1 = vadd.f32 %v4436_v62, %v4394_v37  ;;  %v692_v46 = vrot.slane %v9196_v30, %v691_v25  ;;  %v7131_v25 = vld [vmem:[%s9516_s3] sm:$0xff]   ;;  %v7142_v62 = vld [vmem:[%s9516_s3 + $0xd0] sm:$0xff]  }
 0x269   :  { %4846 = vmatprep.subr.bf16.mxu1 %v7085_v34  ;;  %v4433_v34 = vadd.f32 %v4432_v38, %v4390_v57  ;;  %v7129_v37 = vld [vmem:[%s9516_s3 + $0x8] sm:$0xff]  }
 0x26b   :  { %4804 = vmatpush2.bf16.msra.mxu0 %v7080_v7  ;;  %v4048_v7 = vadd.f32 %v9040_v31, %v692_v46  ;;  %v4870_v11 = vmax.f32 %v4433_v34, 0.0  ;;  %v7118_v31 = vld [vmem:[%s9516_s3 + $0x70] sm:$0xff]   ;;  %v7147_v34 = vld [vmem:[%s9516_s3 + $0x80] sm:$0xff]  }
 0x26c   :  { %4847 = vmatpush2.bf16.msra.mxu1 %v7083_v10  ;;  %4805 = vmatprep.subr.bf16.mxu0 %v7088_v47  ;;  %v7116_v10 = vld [vmem:[%s9516_s3 + $0x78] sm:$0xff]   ;;  %v4874_v47 = vmax.f32 %v4437_v1, 0.0  ;;  %v7145_v1 = vld [vmem:[%s9516_s3 + $0x88] sm:$0xff]  }
 0x26d   :  { %4848 = vmatprep.subr.bf16.mxu1 %v7091_v8  ;;  %v4044_v8 = vadd.f32 %v9010_v20, %v692_v46  ;;  %v4091_v14 = vadd.f32 %v9064_v40, %v4048_v7  ;;  %v7178_v20 = vld [vmem:[%s9515_s0 + $0x40] ss:$80 sps:$4 sm:$0xff]  }
 0x26e   :  { %v4878_v15 = vpack.c.bf16 %v4874_v47, %v4870_v11  ;;  %v7119_v40 = vld [vmem:[%s9516_s3 + $0x30] sm:$0xff]   ;;  %v7146_v46 = vld [vmem:[%s9516_s3 + $0xc0] sm:$0xff]   ;;  %v4516_v11 = vpop.f32.mrf.mxu1 }
 0x26f   :  { %4806 = vmatpush2.bf16.msra.mxu0 %v7086_v19  ;;  %v4087_v18 = vadd.f32 %v9032_v28, %v4044_v8  ;;  %v4134_v19 = vadd.f32 %v9104_v55, %v4091_v14  ;;  %v7120_v55 = vld [vmem:[%s9516_s3 + $0x68] sm:$0xff]   ;;  %v7149_v7 = vld [vmem:[%s9518_s5 + $0x30] sm:$0xff]   ;;  %v7151_v47 = vld [vmem:[%s9518_s5 + $0x20] sm:$0xff]   ;;  %v4473_v8 = vpop.f32.mrf.mxu0 }
 0x270   :  { %4849 = vmatpush2.bf16.msra.mxu1 %v7089_v22  ;;  %4807 = vmatprep.subr.bf16.mxu0 %v7094_v60  ;;  %v7179_v22 = vld [vmem:[%s9515_s0 + $0x48] ss:$80 sps:$4 sm:$0xff]   ;;  %v4518_v14 = vpop.f32.mrf.mxu1 }
 0x271   :  { %4850 = vmatprep.subr.bf16.mxu1 %v7097_v9  ;;  %v4130_v28 = vadd.f32 %v9066_v41, %v4087_v18  ;;  %v4177_v60 = vadd.f32 %v9134_v2, %v4134_v19  ;;  %v7121_v9 = vld [vmem:[%s9516_s3 + $0x28] sm:$0xff]   ;;  %v7122_v41 = vld [vmem:[%s9516_s3 + $0x60] sm:$0xff]  }
 0x272   :  { %v7123_v2 = vld [vmem:[%s9516_s3 + $0x20] sm:$0xff]  }
 0x273   :  { %4808 = vmatpush2.bf16.msra.mxu0 %v7092_v35  ;;  %v4173_v24 = vadd.f32 %v9090_v50, %v4130_v28  ;;  %v4220_v27 = vadd.f32 %v9168_v16, %v4177_v60  ;;  %v7132_v35 = vld [vmem:[%s9516_s3 + $0xf8] sm:$0xff]   ;;  %v7134_v16 = vld [vmem:[%s9516_s3 + $0xf0] sm:$0xff]  }
 0x274   :  { %4851 = vmatpush2.bf16.msra.mxu1 %v7095_v36  ;;  %4809 = vmatprep.subr.bf16.mxu0 %v7100_v39  ;;  %v7133_v50 = vld [vmem:[%s9516_s3 + $0xb8] sm:$0xff]  }
 0x275   :  { %4852 = vmatprep.subr.bf16.mxu1 %v7103_v21  ;;  %v4216_v29 = vadd.f32 %v9136_v3, %v4173_v24  ;;  %v4263_v36 = vadd.f32 %v9198_v32, %v4220_v27  ;;  %v7124_v3 = vld [vmem:[%s9516_s3 + $0x58] sm:$0xff]   ;;  %v7135_v21 = vld [vmem:[%s9516_s3 + $0xb0] sm:$0xff]   ;;  %v703_v27 = vsub.s32 3, %v9170_v17 }
 0x276   :  { %v7125_v32 = vld [vmem:[%s9516_s3 + $0x18] sm:$0xff]  }
 0x277   :  { %4810 = vmatpush2.bf16.msra.mxu0 %v7098_v48  ;;  %v4259_v38 = vadd.f32 %v9160_v13, %v4216_v29  ;;  %v4306_v39 = vadd.f32 %v9233_v56, %v4263_v36  ;;  %v7126_v13 = vld [vmem:[%s9516_s3 + $0x50] sm:$0xff]  }
 0x278   :  { %4853 = vmatpush2.bf16.msra.mxu1 %v7101_v49  ;;  %4811 = vmatprep.subr.bf16.mxu0 %v7106_v44  ;;  %v7127_v48 = vld [vmem:[%s9516_s3 + $0x10] sm:$0xff]  }
 0x279   :  { %4854 = vmatprep.subr.bf16.mxu1 %v7109_v53  ;;  %v4302_v43 = vadd.f32 %v9200_v33, %v4259_v38  ;;  %v4349_v56 = vadd.f32 %v9259_v4, %v4306_v39  ;;  %v7138_v33 = vld [vmem:[%s9516_s3 + $0xe0] sm:$0xff]   ;;  %v7128_v4 = vld [vmem:[%s9516_s3 + $0x48] sm:$0xff]  }
 0x27b   :  { %4812 = vmatpush2.bf16.msra.mxu0 %v7104_v59  ;;  %v4345_v49 = vadd.f32 %v9224_v51, %v4302_v43  ;;  %v4392_v44 = vadd.f32 %v9292_v26, %v4349_v56  ;;  %v7130_v26 = vld [vmem:[%s9516_s3 + $0x40] sm:$0xff]  }
 0x27c   :  { %4855 = vmatpush2.bf16.msra.mxu1 %v7107_v61  ;;  %4813 = vmatprep.subr.bf16.mxu0 %v7112_v58  ;;  %v7143_v58 = vld [vmem:[%s9516_s3 + $0x90] sm:$0xff]  }
 0x27d   :  { %4856 = vmatprep.subr.bf16.mxu1 %v7115_v0  ;;  %v4388_v53 = vadd.f32 %v9261_v5, %v4345_v49  ;;  %v4435_v51 = vadd.f32 %v9314_v52, %v4392_v44  ;;  %v7140_v52 = vld [vmem:[%s9516_s3 + $0xd8] sm:$0xff]   ;;  %v7144_v0 = vld [vmem:[%s9516_s3 + $0xc8] sm:$0xff]  }
 0x27f   :  { %4814 = vmatpush2.bf16.msra.mxu0 %v7110_v63  ;;  %v4431_v5 = vadd.f32 %v9284_v23, %v4388_v53  ;;  %v4873_v57 = vmax.f32 %v4435_v51, 0.0  ;;  %v7141_v23 = vld [vmem:[%s9516_s3 + $0x98] sm:$0xff]   ;;  %v7180_v63 = vmov 0.0  }
 0x280   :  { %4857 = vmatpush2.bf16.msra.mxu1 %v7113_v6  ;;  %6051 = vmatprep.subr.bf16.mxu0 %v7116_v10  ;;  %v7148_v6 = vld [vmem:[%s9518_s5 + $0x38] sm:$0xff]   ;;  %v7150_v10 = vld [vmem:[%s9518_s5 + $0x28] sm:$0xff]  }
 0x281   :  { %6073 = vmatprep.subr.bf16.mxu1 %v7132_v35  ;;  %v4869_v59 = vmax.f32 %v4431_v5, 0.0  ;;  %v704_v35 = vrot.slane %v9196_v30, %v703_v27 }
 0x282   :  { %4816 = vmatmul.mubr.bf16.vlgmr.msra.gmra.mxu0 %v7178_v20 }
 0x283   :  { %4859 = vmatmul.mubr.bf16.vlgmr.msra.gmra.mxu1 %v7179_v22  ;;  %6052 = vmatpush3.bf16.msra.mxu0 %v7117_v12  ;;  %v4877_v61 = vpack.c.bf16 %v4873_v57, %v4869_v59  ;;  %v4475_v12 = vpop.f32.mrf.mxu0 }
 0x284   :  { %5176 = vmatprep.mubr.bf16.mxu0 %v4878_v15  ;;  %6053 = vmatprep.subr.bf16.mxu0 %v7118_v31  ;;  %v4520_v15 = vpop.f32.mrf.mxu1 }
 0x285   :  { %6074 = vmatpush3.bf16.msra.mxu1 %v7133_v50  ;;  %v4477_v31 = vpop.f32.mrf.mxu0 }
 0x286   :  { %6075 = vmatprep.subr.bf16.mxu1 %v7134_v16  ;;  %v4522_v19 = vpop.f32.mrf.mxu1 }
 0x287   :  { %6054 = vmatpush3.bf16.msra.mxu0 %v7119_v40  ;;  %v4479_v18 = vpop.f32.mrf.mxu0 }
 0x288   :  { %6055 = vmatprep.subr.bf16.mxu0 %v7120_v55  ;;  %v4602_v22 = vpop.f32.mrf.mxu1  ;;  %v4480_v43 = vadd.f32 %v4479_v18, %v704_v35 }
 0x289   :  { %6076 = vmatpush3.bf16.msra.mxu1 %v7135_v21  ;;  %v4559_v20 = vpop.f32.mrf.mxu0 }
 0x28a   :  { %6077 = vmatprep.subr.bf16.mxu1 %v7136_v42  ;;  %v4604_v28 = vpop.f32.mrf.mxu1 }
 0x28b   :  { %6056 = vmatpush3.bf16.msra.mxu0 %v7121_v9  ;;  %v4561_v40 = vpop.f32.mrf.mxu0 }
 0x28c   :  { %6057 = vmatprep.subr.bf16.mxu0 %v7122_v41  ;;  %v4606_v60 = vpop.f32.mrf.mxu1  ;;  %v699_v41 = vsub.s32 2, %v9170_v17 }
 0x28d   :  { %6078 = vmatpush3.bf16.msra.mxu1 %v7137_v45  ;;  %v4563_v55 = vpop.f32.mrf.mxu0 }
 0x28e   :  { %6079 = vmatprep.subr.bf16.mxu1 %v7138_v33  ;;  %v4608_v24 = vpop.f32.mrf.mxu1  ;;  %v700_v50 = vrot.slane %v9196_v30, %v699_v41 }
 0x28f   :  { %6058 = vmatpush3.bf16.msra.mxu0 %v7123_v2  ;;  %v4565_v9 = vpop.f32.mrf.mxu0 }
 0x290   :  { %6059 = vmatprep.subr.bf16.mxu0 %v7124_v3  ;;  %v4476_v3 = vadd.f32 %v4475_v12, %v704_v35  ;;  %v4474_v38 = vadd.f32 %v4473_v8, %v700_v50 }
 0x291   :  { %6080 = vmatpush3.bf16.msra.mxu1 %v7139_v54 }
 0x292   :  { %6081 = vmatprep.subr.bf16.mxu1 %v7140_v52  ;;  %v4519_v42 = vadd.f32 %v4518_v14, %v4476_v3 }
 0x293   :  { %6060 = vmatpush3.bf16.msra.mxu0 %v7125_v32  ;;  %v4478_v32 = vadd.f32 %v4477_v31, %v700_v50 }
 0x294   :  { %6061 = vmatprep.subr.bf16.mxu0 %v7126_v13  ;;  %v4517_v13 = vadd.f32 %v4516_v11, %v4474_v38  ;;  %v4562_v17 = vadd.f32 %v4561_v40, %v4519_v42  ;;  %v7154_v42 = vld [vmem:[%s9518_s5 + $0x8] sm:$0xff]  }
 0x295   :  { %6082 = vmatpush3.bf16.msra.mxu1 %v7141_v23 }
 0x296   :  { %6083 = vmatprep.subr.bf16.mxu1 %v7142_v62  ;;  %v4560_v33 = vadd.f32 %v4559_v20, %v4517_v13  ;;  %v4605_v30 = vadd.f32 %v4604_v28, %v4562_v17 }
 0x297   :  { %6062 = vmatpush3.bf16.msra.mxu0 %v7127_v48  ;;  %v4521_v48 = vadd.f32 %v4520_v15, %v4478_v32  ;;  %v7153_v32 = vld [vmem:[%s9518_s5 + $0x10] sm:$0xff]  }
 0x298   :  { %6063 = vmatprep.subr.bf16.mxu0 %v7128_v4  ;;  %v4523_v4 = vadd.f32 %v4522_v19, %v4480_v43  ;;  %v7155_v43 = vld [vmem:[%s9518_s5] sm:$0xff]  }
 0x299   :  { %6084 = vmatpush3.bf16.msra.mxu1 %v7143_v58  ;;  %v4564_v53 = vadd.f32 %v4563_v55, %v4521_v48 }
 0x29a   :  { %6085 = vmatprep.subr.bf16.mxu1 %v7144_v0  ;;  %v4566_v54 = vadd.f32 %v4565_v9, %v4523_v4 }
 0x29b   :  { %6064 = vmatpush3.bf16.msra.mxu0 %v7129_v37  ;;  %v4603_v37 = vadd.f32 %v4602_v22, %v4560_v33  ;;  %v4607_v5 = vadd.f32 %v4606_v60, %v4564_v53 }
 0x29c   :  { %6065 = vmatprep.subr.bf16.mxu0 %v7130_v26  ;;  %v4609_v59 = vadd.f32 %v4608_v24, %v4566_v54 }
 0x29d   :  { %6086 = vmatpush3.bf16.msra.mxu1 %v7145_v1 }
 0x29e   :  { %6087 = vmatprep.subr.bf16.mxu1 %v7146_v46 }
 0x29f   :  { %6066 = vmatpush3.bf16.msra.mxu0 %v7131_v25 }
 0x2a0   :  { %6104 = vmatprep.subr.bf16.mxu0 %v7180_v63 }
 0x2a1   :  { %6088 = vmatpush3.bf16.msra.mxu1 %v7147_v34 }
 0x2a2   :  { %5177 = vmatmul.mubr.bf16.vlgmr.msra.gmra.mxu0 %v4877_v61 }
 0x2a3   :  { %6105 = vmatpush3.bf16.msra.mxu0 %v7148_v6  ;;  %6120 = vmatprep.mubr.msk.bf16.mxu0 %vm7181_vm0, %v7180_v63 }
 0x2a4   :  { %6106 = vmatprep.subr.bf16.mxu0 %v7180_v63 }
 0x2a7   :  { %6107 = vmatpush3.bf16.msra.mxu0 %v7149_v7 }
 0x2a8   :  { %6108 = vmatprep.subr.bf16.mxu0 %v7180_v63 }
 0x2ab   :  { %6109 = vmatpush3.bf16.msra.mxu0 %v7150_v10 }
 0x2ac   :  { %6110 = vmatprep.subr.bf16.mxu0 %v7180_v63 }
 0x2af   :  { %6111 = vmatpush3.bf16.msra.mxu0 %v7151_v47 }
 0x2b0   :  { %6112 = vmatprep.subr.bf16.mxu0 %v7180_v63 }
 0x2c2   :  { %v4645_v29 = vpop.f32.mrf.mxu0 }
 0x2c3   :  { %v4688_v2 = vpop.f32.mrf.mxu1  ;;  %v4646_v57 = vadd.f32 %v4645_v29, %v4603_v37 }
 0x2c4   :  { %v4647_v16 = vpop.f32.mrf.mxu0 }
 0x2c5   :  { %v4690_v36 = vpop.f32.mrf.mxu1  ;;  %v4648_v25 = vadd.f32 %v4647_v16, %v4605_v30  ;;  %v4689_v0 = vadd.f32 %v4688_v2, %v4646_v57 }
 0x2c6   :  { %v4649_v39 = vpop.f32.mrf.mxu0 }
 0x2c7   :  { %v4692_v21 = vpop.f32.mrf.mxu1  ;;  %v4650_v61 = vadd.f32 %v4649_v39, %v4607_v5  ;;  %v4691_v62 = vadd.f32 %v4690_v36, %v4648_v25 }
 0x2c8   :  { %v4651_v56 = vpop.f32.mrf.mxu0 }
 0x2c9   :  { %v4694_v45 = vpop.f32.mrf.mxu1  ;;  %v4652_v58 = vadd.f32 %v4651_v56, %v4609_v59  ;;  %v4693_v1 = vadd.f32 %v4692_v21, %v4650_v61  ;;  %v7152_v21 = vld [vmem:[%s9518_s5 + $0x18] sm:$0xff]   ;;  %v6042_v61 = vld [vmem:[%s9520_s6] ss:$0 sm:$0xff] }
 0x2ca   :  { %6113 = vmatpush3.bf16.msra.mxu0 %v7152_v21 }
 0x2cb   :  { %v4695_v10 = vadd.f32 %v4694_v45, %v4652_v58  ;;  %6114 = vmatprep.subr.bf16.mxu0 %v7180_v63 }
 0x2ce   :  { %6115 = vmatpush3.bf16.msra.mxu0 %v7153_v32 }
 0x2cf   :  { %6116 = vmatprep.subr.bf16.mxu0 %v7180_v63 }
 0x2d2   :  { %6117 = vmatpush3.bf16.msra.mxu0 %v7154_v42 }
 0x2d3   :  { %6118 = vmatprep.subr.bf16.mxu0 %v7180_v63 }
 0x2d6   :  { %6119 = vmatpush3.bf16.msra.mxu0 %v7155_v43 }
 0x302   :  { %v4731_v49 = vpop.f32.mrf.mxu0 }
 0x303   :  { %v4774_v44 = vpop.f32.mrf.mxu1  ;;  %v4732_v34 = vadd.f32 %v4731_v49, %v4689_v0  ;;  %v6009_v49 = vld [vmem:[%s9519_s4] ss:$0 sm:$0xff] }
 0x304   :  { %v4733_v51 = vpop.f32.mrf.mxu0 }
 0x305   :  { %v4776_v26 = vpop.f32.mrf.mxu1  ;;  %v4734_v46 = vadd.f32 %v4733_v51, %v4691_v62  ;;  %v4775_v31 = vadd.f32 %v4774_v44, %v4732_v34 }
 0x306   :  { %v4735_v52 = vpop.f32.mrf.mxu0 }
 0x307   :  { %v4778_v23 = vpop.f32.mrf.mxu1  ;;  %v4736_v47 = vadd.f32 %v4735_v52, %v4693_v1  ;;  %v4777_v12 = vadd.f32 %v4776_v26, %v4734_v46 }
 0x308   :  { %v4737_v6 = vpop.f32.mrf.mxu0 }
 0x309   :  { %v4780_v7 = vpop.f32.mrf.mxu1  ;;  %v4738_v14 = vadd.f32 %v4737_v6, %v4695_v10  ;;  %v4779_v19 = vadd.f32 %v4778_v23, %v4736_v47 }
 0x30b   :  { %v4781_v55 = vadd.f32 %v4780_v7, %v4738_v14 }
 0x342   :  { %v4817_v8 = vpop.f32.mrf.mxu0 }
 0x343   :  { %v4860_v11 = vpop.f32.mrf.mxu1  ;;  %v4818_v22 = vadd.f32 %v4817_v8, %v4775_v31 }
 0x344   :  { %v4819_v15 = vpop.f32.mrf.mxu0 }
 0x345   :  { %v4862_v18 = vpop.f32.mrf.mxu1  ;;  %v4820_v20 = vadd.f32 %v4819_v15, %v4777_v12  ;;  %v4861_v29 = vadd.f32 %v4860_v11, %v4818_v22 }
 0x346   :  { %v4821_v40 = vpop.f32.mrf.mxu0 }
 0x347   :  { %v4864_v28 = vpop.f32.mrf.mxu1  ;;  %v4822_v60 = vadd.f32 %v4821_v40, %v4779_v19  ;;  %v4863_v24 = vadd.f32 %v4862_v18, %v4820_v20  ;;  %v4871_v3 = vmax.f32 %v4861_v29, 0.0 }
 0x348   :  { %v4823_v9 = vpop.f32.mrf.mxu0 }
 0x349   :  { %v4865_v27 = vadd.f32 %v4864_v28, %v4822_v60  ;;  %v4824_v41 = vadd.f32 %v4823_v9, %v4781_v55  ;;  %v4866_v2 = vpop.f32.mrf.mxu1  ;;  %v4872_v16 = vmax.f32 %v4863_v24, 0.0 }
 0x34b   :  { %v4867_v35 = vadd.f32 %v4866_v2, %v4824_v41  ;;  %v4875_v50 = vmax.f32 %v4865_v27, 0.0 }
 0x34d   :  { %v4876_v36 = vmax.f32 %v4867_v35, 0.0  ;;  %v4879_v39 = vpack.c.bf16 %v4875_v50, %v4871_v3 }
 0x34f   :  { %v4880_v38 = vpack.c.bf16 %v4876_v36, %v4872_v16 }
 0x351   :  { %5217 = vmatprep.mubr.bf16.mxu1 %v4880_v38 }
 0x352   :  { %5218 = vmatmul.mubr.bf16.vlgmr.msra.gmra.mxu1 %v4879_v39 }
 0x362   :  { %v6067_v13 = vpop.f32.mrf.mxu0 }
 0x364   :  { %v6068_v56 = vpop.f32.mrf.mxu0 }
 0x365   :  { %v6069_v33 = vadd.f32 %v6068_v56, %v6067_v13 }
 0x366   :  { %v6070_v45 = vpop.f32.mrf.mxu0 }
 0x367   :  { %v5179_v54 = vadd.f32 %v6069_v33, %v6009_v49 }
 0x368   :  { %v6071_v48 = vpop.f32.mrf.mxu0 }
 0x369   :  { %v6072_v4 = vadd.f32 %v6071_v48, %v6070_v45 }
 0x36b   :  { %v5182_v51 = vadd.f32 %v6072_v4, %v6009_v49 }
 0x412   :  { %v6089_v17 = vpop.f32.mrf.mxu1 }
 0x414   :  { %v6090_v44 = vpop.f32.mrf.mxu1 }
 0x415   :  { %v6091_v53 = vadd.f32 %v6090_v44, %v6089_v17 }
 0x416   :  { %v6092_v30 = vpop.f32.mrf.mxu1 }
 0x417   :  { %v5220_v26 = vadd.f32 %v6091_v53, %v5179_v54 }
 0x418   :  { %v6093_v37 = vpop.f32.mrf.mxu1 }
 0x419   :  { %v6094_v5 = vadd.f32 %v6093_v37, %v6092_v30  ;;  %v5226_v25 = vmax.f32 %v5220_v26, 0.0 }
 0x41b   :  { %v5223_v63 = vadd.f32 %v6094_v5, %v5182_v51 }
 0x41d   :  { %v5227_v57 = vmax.f32 %v5223_v63, 0.0 }
 0x41f   :  { %v5228_v59 = vpack.c.bf16 %v5227_v57, %v5226_v25 }
 0x421   :  { %6121 = vmatmul.mubr.bf16.vlgmr.msra.gmra.mxu0 %v5228_v59 }
 0x4e1   :  { %v5334_v52 = vpop.f32.mrf.mxu0 }
 0x4e2   :  { %v5335_v23 = vadd.f32 %v6042_v61, %v5334_v52 }
 0x4e3   :  { %v6122_v62 = vpop.f32.mrf.mxu0 }
 0x4e4   :  { %7156 = vtanh.f32 %v5335_v23 }
 0x4e5   :  { %v5337_v58 = vpop.f32.mrf.mxu0 }
 0x4e6   :  { %v5338_v0 = vadd.f32 %v6042_v61, %v5337_v58 }
 0x4e7   :  { %v6123_v1 = vpop.f32.mrf.mxu0 }
 0x4e8   :  { %7158 = vtanh.f32 %v5338_v0 }
 0x4f1   :  { %v7157_v46 = vpop.eup %7156 }
 0x4f2   :  { %5343 = vst [vmem:[%s9521_s7] sm:$0xff] %v7157_v46 }
 0x4f5   :  { %v7159_v34 = vpop.eup %7158 }
 0x4f6   :  { %5344 = vst [vmem:[%s9521_s7 + $0x8] sm:$0xff] %v7159_v34 }

</bundles_post_ra>
